<compile_context>
chip_gen: v5e
topology: v5e:2x2
jax: 0.10.0
libtpu: 0.0.40
codegen_flags: <defaults>
</compile_context>

<pallas_src>
import numpy as np

import jax
import jax.numpy as jnp
from jax.experimental import pallas as pl
from jax.experimental.pallas import tpu as pltpu


# Fixed model geometry (matches the TN(b, 24, 8, 8, 2) head fed by 32x32 input).
C_FEAT = 24          # backbone feature channels
C_MID = 8            # bottleneck mid channels
H_FEAT = W_FEAT = 8  # final feature map
BOND = 8             # tensor-train bond dimension
N_OUT = 2            # classifier outputs
G1 = 18              # padded 16x16 grid (stage-1 maps, stored with a zero ring)
G2 = 10              # padded  8x8 grid (stage-2 maps, stored with a zero ring)


# ----------------------------------------------------------------------------
# Fused kernel
# ----------------------------------------------------------------------------

def _conv3x3_acc(x, w_ref, grid_w):
    """3x3 'same' conv via 9 accumulated shifted-view dots (implicit im2col).

    x      : [cin, M] bf16, lane-dense columns laid out as (b, h, w) on a
             grid_w-wide padded grid whose 1-pixel ring is all zero.
    w_ref  : [9, cout, cin] bf16 (tap-major, BN scale pre-folded).
    Returns: [cout, M] f32.  Values on ring columns are junk; callers mask or
             drop them (they never feed a kept output).
    """
    cin, m = x.shape
    halo = grid_w + 1                                   # max |shift|
    z = jnp.zeros((cin, halo), x.dtype)
    xp = jnp.concatenate([z, x, z], axis=1)             # [cin, M + 2*halo]
    acc = None
    for t in range(9):
        i, j = divmod(t, 3)
        d = (i - 1) * grid_w + (j - 1)
        view = xp[:, halo + d: halo + d + m]            # x shifted by d (zero fill)
        part = jnp.dot(w_ref[t], view, preferred_element_type=jnp.float32)
        acc = part if acc is None else acc + part
    return acc


def _res_tn_kernel(cols0, w0, b0,
                   w1, b1, w2, b2, w3, b3, wp, bp,
                   w4, b4, w5, b5, w6, b6,
                   wa, dpat, pool, mask1, mask2, p12,
                   o_ref):
    relu = lambda v: jnp.maximum(v, 0.0)
    f32, bf16 = jnp.float32, jnp.bfloat16

    # --- Stem: 3x3 stride-2 conv as one GEMM on pre-gathered patch columns ---
    h0 = relu(jnp.dot(w0[...], cols0[...], preferred_element_type=f32) + b0[...])
    h0 = h0.astype(bf16)                                       # [24, B*18*18]

    # --- Bottleneck 1 (stride 2, projection shortcut) -------------------------
    a1 = relu(jnp.dot(w1[...], h0, preferred_element_type=f32) + b1[...])
    a1 = (a1 * mask1[...]).astype(bf16)                        # keep zero ring
    c2 = relu(_conv3x3_acc(a1, w2, G1) + b2[...]).astype(bf16)  # [8, B*18*18]
    c3 = jnp.dot(w3[...], c2, preferred_element_type=f32) + b3[...]
    sc = jnp.dot(wp[...], h0, preferred_element_type=f32) + bp[...]
    blk1 = relu(c3 + sc).astype(bf16)                          # [24, B*18*18]
    # stride-2 subsample + re-pack onto the padded 10x10 grid: one 0/1 GEMM.
    x2 = jnp.dot(blk1, p12[...], preferred_element_type=f32)   # [24, B*10*10]

    # --- Bottleneck 2 (stride 1, identity shortcut) ---------------------------
    x2b = x2.astype(bf16)
    a2 = relu(jnp.dot(w4[...], x2b, preferred_element_type=f32) + b4[...])
    a2 = (a2 * mask2[...]).astype(bf16)
    c5 = relu(_conv3x3_acc(a2, w5, G2) + b5[...]).astype(bf16)  # [8, B*10*10]
    c6 = jnp.dot(w6[...], c5, preferred_element_type=f32) + b6[...]
    feat = relu(c6 + x2)                                        # [24, B*10*10] f32

    # --- Tensor-network head --------------------------------------------------
    # A-contraction over channels as one GEMM; the B and C cores are folded
    # offline into dpat[n, r1, (b,h,w)], so the remaining contraction is one
    # masked multiply + sublane reduction + one tiny batch-pooling GEMM.
    x1 = jnp.dot(wa[...], feat, preferred_element_type=f32)     # [r1, B*10*10]
    q = jnp.sum(x1[None, :, :] * dpat[...], axis=1)             # [n, B*10*10]
    o_ref[...] = jnp.dot(q, pool[...], preferred_element_type=f32)   # [n, B]


# ----------------------------------------------------------------------------
# Wrapper-side glue (tiny XLA ops on the network input only)
# ----------------------------------------------------------------------------

def _stem_patch_columns(img):
    """im2col for the stride-2 stem conv, emitted directly in the padded
    (b, 18, 18) zero-ring column layout the fused kernel uses."""
    b = img.shape[0]
    xp = jnp.pad(img, ((0, 0), (0, 0), (1, 1), (1, 1)))               # [B,3,34,34]
    taps = [xp[:, :, i:i + 32:2, j:j + 32:2] for i in range(3) for j in range(3)]
    cols = jnp.stack(taps, axis=1)                                    # [B,9,3,16,16]
    cols = cols.transpose(1, 2, 0, 3, 4).reshape(27, b, 16, 16)       # [(tap,ci),B,16,16]
    cols = jnp.pad(cols, ((0, 0), (0, 0), (1, 1), (1, 1)))            # [27,B,18,18]
    return cols.reshape(27, b * G1 * G1).astype(jnp.bfloat16)


def make_forward(batch):
    @jax.jit
    def forward(img, ops):
        cols0 = _stem_patch_columns(img)
        n_inputs = 1 + len(ops)
        y = pl.pallas_call(
            _res_tn_kernel,
            out_shape=jax.ShapeDtypeStruct((N_OUT, batch), jnp.float32),
            in_specs=[pl.BlockSpec(memory_space=pltpu.MemorySpace.VMEM)] * n_inputs,
            out_specs=pl.BlockSpec(memory_space=pltpu.MemorySpace.VMEM),
        )(cols0, *ops)
        return y.T                                                    # [B, N_OUT]
    return forward


# ----------------------------------------------------------------------------
# Parameter preprocessing (BN fold, layout packing, constant tensors) — no jit
# ----------------------------------------------------------------------------

def prepare_ops(params, batch):
    def fold1x1(p):
        w = p["w"] * p["scale"]                                    # [1,1,ci,co]
        wk = w.reshape(w.shape[2], w.shape[3]).T                   # [co, ci]
        return wk.astype(jnp.bfloat16), p["bias"].reshape(-1, 1).astype(jnp.float32)

    def fold3x3(p):
        w = p["w"] * p["scale"]                                    # [3,3,ci,co]
        wk = w.transpose(0, 1, 3, 2).reshape(9, w.shape[3], w.shape[2])   # [9,co,ci]
        return wk.astype(jnp.bfloat16), p["bias"].reshape(-1, 1).astype(jnp.float32)

    def fold_stem(p):
        w = p["w"] * p["scale"]                                    # [3,3,ci,co]
        wk = w.transpose(3, 0, 1, 2).reshape(w.shape[3], -1)       # [co, 9*ci]
        return wk.astype(jnp.bfloat16), p["bias"].reshape(-1, 1).astype(jnp.float32)

    w0, b0 = fold_stem(params["stem"])
    w1, b1 = fold1x1(params["block1"]["conv1"])
    w2, b2 = fold3x3(params["block1"]["conv2"])
    w3, b3 = fold1x1(params["block1"]["conv3"])
    wp, bp = fold1x1(params["block1"]["proj"])
    w4, b4 = fold1x1(params["block2"]["conv1"])
    w5, b5 = fold3x3(params["block2"]["conv2"])
    w6, b6 = fold1x1(params["block2"]["conv3"])

    # TN head: pre-contract the B and C cores into D[n, r1, h, w] and lay it
    # onto the padded (b, 10, 10) column grid (zero on the ring, tiled over b).
    tn = params["tn"]
    wa = jnp.asarray(tn["A"].T, jnp.float32)                       # [r1, C]
    b3c = tn["B"].reshape(W_FEAT, BOND, BOND)                      # [w, r1, r2]
    c3c = tn["C"].reshape(H_FEAT, BOND, N_OUT)                     # [h, r2, n]
    d = jnp.einsum("wrs,hsn->nrhw", b3c, c3c)                      # [n, r1, h, w]
    dg = jnp.zeros((N_OUT, BOND, G2, G2), jnp.float32)
    dg = dg.at[:, :, 1:1 + H_FEAT, 1:1 + W_FEAT].set(d)
    dpat = jnp.tile(dg.reshape(N_OUT, BOND, G2 * G2), (1, 1, batch))   # [n,r1,B*100]

    # Zero-ring masks (keep implicit SAME padding exact for the 3x3 convs).
    m1 = np.zeros((G1, G1), np.float32); m1[1:G1 - 1, 1:G1 - 1] = 1.0
    mask1 = jnp.asarray(np.tile(m1.reshape(-1), batch)[None, :])       # [1, B*324]
    m2 = np.zeros((G2, G2), np.float32); m2[1:G2 - 1, 1:G2 - 1] = 1.0
    mask2 = jnp.asarray(np.tile(m2.reshape(-1), batch)[None, :])       # [1, B*100]

    # Stride-2 spatial selection: padded 18x18 grid -> padded 10x10 grid.
    p12 = np.zeros((batch * G1 * G1, batch * G2 * G2), np.float32)
    for b in range(batch):
        for ho in range(H_FEAT):
            for wo in range(W_FEAT):
                src = b * G1 * G1 + (2 * ho + 1) * G1 + (2 * wo + 1)
                dst = b * G2 * G2 + (ho + 1) * G2 + (wo + 1)
                p12[src, dst] = 1.0
    p12 = jnp.asarray(p12, jnp.bfloat16)

    # Per-batch lane-segment pooling for the TN head's final sum.
    pool = np.zeros((batch * G2 * G2, batch), np.float32)
    for b in range(batch):
        pool[b * G2 * G2:(b + 1) * G2 * G2, b] = 1.0
    pool = jnp.asarray(pool)

    return (w0, b0, w1, b1, w2, b2, w3, b3, wp, bp,
            w4, b4, w5, b5, w6, b6,
            wa, dpat, pool, mask1, mask2, p12)


# ----------------------------------------------------------------------------
# Deterministic parameter init (same structure/math as the previous version)
# ----------------------------------------------------------------------------

def _conv_params(key, kh, kw, cin, cout):
    std = (2.0 / (kh * kw * cin)) ** 0.5
    return {
        "w": std * jax.random.normal(key, (kh, kw, cin, cout), jnp.float32),
        "scale": jnp.ones((cout,), jnp.float32),   # folded BatchNorm gamma/sqrt(var)
        "bias": jnp.zeros((cout,), jnp.float32),   # folded BatchNorm beta - mean*scale
    }


def init_params(key):
    ks = jax.random.split(key, 11)
    return {
        "stem": _conv_params(ks[0], 3, 3, 3, C_FEAT),
        "block1": {
            "conv1": _conv_params(ks[1], 1, 1, C_FEAT, C_MID),
            "conv2": _conv_params(ks[2], 3, 3, C_MID, C_MID),
            "conv3": _conv_params(ks[3], 1, 1, C_MID, C_FEAT),
            "proj": _conv_params(ks[4], 1, 1, C_FEAT, C_FEAT),
        },
        "block2": {
            "conv1": _conv_params(ks[5], 1, 1, C_FEAT, C_MID),
            "conv2": _conv_params(ks[6], 3, 3, C_MID, C_MID),
            "conv3": _conv_params(ks[7], 1, 1, C_MID, C_FEAT),
        },
        "tn": {
            "A": 0.1 * jax.random.normal(ks[8], (C_FEAT, BOND), jnp.float32),
            "B": 0.1 * jax.random.normal(ks[9], (W_FEAT * BOND, BOND), jnp.float32),
            "C": 0.1 * jax.random.normal(ks[10], (H_FEAT * BOND, N_OUT), jnp.float32),
        },
    }


if __name__ == "__main__":
    key = jax.random.PRNGKey(0)
    pkey, xkey = jax.random.split(key)
    batch = 2
    params = init_params(pkey)
    ops = prepare_ops(params, batch)
    img = jax.random.normal(xkey, (batch, 3, 32, 32), jnp.float32)   # NCHW (PyTorch)
    fwd = make_forward(batch)
    out = jax.block_until_ready(fwd(img, ops))
    assert out.shape == (batch, N_OUT), out.shape
    assert bool(jnp.all(jnp.isfinite(out)))
    print("KERNEL_OK")
</pallas_src>

<mosaic_0001>
module attributes {stable_mosaic.version = 11 : i64} {
  func.func @_res_tn_kernel(%arg0: memref<27x648xbf16, #tpu.memory_space<vmem>>, %arg1: memref<24x27xbf16, #tpu.memory_space<vmem>>, %arg2: memref<24x1xf32, #tpu.memory_space<vmem>>, %arg3: memref<8x24xbf16, #tpu.memory_space<vmem>>, %arg4: memref<8x1xf32, #tpu.memory_space<vmem>>, %arg5: memref<9x8x8xbf16, #tpu.memory_space<vmem>>, %arg6: memref<8x1xf32, #tpu.memory_space<vmem>>, %arg7: memref<24x8xbf16, #tpu.memory_space<vmem>>, %arg8: memref<24x1xf32, #tpu.memory_space<vmem>>, %arg9: memref<24x24xbf16, #tpu.memory_space<vmem>>, %arg10: memref<24x1xf32, #tpu.memory_space<vmem>>, %arg11: memref<8x24xbf16, #tpu.memory_space<vmem>>, %arg12: memref<8x1xf32, #tpu.memory_space<vmem>>, %arg13: memref<9x8x8xbf16, #tpu.memory_space<vmem>>, %arg14: memref<8x1xf32, #tpu.memory_space<vmem>>, %arg15: memref<24x8xbf16, #tpu.memory_space<vmem>>, %arg16: memref<24x1xf32, #tpu.memory_space<vmem>>, %arg17: memref<8x24xf32, #tpu.memory_space<vmem>>, %arg18: memref<2x8x200xf32, #tpu.memory_space<vmem>>, %arg19: memref<200x2xf32, #tpu.memory_space<vmem>>, %arg20: memref<1x648xf32, #tpu.memory_space<vmem>>, %arg21: memref<1x200xf32, #tpu.memory_space<vmem>>, %arg22: memref<648x200xbf16, #tpu.memory_space<vmem>>, %arg23: memref<2x2xf32, #tpu.memory_space<vmem>>) attributes {dimension_semantics = [], scalar_prefetch = 0 : i64, scratch_operands = 0 : i64, tpu.core_type = #tpu.core_type<tc>} {
    %c0 = arith.constant 0 : index
    %c0_0 = arith.constant 0 : index
    %0 = vector.load %arg1[%c0, %c0_0] : memref<24x27xbf16, #tpu.memory_space<vmem>>, vector<24x27xbf16>
    %c0_1 = arith.constant 0 : index
    %c0_2 = arith.constant 0 : index
    %1 = vector.load %arg0[%c0_1, %c0_2] : memref<27x648xbf16, #tpu.memory_space<vmem>>, vector<27x648xbf16>
    %cst = arith.constant dense<0.000000e+00> : vector<24x648xf32>
    %2 = tpu.matmul %0, %1, %cst {dimension_numbers = #tpu.dot_dimension_numbers<[1], [0], [0], [1], [0, 0, 1, 1], [], []>} : vector<24x27xbf16>, vector<27x648xbf16>, vector<24x648xf32> -> vector<24x648xf32>
    %c0_3 = arith.constant 0 : index
    %c0_4 = arith.constant 0 : index
    %3 = vector.load %arg2[%c0_3, %c0_4] : memref<24x1xf32, #tpu.memory_space<vmem>>, vector<24x1xf32>
    %4 = vector.broadcast %3 : vector<24x1xf32> to vector<24x648xf32>
    %5 = arith.addf %2, %4 : vector<24x648xf32>
    %cst_5 = arith.constant 0.000000e+00 : f32
    %6 = vector.broadcast %cst_5 : f32 to vector<24x648xf32>
    %7 = arith.maximumf %5, %6 : vector<24x648xf32>
    %8 = arith.truncf %7 : vector<24x648xf32> to vector<24x648xbf16>
    %c0_6 = arith.constant 0 : index
    %c0_7 = arith.constant 0 : index
    %9 = vector.load %arg3[%c0_6, %c0_7] : memref<8x24xbf16, #tpu.memory_space<vmem>>, vector<8x24xbf16>
    %cst_8 = arith.constant dense<0.000000e+00> : vector<8x648xf32>
    %10 = tpu.matmul %9, %8, %cst_8 {dimension_numbers = #tpu.dot_dimension_numbers<[1], [0], [0], [1], [0, 0, 1, 1], [], []>} : vector<8x24xbf16>, vector<24x648xbf16>, vector<8x648xf32> -> vector<8x648xf32>
    %c0_9 = arith.constant 0 : index
    %c0_10 = arith.constant 0 : index
    %11 = vector.load %arg4[%c0_9, %c0_10] : memref<8x1xf32, #tpu.memory_space<vmem>>, vector<8x1xf32>
    %12 = vector.broadcast %11 : vector<8x1xf32> to vector<8x648xf32>
    %13 = arith.addf %10, %12 : vector<8x648xf32>
    %cst_11 = arith.constant 0.000000e+00 : f32
    %14 = vector.broadcast %cst_11 : f32 to vector<8x648xf32>
    %15 = arith.maximumf %13, %14 : vector<8x648xf32>
    %c0_12 = arith.constant 0 : index
    %c0_13 = arith.constant 0 : index
    %16 = vector.load %arg20[%c0_12, %c0_13] : memref<1x648xf32, #tpu.memory_space<vmem>>, vector<1x648xf32>
    %17 = vector.broadcast %16 : vector<1x648xf32> to vector<8x648xf32>
    %18 = arith.mulf %15, %17 : vector<8x648xf32>
    %19 = arith.truncf %18 : vector<8x648xf32> to vector<8x648xbf16>
    %cst_14 = arith.constant 0.000000e+00 : bf16
    %20 = vector.broadcast %cst_14 : bf16 to vector<8x19xbf16>
    %21 = tpu.concatenate %20, %19, %20 in 1 : vector<8x19xbf16>, vector<8x648xbf16>, vector<8x19xbf16> -> vector<8x686xbf16>
    %22 = vector.extract_strided_slice %21 {offsets = [0, 0], sizes = [8, 648], strides = [1, 1]} : vector<8x686xbf16> to vector<8x648xbf16>
    %c0_15 = arith.constant 0 : index
    %c0_16 = arith.constant 0 : index
    %c0_17 = arith.constant 0 : index
    %23 = vector.load %arg5[%c0_15, %c0_16, %c0_17] : memref<9x8x8xbf16, #tpu.memory_space<vmem>>, vector<1x8x8xbf16>
    %24 = vector.shape_cast %23 : vector<1x8x8xbf16> to vector<8x8xbf16>
    %cst_18 = arith.constant dense<0.000000e+00> : vector<8x648xf32>
    %25 = tpu.matmul %24, %22, %cst_18 {dimension_numbers = #tpu.dot_dimension_numbers<[1], [0], [0], [1], [0, 0, 1, 1], [], []>} : vector<8x8xbf16>, vector<8x648xbf16>, vector<8x648xf32> -> vector<8x648xf32>
    %26 = vector.extract_strided_slice %21 {offsets = [0, 1], sizes = [8, 648], strides = [1, 1]} : vector<8x686xbf16> to vector<8x648xbf16>
    %c1 = arith.constant 1 : index
    %c0_19 = arith.constant 0 : index
    %c0_20 = arith.constant 0 : index
    %27 = vector.load %arg5[%c1, %c0_19, %c0_20] : memref<9x8x8xbf16, #tpu.memory_space<vmem>>, vector<1x8x8xbf16>
    %28 = vector.shape_cast %27 : vector<1x8x8xbf16> to vector<8x8xbf16>
    %cst_21 = arith.constant dense<0.000000e+00> : vector<8x648xf32>
    %29 = tpu.matmul %28, %26, %cst_21 {dimension_numbers = #tpu.dot_dimension_numbers<[1], [0], [0], [1], [0, 0, 1, 1], [], []>} : vector<8x8xbf16>, vector<8x648xbf16>, vector<8x648xf32> -> vector<8x648xf32>
    %30 = arith.addf %25, %29 : vector<8x648xf32>
    %31 = vector.extract_strided_slice %21 {offsets = [0, 2], sizes = [8, 648], strides = [1, 1]} : vector<8x686xbf16> to vector<8x648xbf16>
    %c2 = arith.constant 2 : index
    %c0_22 = arith.constant 0 : index
    %c0_23 = arith.constant 0 : index
    %32 = vector.load %arg5[%c2, %c0_22, %c0_23] : memref<9x8x8xbf16, #tpu.memory_space<vmem>>, vector<1x8x8xbf16>
    %33 = vector.shape_cast %32 : vector<1x8x8xbf16> to vector<8x8xbf16>
    %cst_24 = arith.constant dense<0.000000e+00> : vector<8x648xf32>
    %34 = tpu.matmul %33, %31, %cst_24 {dimension_numbers = #tpu.dot_dimension_numbers<[1], [0], [0], [1], [0, 0, 1, 1], [], []>} : vector<8x8xbf16>, vector<8x648xbf16>, vector<8x648xf32> -> vector<8x648xf32>
    %35 = arith.addf %30, %34 : vector<8x648xf32>
    %36 = vector.extract_strided_slice %21 {offsets = [0, 18], sizes = [8, 648], strides = [1, 1]} : vector<8x686xbf16> to vector<8x648xbf16>
    %c3 = arith.constant 3 : index
    %c0_25 = arith.constant 0 : index
    %c0_26 = arith.constant 0 : index
    %37 = vector.load %arg5[%c3, %c0_25, %c0_26] : memref<9x8x8xbf16, #tpu.memory_space<vmem>>, vector<1x8x8xbf16>
    %38 = vector.shape_cast %37 : vector<1x8x8xbf16> to vector<8x8xbf16>
    %cst_27 = arith.constant dense<0.000000e+00> : vector<8x648xf32>
    %39 = tpu.matmul %38, %36, %cst_27 {dimension_numbers = #tpu.dot_dimension_numbers<[1], [0], [0], [1], [0, 0, 1, 1], [], []>} : vector<8x8xbf16>, vector<8x648xbf16>, vector<8x648xf32> -> vector<8x648xf32>
    %40 = arith.addf %35, %39 : vector<8x648xf32>
    %41 = vector.extract_strided_slice %21 {offsets = [0, 19], sizes = [8, 648], strides = [1, 1]} : vector<8x686xbf16> to vector<8x648xbf16>
    %c4 = arith.constant 4 : index
    %c0_28 = arith.constant 0 : index
    %c0_29 = arith.constant 0 : index
    %42 = vector.load %arg5[%c4, %c0_28, %c0_29] : memref<9x8x8xbf16, #tpu.memory_space<vmem>>, vector<1x8x8xbf16>
    %43 = vector.shape_cast %42 : vector<1x8x8xbf16> to vector<8x8xbf16>
    %cst_30 = arith.constant dense<0.000000e+00> : vector<8x648xf32>
    %44 = tpu.matmul %43, %41, %cst_30 {dimension_numbers = #tpu.dot_dimension_numbers<[1], [0], [0], [1], [0, 0, 1, 1], [], []>} : vector<8x8xbf16>, vector<8x648xbf16>, vector<8x648xf32> -> vector<8x648xf32>
    %45 = arith.addf %40, %44 : vector<8x648xf32>
    %46 = vector.extract_strided_slice %21 {offsets = [0, 20], sizes = [8, 648], strides = [1, 1]} : vector<8x686xbf16> to vector<8x648xbf16>
    %c5 = arith.constant 5 : index
    %c0_31 = arith.constant 0 : index
    %c0_32 = arith.constant 0 : index
    %47 = vector.load %arg5[%c5, %c0_31, %c0_32] : memref<9x8x8xbf16, #tpu.memory_space<vmem>>, vector<1x8x8xbf16>
    %48 = vector.shape_cast %47 : vector<1x8x8xbf16> to vector<8x8xbf16>
    %cst_33 = arith.constant dense<0.000000e+00> : vector<8x648xf32>
    %49 = tpu.matmul %48, %46, %cst_33 {dimension_numbers = #tpu.dot_dimension_numbers<[1], [0], [0], [1], [0, 0, 1, 1], [], []>} : vector<8x8xbf16>, vector<8x648xbf16>, vector<8x648xf32> -> vector<8x648xf32>
    %50 = arith.addf %45, %49 : vector<8x648xf32>
    %51 = vector.extract_strided_slice %21 {offsets = [0, 36], sizes = [8, 648], strides = [1, 1]} : vector<8x686xbf16> to vector<8x648xbf16>
    %c6 = arith.constant 6 : index
    %c0_34 = arith.constant 0 : index
    %c0_35 = arith.constant 0 : index
    %52 = vector.load %arg5[%c6, %c0_34, %c0_35] : memref<9x8x8xbf16, #tpu.memory_space<vmem>>, vector<1x8x8xbf16>
    %53 = vector.shape_cast %52 : vector<1x8x8xbf16> to vector<8x8xbf16>
    %cst_36 = arith.constant dense<0.000000e+00> : vector<8x648xf32>
    %54 = tpu.matmul %53, %51, %cst_36 {dimension_numbers = #tpu.dot_dimension_numbers<[1], [0], [0], [1], [0, 0, 1, 1], [], []>} : vector<8x8xbf16>, vector<8x648xbf16>, vector<8x648xf32> -> vector<8x648xf32>
    %55 = arith.addf %50, %54 : vector<8x648xf32>
    %56 = vector.extract_strided_slice %21 {offsets = [0, 37], sizes = [8, 648], strides = [1, 1]} : vector<8x686xbf16> to vector<8x648xbf16>
    %c7 = arith.constant 7 : index
    %c0_37 = arith.constant 0 : index
    %c0_38 = arith.constant 0 : index
    %57 = vector.load %arg5[%c7, %c0_37, %c0_38] : memref<9x8x8xbf16, #tpu.memory_space<vmem>>, vector<1x8x8xbf16>
    %58 = vector.shape_cast %57 : vector<1x8x8xbf16> to vector<8x8xbf16>
    %cst_39 = arith.constant dense<0.000000e+00> : vector<8x648xf32>
    %59 = tpu.matmul %58, %56, %cst_39 {dimension_numbers = #tpu.dot_dimension_numbers<[1], [0], [0], [1], [0, 0, 1, 1], [], []>} : vector<8x8xbf16>, vector<8x648xbf16>, vector<8x648xf32> -> vector<8x648xf32>
    %60 = arith.addf %55, %59 : vector<8x648xf32>
    %61 = vector.extract_strided_slice %21 {offsets = [0, 38], sizes = [8, 648], strides = [1, 1]} : vector<8x686xbf16> to vector<8x648xbf16>
    %c8 = arith.constant 8 : index
    %c0_40 = arith.constant 0 : index
    %c0_41 = arith.constant 0 : index
    %62 = vector.load %arg5[%c8, %c0_40, %c0_41] : memref<9x8x8xbf16, #tpu.memory_space<vmem>>, vector<1x8x8xbf16>
    %63 = vector.shape_cast %62 : vector<1x8x8xbf16> to vector<8x8xbf16>
    %cst_42 = arith.constant dense<0.000000e+00> : vector<8x648xf32>
    %64 = tpu.matmul %63, %61, %cst_42 {dimension_numbers = #tpu.dot_dimension_numbers<[1], [0], [0], [1], [0, 0, 1, 1], [], []>} : vector<8x8xbf16>, vector<8x648xbf16>, vector<8x648xf32> -> vector<8x648xf32>
    %65 = arith.addf %60, %64 : vector<8x648xf32>
    %c0_43 = arith.constant 0 : index
    %c0_44 = arith.constant 0 : index
    %66 = vector.load %arg6[%c0_43, %c0_44] : memref<8x1xf32, #tpu.memory_space<vmem>>, vector<8x1xf32>
    %67 = vector.broadcast %66 : vector<8x1xf32> to vector<8x648xf32>
    %68 = arith.addf %65, %67 : vector<8x648xf32>
    %cst_45 = arith.constant 0.000000e+00 : f32
    %69 = vector.broadcast %cst_45 : f32 to vector<8x648xf32>
    %70 = arith.maximumf %68, %69 : vector<8x648xf32>
    %71 = arith.truncf %70 : vector<8x648xf32> to vector<8x648xbf16>
    %c0_46 = arith.constant 0 : index
    %c0_47 = arith.constant 0 : index
    %72 = vector.load %arg7[%c0_46, %c0_47] : memref<24x8xbf16, #tpu.memory_space<vmem>>, vector<24x8xbf16>
    %cst_48 = arith.constant dense<0.000000e+00> : vector<24x648xf32>
    %73 = tpu.matmul %72, %71, %cst_48 {dimension_numbers = #tpu.dot_dimension_numbers<[1], [0], [0], [1], [0, 0, 1, 1], [], []>} : vector<24x8xbf16>, vector<8x648xbf16>, vector<24x648xf32> -> vector<24x648xf32>
    %c0_49 = arith.constant 0 : index
    %c0_50 = arith.constant 0 : index
    %74 = vector.load %arg8[%c0_49, %c0_50] : memref<24x1xf32, #tpu.memory_space<vmem>>, vector<24x1xf32>
    %75 = vector.broadcast %74 : vector<24x1xf32> to vector<24x648xf32>
    %76 = arith.addf %73, %75 : vector<24x648xf32>
    %c0_51 = arith.constant 0 : index
    %c0_52 = arith.constant 0 : index
    %77 = vector.load %arg9[%c0_51, %c0_52] : memref<24x24xbf16, #tpu.memory_space<vmem>>, vector<24x24xbf16>
    %cst_53 = arith.constant dense<0.000000e+00> : vector<24x648xf32>
    %78 = tpu.matmul %77, %8, %cst_53 {dimension_numbers = #tpu.dot_dimension_numbers<[1], [0], [0], [1], [0, 0, 1, 1], [], []>} : vector<24x24xbf16>, vector<24x648xbf16>, vector<24x648xf32> -> vector<24x648xf32>
    %c0_54 = arith.constant 0 : index
    %c0_55 = arith.constant 0 : index
    %79 = vector.load %arg10[%c0_54, %c0_55] : memref<24x1xf32, #tpu.memory_space<vmem>>, vector<24x1xf32>
    %80 = vector.broadcast %79 : vector<24x1xf32> to vector<24x648xf32>
    %81 = arith.addf %78, %80 : vector<24x648xf32>
    %82 = arith.addf %76, %81 : vector<24x648xf32>
    %cst_56 = arith.constant 0.000000e+00 : f32
    %83 = vector.broadcast %cst_56 : f32 to vector<24x648xf32>
    %84 = arith.maximumf %82, %83 : vector<24x648xf32>
    %85 = arith.truncf %84 : vector<24x648xf32> to vector<24x648xbf16>
    %c0_57 = arith.constant 0 : index
    %c0_58 = arith.constant 0 : index
    %86 = vector.load %arg22[%c0_57, %c0_58] : memref<648x200xbf16, #tpu.memory_space<vmem>>, vector<648x200xbf16>
    %cst_59 = arith.constant dense<0.000000e+00> : vector<24x200xf32>
    %87 = tpu.matmul %85, %86, %cst_59 {dimension_numbers = #tpu.dot_dimension_numbers<[1], [0], [0], [1], [0, 0, 1, 1], [], []>} : vector<24x648xbf16>, vector<648x200xbf16>, vector<24x200xf32> -> vector<24x200xf32>
    %88 = arith.truncf %87 : vector<24x200xf32> to vector<24x200xbf16>
    %c0_60 = arith.constant 0 : index
    %c0_61 = arith.constant 0 : index
    %89 = vector.load %arg11[%c0_60, %c0_61] : memref<8x24xbf16, #tpu.memory_space<vmem>>, vector<8x24xbf16>
    %cst_62 = arith.constant dense<0.000000e+00> : vector<8x200xf32>
    %90 = tpu.matmul %89, %88, %cst_62 {dimension_numbers = #tpu.dot_dimension_numbers<[1], [0], [0], [1], [0, 0, 1, 1], [], []>} : vector<8x24xbf16>, vector<24x200xbf16>, vector<8x200xf32> -> vector<8x200xf32>
    %c0_63 = arith.constant 0 : index
    %c0_64 = arith.constant 0 : index
    %91 = vector.load %arg12[%c0_63, %c0_64] : memref<8x1xf32, #tpu.memory_space<vmem>>, vector<8x1xf32>
    %92 = vector.broadcast %91 : vector<8x1xf32> to vector<8x200xf32>
    %93 = arith.addf %90, %92 : vector<8x200xf32>
    %cst_65 = arith.constant 0.000000e+00 : f32
    %94 = vector.broadcast %cst_65 : f32 to vector<8x200xf32>
    %95 = arith.maximumf %93, %94 : vector<8x200xf32>
    %c0_66 = arith.constant 0 : index
    %c0_67 = arith.constant 0 : index
    %96 = vector.load %arg21[%c0_66, %c0_67] : memref<1x200xf32, #tpu.memory_space<vmem>>, vector<1x200xf32>
    %97 = vector.broadcast %96 : vector<1x200xf32> to vector<8x200xf32>
    %98 = arith.mulf %95, %97 : vector<8x200xf32>
    %99 = arith.truncf %98 : vector<8x200xf32> to vector<8x200xbf16>
    %cst_68 = arith.constant 0.000000e+00 : bf16
    %100 = vector.broadcast %cst_68 : bf16 to vector<8x11xbf16>
    %101 = tpu.concatenate %100, %99, %100 in 1 : vector<8x11xbf16>, vector<8x200xbf16>, vector<8x11xbf16> -> vector<8x222xbf16>
    %102 = vector.extract_strided_slice %101 {offsets = [0, 0], sizes = [8, 200], strides = [1, 1]} : vector<8x222xbf16> to vector<8x200xbf16>
    %c0_69 = arith.constant 0 : index
    %c0_70 = arith.constant 0 : index
    %c0_71 = arith.constant 0 : index
    %103 = vector.load %arg13[%c0_69, %c0_70, %c0_71] : memref<9x8x8xbf16, #tpu.memory_space<vmem>>, vector<1x8x8xbf16>
    %104 = vector.shape_cast %103 : vector<1x8x8xbf16> to vector<8x8xbf16>
    %cst_72 = arith.constant dense<0.000000e+00> : vector<8x200xf32>
    %105 = tpu.matmul %104, %102, %cst_72 {dimension_numbers = #tpu.dot_dimension_numbers<[1], [0], [0], [1], [0, 0, 1, 1], [], []>} : vector<8x8xbf16>, vector<8x200xbf16>, vector<8x200xf32> -> vector<8x200xf32>
    %106 = vector.extract_strided_slice %101 {offsets = [0, 1], sizes = [8, 200], strides = [1, 1]} : vector<8x222xbf16> to vector<8x200xbf16>
    %c1_73 = arith.constant 1 : index
    %c0_74 = arith.constant 0 : index
    %c0_75 = arith.constant 0 : index
    %107 = vector.load %arg13[%c1_73, %c0_74, %c0_75] : memref<9x8x8xbf16, #tpu.memory_space<vmem>>, vector<1x8x8xbf16>
    %108 = vector.shape_cast %107 : vector<1x8x8xbf16> to vector<8x8xbf16>
    %cst_76 = arith.constant dense<0.000000e+00> : vector<8x200xf32>
    %109 = tpu.matmul %108, %106, %cst_76 {dimension_numbers = #tpu.dot_dimension_numbers<[1], [0], [0], [1], [0, 0, 1, 1], [], []>} : vector<8x8xbf16>, vector<8x200xbf16>, vector<8x200xf32> -> vector<8x200xf32>
    %110 = arith.addf %105, %109 : vector<8x200xf32>
    %111 = vector.extract_strided_slice %101 {offsets = [0, 2], sizes = [8, 200], strides = [1, 1]} : vector<8x222xbf16> to vector<8x200xbf16>
    %c2_77 = arith.constant 2 : index
    %c0_78 = arith.constant 0 : index
    %c0_79 = arith.constant 0 : index
    %112 = vector.load %arg13[%c2_77, %c0_78, %c0_79] : memref<9x8x8xbf16, #tpu.memory_space<vmem>>, vector<1x8x8xbf16>
    %113 = vector.shape_cast %112 : vector<1x8x8xbf16> to vector<8x8xbf16>
    %cst_80 = arith.constant dense<0.000000e+00> : vector<8x200xf32>
    %114 = tpu.matmul %113, %111, %cst_80 {dimension_numbers = #tpu.dot_dimension_numbers<[1], [0], [0], [1], [0, 0, 1, 1], [], []>} : vector<8x8xbf16>, vector<8x200xbf16>, vector<8x200xf32> -> vector<8x200xf32>
    %115 = arith.addf %110, %114 : vector<8x200xf32>
    %116 = vector.extract_strided_slice %101 {offsets = [0, 10], sizes = [8, 200], strides = [1, 1]} : vector<8x222xbf16> to vector<8x200xbf16>
    %c3_81 = arith.constant 3 : index
    %c0_82 = arith.constant 0 : index
    %c0_83 = arith.constant 0 : index
    %117 = vector.load %arg13[%c3_81, %c0_82, %c0_83] : memref<9x8x8xbf16, #tpu.memory_space<vmem>>, vector<1x8x8xbf16>
    %118 = vector.shape_cast %117 : vector<1x8x8xbf16> to vector<8x8xbf16>
    %cst_84 = arith.constant dense<0.000000e+00> : vector<8x200xf32>
    %119 = tpu.matmul %118, %116, %cst_84 {dimension_numbers = #tpu.dot_dimension_numbers<[1], [0], [0], [1], [0, 0, 1, 1], [], []>} : vector<8x8xbf16>, vector<8x200xbf16>, vector<8x200xf32> -> vector<8x200xf32>
    %120 = arith.addf %115, %119 : vector<8x200xf32>
    %121 = vector.extract_strided_slice %101 {offsets = [0, 11], sizes = [8, 200], strides = [1, 1]} : vector<8x222xbf16> to vector<8x200xbf16>
    %c4_85 = arith.constant 4 : index
    %c0_86 = arith.constant 0 : index
    %c0_87 = arith.constant 0 : index
    %122 = vector.load %arg13[%c4_85, %c0_86, %c0_87] : memref<9x8x8xbf16, #tpu.memory_space<vmem>>, vector<1x8x8xbf16>
    %123 = vector.shape_cast %122 : vector<1x8x8xbf16> to vector<8x8xbf16>
    %cst_88 = arith.constant dense<0.000000e+00> : vector<8x200xf32>
    %124 = tpu.matmul %123, %121, %cst_88 {dimension_numbers = #tpu.dot_dimension_numbers<[1], [0], [0], [1], [0, 0, 1, 1], [], []>} : vector<8x8xbf16>, vector<8x200xbf16>, vector<8x200xf32> -> vector<8x200xf32>
    %125 = arith.addf %120, %124 : vector<8x200xf32>
    %126 = vector.extract_strided_slice %101 {offsets = [0, 12], sizes = [8, 200], strides = [1, 1]} : vector<8x222xbf16> to vector<8x200xbf16>
    %c5_89 = arith.constant 5 : index
    %c0_90 = arith.constant 0 : index
    %c0_91 = arith.constant 0 : index
    %127 = vector.load %arg13[%c5_89, %c0_90, %c0_91] : memref<9x8x8xbf16, #tpu.memory_space<vmem>>, vector<1x8x8xbf16>
    %128 = vector.shape_cast %127 : vector<1x8x8xbf16> to vector<8x8xbf16>
    %cst_92 = arith.constant dense<0.000000e+00> : vector<8x200xf32>
    %129 = tpu.matmul %128, %126, %cst_92 {dimension_numbers = #tpu.dot_dimension_numbers<[1], [0], [0], [1], [0, 0, 1, 1], [], []>} : vector<8x8xbf16>, vector<8x200xbf16>, vector<8x200xf32> -> vector<8x200xf32>
    %130 = arith.addf %125, %129 : vector<8x200xf32>
    %131 = vector.extract_strided_slice %101 {offsets = [0, 20], sizes = [8, 200], strides = [1, 1]} : vector<8x222xbf16> to vector<8x200xbf16>
    %c6_93 = arith.constant 6 : index
    %c0_94 = arith.constant 0 : index
    %c0_95 = arith.constant 0 : index
    %132 = vector.load %arg13[%c6_93, %c0_94, %c0_95] : memref<9x8x8xbf16, #tpu.memory_space<vmem>>, vector<1x8x8xbf16>
    %133 = vector.shape_cast %132 : vector<1x8x8xbf16> to vector<8x8xbf16>
    %cst_96 = arith.constant dense<0.000000e+00> : vector<8x200xf32>
    %134 = tpu.matmul %133, %131, %cst_96 {dimension_numbers = #tpu.dot_dimension_numbers<[1], [0], [0], [1], [0, 0, 1, 1], [], []>} : vector<8x8xbf16>, vector<8x200xbf16>, vector<8x200xf32> -> vector<8x200xf32>
    %135 = arith.addf %130, %134 : vector<8x200xf32>
    %136 = vector.extract_strided_slice %101 {offsets = [0, 21], sizes = [8, 200], strides = [1, 1]} : vector<8x222xbf16> to vector<8x200xbf16>
    %c7_97 = arith.constant 7 : index
    %c0_98 = arith.constant 0 : index
    %c0_99 = arith.constant 0 : index
    %137 = vector.load %arg13[%c7_97, %c0_98, %c0_99] : memref<9x8x8xbf16, #tpu.memory_space<vmem>>, vector<1x8x8xbf16>
    %138 = vector.shape_cast %137 : vector<1x8x8xbf16> to vector<8x8xbf16>
    %cst_100 = arith.constant dense<0.000000e+00> : vector<8x200xf32>
    %139 = tpu.matmul %138, %136, %cst_100 {dimension_numbers = #tpu.dot_dimension_numbers<[1], [0], [0], [1], [0, 0, 1, 1], [], []>} : vector<8x8xbf16>, vector<8x200xbf16>, vector<8x200xf32> -> vector<8x200xf32>
    %140 = arith.addf %135, %139 : vector<8x200xf32>
    %141 = vector.extract_strided_slice %101 {offsets = [0, 22], sizes = [8, 200], strides = [1, 1]} : vector<8x222xbf16> to vector<8x200xbf16>
    %c8_101 = arith.constant 8 : index
    %c0_102 = arith.constant 0 : index
    %c0_103 = arith.constant 0 : index
    %142 = vector.load %arg13[%c8_101, %c0_102, %c0_103] : memref<9x8x8xbf16, #tpu.memory_space<vmem>>, vector<1x8x8xbf16>
    %143 = vector.shape_cast %142 : vector<1x8x8xbf16> to vector<8x8xbf16>
    %cst_104 = arith.constant dense<0.000000e+00> : vector<8x200xf32>
    %144 = tpu.matmul %143, %141, %cst_104 {dimension_numbers = #tpu.dot_dimension_numbers<[1], [0], [0], [1], [0, 0, 1, 1], [], []>} : vector<8x8xbf16>, vector<8x200xbf16>, vector<8x200xf32> -> vector<8x200xf32>
    %145 = arith.addf %140, %144 : vector<8x200xf32>
    %c0_105 = arith.constant 0 : index
    %c0_106 = arith.constant 0 : index
    %146 = vector.load %arg14[%c0_105, %c0_106] : memref<8x1xf32, #tpu.memory_space<vmem>>, vector<8x1xf32>
    %147 = vector.broadcast %146 : vector<8x1xf32> to vector<8x200xf32>
    %148 = arith.addf %145, %147 : vector<8x200xf32>
    %cst_107 = arith.constant 0.000000e+00 : f32
    %149 = vector.broadcast %cst_107 : f32 to vector<8x200xf32>
    %150 = arith.maximumf %148, %149 : vector<8x200xf32>
    %151 = arith.truncf %150 : vector<8x200xf32> to vector<8x200xbf16>
    %c0_108 = arith.constant 0 : index
    %c0_109 = arith.constant 0 : index
    %152 = vector.load %arg15[%c0_108, %c0_109] : memref<24x8xbf16, #tpu.memory_space<vmem>>, vector<24x8xbf16>
    %cst_110 = arith.constant dense<0.000000e+00> : vector<24x200xf32>
    %153 = tpu.matmul %152, %151, %cst_110 {dimension_numbers = #tpu.dot_dimension_numbers<[1], [0], [0], [1], [0, 0, 1, 1], [], []>} : vector<24x8xbf16>, vector<8x200xbf16>, vector<24x200xf32> -> vector<24x200xf32>
    %c0_111 = arith.constant 0 : index
    %c0_112 = arith.constant 0 : index
    %154 = vector.load %arg16[%c0_111, %c0_112] : memref<24x1xf32, #tpu.memory_space<vmem>>, vector<24x1xf32>
    %155 = vector.broadcast %154 : vector<24x1xf32> to vector<24x200xf32>
    %156 = arith.addf %153, %155 : vector<24x200xf32>
    %157 = arith.addf %156, %87 : vector<24x200xf32>
    %cst_113 = arith.constant 0.000000e+00 : f32
    %158 = vector.broadcast %cst_113 : f32 to vector<24x200xf32>
    %159 = arith.maximumf %157, %158 : vector<24x200xf32>
    %c0_114 = arith.constant 0 : index
    %c0_115 = arith.constant 0 : index
    %160 = vector.load %arg17[%c0_114, %c0_115] : memref<8x24xf32, #tpu.memory_space<vmem>>, vector<8x24xf32>
    %cst_116 = arith.constant dense<0.000000e+00> : vector<8x200xf32>
    %161 = tpu.matmul %160, %159, %cst_116 {dimension_numbers = #tpu.dot_dimension_numbers<[1], [0], [0], [1], [0, 0, 1, 1], [], []>} : vector<8x24xf32>, vector<24x200xf32>, vector<8x200xf32> -> vector<8x200xf32>
    %162 = vector.shape_cast %161 : vector<8x200xf32> to vector<1x8x200xf32>
    %c0_117 = arith.constant 0 : index
    %c0_118 = arith.constant 0 : index
    %c0_119 = arith.constant 0 : index
    %163 = vector.load %arg18[%c0_117, %c0_118, %c0_119] : memref<2x8x200xf32, #tpu.memory_space<vmem>>, vector<2x8x200xf32>
    %164 = vector.broadcast %162 : vector<1x8x200xf32> to vector<2x8x200xf32>
    %165 = arith.mulf %164, %163 : vector<2x8x200xf32>
    %cst_120 = arith.constant dense<0.000000e+00> : vector<2x200xf32>
    %166 = vector.multi_reduction <add>, %165, %cst_120 [1] : vector<2x8x200xf32> to vector<2x200xf32>
    %c0_121 = arith.constant 0 : index
    %c0_122 = arith.constant 0 : index
    %167 = vector.load %arg19[%c0_121, %c0_122] : memref<200x2xf32, #tpu.memory_space<vmem>>, vector<200x2xf32>
    %cst_123 = arith.constant dense<0.000000e+00> : vector<2x2xf32>
    %168 = tpu.matmul %166, %167, %cst_123 {dimension_numbers = #tpu.dot_dimension_numbers<[1], [0], [0], [1], [0, 0, 1, 1], [], []>} : vector<2x200xf32>, vector<200x2xf32>, vector<2x2xf32> -> vector<2x2xf32>
    %c0_124 = arith.constant 0 : index
    %c0_125 = arith.constant 0 : index
    %169 = vector.load %arg23[%c0_124, %c0_125] : memref<2x2xf32, #tpu.memory_space<vmem>>, vector<2x2xf32>
    tpu.vector_store %arg23[%c0_124, %c0_125], %168 {strides = array<i32>} : memref<2x2xf32, #tpu.memory_space<vmem>>, vector<2x2xf32>,
    return
  }
}

</mosaic_0001>

<bundles_post_ra>
// kernel: forward.1
= control target key start
LH: loop header
LB: loop body
LE: loop exit
PB: predicated region body
PF: predicated region fallthrough
CT: control target
= control target key end

     0   :  { %vm177_vm0 = vcmask 1044480   ;;  %vm178_vm1 = vcmask 1045504   ;;  %v4069_v2 = vmov 65535   ;;  %v4070_v12 = vmov 0   ;;  %s4072_s25 = smov 127   ;;  %s4075_s26 = smov 109   ;;  %s5646_s0 = inlined_call_operand.vmem [shape: bf16[27,648], index: 0, kind: input, shape index: {}]   ;;  %s5647_s1 = inlined_call_operand.vmem [shape: bf16[24,27], index: 1, kind: input, shape index: {}]   ;;  %s5648_s2 = inlined_call_operand.vmem [shape: f32[24,1], index: 2, kind: input, shape index: {}]   ;;  %s5649_s4 = inlined_call_operand.vmem [shape: f32[8,1], index: 4, kind: input, shape index: {}]   ;;  %s5650_s3 = inlined_call_operand.vmem [shape: bf16[8,24], index: 3, kind: input, shape index: {}]   ;;  %s5651_s20 = inlined_call_operand.vmem [shape: f32[1,648], index: 20, kind: input, shape index: {}]   ;;  %s5652_s5 = inlined_call_operand.vmem [shape: bf16[9,8,8], index: 5, kind: input, shape index: {}]   ;;  %s5653_s8 = inlined_call_operand.vmem [shape: f32[24,1], index: 8, kind: input, shape index: {}]   ;;  %s5654_s6 = inlined_call_operand.vmem [shape: f32[8,1], index: 6, kind: input, shape index: {}]   ;;  %s5655_s10 = inlined_call_operand.vmem [shape: f32[24,1], index: 10, kind: input, shape index: {}]   ;;  %s5656_s7 = inlined_call_operand.vmem [shape: bf16[24,8], index: 7, kind: input, shape index: {}]   ;;  %s5657_s9 = inlined_call_operand.vmem [shape: bf16[24,24], index: 9, kind: input, shape index: {}]   ;;  %s5658_s12 = inlined_call_operand.vmem [shape: f32[8,1], index: 12, kind: input, shape index: {}]   ;;  %s5659_s22 = inlined_call_operand.vmem [shape: bf16[648,200], index: 22, kind: input, shape index: {}]   ;;  %s5660_s11 = inlined_call_operand.vmem [shape: bf16[8,24], index: 11, kind: input, shape index: {}]   ;;  %s5661_s21 = inlined_call_operand.vmem [shape: f32[1,200], index: 21, kind: input, shape index: {}]   ;;  %s5662_s14 = inlined_call_operand.vmem [shape: f32[8,1], index: 14, kind: input, shape index: {}]   ;;  %s5663_s16 = inlined_call_operand.vmem [shape: f32[24,1], index: 16, kind: input, shape index: {}]   ;;  %s5664_s13 = inlined_call_operand.vmem [shape: bf16[9,8,8], index: 13, kind: input, shape index: {}]   ;;  %s5665_s15 = inlined_call_operand.vmem [shape: bf16[24,8], index: 15, kind: input, shape index: {}]   ;;  %s5666_s19 = inlined_call_operand.vmem [shape: f32[200,2], index: 19, kind: input, shape index: {}]   ;;  %s5667_s17 = inlined_call_operand.vmem [shape: f32[8,24], index: 17, kind: input, shape index: {}]   ;;  %s5668_s18 = inlined_call_operand.vmem [shape: f32[2,8,200], index: 18, kind: input, shape index: {}]   ;;  %s5669_s23 = inlined_call_operand.vmem [shape: f32[2,2], index: 23, kind: output, shape index: {}]  }
   0x1   :  { %5675 = sst [smem:[#allocation2_spill]] %s5646_s0  ;;  %v179_v3 = vsel %vm177_vm0, 4294967295, %v4069_v2  ;;  %4066 = vset.pattern.permute.xlu0 %v4070_v12  ;;  %4067 = vset.pattern.permute.xlu1 %v4070_v12  ;;  %vm170_vm2 = vcmask 220160   ;;  %vm348_vm3 = vcmask 1043456   ;;  %vm344_vm4 = vcmask 195584   ;;  %s4078_s27 = smov 91  }
   0x2   :  { %5676 = sst [smem:[#allocation3_spill]] %s5647_s1  ;;  %v4212_v5 = vsel %vm178_vm1, %v179_v3, 0  ;;  %4068 = vset.pattern.permute.xlu2 %v4070_v12  ;;  %vm501_vm5 = vcmask 154624   ;;  %s4074_s1 = smov 110   ;;  %vm530_vm6 = vcmask 1039360   ;;  %vm536_vm7 = vcmask 64512  }
   0x3   :  { %5677 = sst [smem:[#allocation4_spill]] %s5648_s2  ;;  %s4076_s2 = smov 108   ;;  %vm747_vm8 = vcmask 1031168   ;;  %vm872_vm9 = vcmask 900096   ;;  %vm997_vm10 = vcmask 891904   ;;  %vm1122_vm11 = vcmask 883712  }
   0x4   :  { %5678 = sst [smem:[#allocation5_spill]] %s5649_s4  ;;  %vm1247_vm12 = vcmask 752640   ;;  %vm1372_vm13 = vcmask 744448   ;;  %vm1497_vm14 = vcmask 736256   ;;  %vm2764_vm15 = vcmask 89088  }
   0x5   :  { %5679 = sst [smem:[#allocation6_spill]] %s5650_s3  ;;  %s4071_s3 = smov 19   ;;  %vm2769_vm0 = vcmask 678912   ;;  %vm2945_vm1 = vcmask 957440  }
   0x6   :  { %5680 = sst [smem:[#allocation7_spill]] %s5651_s20  ;;  %s4073_s20 = smov 126  }
   0x7   :  { %5681 = sst [smem:[#allocation8_spill]] %s5652_s5 }
   0x8   :  { %5682 = sst [smem:[#allocation9_spill]] %s5653_s8 }
   0x9   :  { %s5683_s24 = sld [smem:[#allocation2_spill]] }
   0xa   :  { %s5684_s4 = sld [smem:[#allocation3_spill]] }
   0xb   :  { %s5685_s30 = sld [smem:[#allocation4_spill]] }
   0xc   :  { %s5687_s8 = sld [smem:[#allocation6_spill]] }
   0xd   :  { %s5688_s0 = sld [smem:[#allocation7_spill]] }
   0xf   :  { %v3454_v0 = vld [vmem:[%s5683_s24 + $0x30] sm:$0xf]  ;;  %v3961_v1 = vld [vmem:[%s5683_s24 + $0x44] sm:$0x30]  ;;  %v3958_v6 = vld [vmem:[%s5683_s24 + $0x34] sm:$0xf] }
  0x10   :  { %v3455_v4 = vor.u32 %v3961_v1, %v3454_v0  ;;  %v3456_v7 = vld [vmem:[%s5683_s24 + $0x48] sm:$0x30]  ;;  %v3462_v9 = vld [vmem:[%s5683_s24 + $0x38] sm:$0xf]  ;;  %v3962_v10 = vld [vmem:[%s5683_s24 + $0x4c] sm:$0x30] }
  0x11   :  { %v3459_v8 = vor.u32 %v3958_v6, %v3456_v7  ;;  %v3430_v11 = vld [vmem:[%s5683_s24] sm:$0xf]  ;;  %v3463_v14 = vor.u32 %v3962_v10, %v3462_v9  ;;  %v3955_v15 = vld [vmem:[%s5683_s24 + $0x14] sm:$0xf0]  ;;  %v3952_v16 = vld [vmem:[%s5683_s24 + $0x4] sm:$0xf] }
  0x12   :  { %v182_v13 = vand.u32 %v3455_v4, %v4212_v5  ;;  %v3432_v17 = vld [vmem:[%s5683_s24 + $0x18] sm:$0xf0]  ;;  %v3438_v19 = vld [vmem:[%s5683_s24 + $0x8] sm:$0xf]  ;;  %v3956_v20 = vld [vmem:[%s5683_s24 + $0x1c] sm:$0xf0]  ;;  %v3431_v23 = vor.u32 %v3955_v15, %v3430_v11 }
  0x13   :  { %v185_v18 = vand.u32 %v3459_v8, %v4212_v5  ;;  %v77_v21 = vld [vmem:[%s5684_s4 + $0x8] sm:$0xf]  ;;  %v188_v22 = vand.u32 %v3463_v14, %v4212_v5  ;;  %v92_v25 = vld [vmem:[%s5685_s30 + $0x10] sm:$0xff]  ;;  %v3959_v26 = vld [vmem:[%s5683_s24 + $0x3c] sm:$0xf]  ;;  %v3435_v28 = vor.u32 %v3952_v16, %v3432_v17  ;;  %v3439_v32 = vor.u32 %v3956_v20, %v3438_v19 }
  0x14   :  { %205 = vmatpush.bf16.msra.mxu0 %v182_v13  ;;  %4047 = vmatpush.bf16.msra.mxu3 %v182_v13  ;;  %v113_v24 = vunpack.c.l.b16 %v77_v21  ;;  %v3464_v27 = vld [vmem:[%s5683_s24 + $0x50] sm:$0x30]  ;;  %v3470_v30 = vld [vmem:[%s5683_s24 + $0x40] sm:$0xf]  ;;  %v3963_v31 = vld [vmem:[%s5683_s24 + $0x54] sm:$0x30] }
  0x15   :  { %223 = vmatpush.bf16.msra.mxu1 %v185_v18  ;;  %105 = vperm.xlu0 %4066, %v92_v25   ;;  %v3467_v29 = vor.u32 %v3959_v26, %v3464_v27  ;;  %v3951_v33 = vld [vmem:[%s5684_s4] sm:$0xff]  ;;  %v3471_v34 = vor.u32 %v3963_v31, %v3470_v30  ;;  %v3953_v35 = vld [vmem:[%s5683_s24 + $0xc] sm:$0xf]  ;;  %v3446_v39 = vld [vmem:[%s5683_s24 + $0x10] sm:$0xf]  ;;  %s5686_s4 = sld [smem:[#allocation5_spill]] }
  0x16   :  { %241 = vmatpush.bf16.msra.mxu2 %v188_v22  ;;  %v3440_v36 = vld [vmem:[%s5683_s24 + $0x20] sm:$0xf0]  ;;  %v115_v37 = vpack.c.b16 %v113_v24, %v113_v24  ;;  %v3957_v40 = vld [vmem:[%s5683_s24 + $0x24] sm:$0xf0]  ;;  %v3472_v43 = vld [vmem:[%s5683_s24 + $0x58] sm:$0x30] }
  0x17   :  { %v191_v38 = vand.u32 %v3467_v29, %v4212_v5  ;;  %v3960_v41 = vld [vmem:[%s5683_s24 + $0x44] sm:$0xf]  ;;  %v194_v42 = vand.u32 %v3471_v34, %v4212_v5  ;;  %v3443_v44 = vor.u32 %v3953_v35, %v3440_v36  ;;  %v91_v45 = vld [vmem:[%s5685_s30 + $0x8] sm:$0xff]  ;;  %v3447_v47 = vor.u32 %v3957_v40, %v3446_v39  ;;  %v3954_v50 = vld [vmem:[%s5683_s24 + $0x14] sm:$0xf] }
  0x18   :  { %206 = vmatpush.bf16.msra.mxu0 %v3431_v23  ;;  %4048 = vmatpush.bf16.msra.mxu3 %v3431_v23  ;;  %v3475_v46 = vor.u32 %v3960_v41, %v3472_v43  ;;  %v90_v48 = vld [vmem:[%s5685_s30] sm:$0xff]  ;;  %v3448_v51 = vld [vmem:[%s5683_s24 + $0x28] sm:$0xf0]  ;;  %s4077_s30 = smov 92   ;;  %s5689_s24 = sld [smem:[#allocation8_spill]] }
  0x19   :  { %224 = vmatpush.bf16.msra.mxu1 %v3435_v28  ;;  %100 = vperm.xlu1 %4067, %v91_v45   ;;  %v3451_v52 = vor.u32 %v3954_v50, %v3448_v51  ;;  %v4336_v13 = vld [vmem:[%s5687_s8] sm:$0xf]  ;;  %s4079_s8 = smov 90  }
  0x1a   :  { %242 = vmatpush.bf16.msra.mxu2 %v3439_v32  ;;  %v197_v49 = vand.u32 %v3475_v46, %v4212_v5 }
  0x1b   :  { %3476 = vmatmul.msk.bf16.vlgmr.msra.gmra.mxu0 %vm170_vm2, %v3951_v33  ;;  %3477 = vmatmul.msk.bf16.vlgmr.msra.gmra.mxu3 %vm170_vm2, %v115_v37  ;;  %v338_v53 = vld [vmem:[%s5686_s4] sm:$0xff] }
  0x1c   :  { %259 = vmatpush.bf16.msrb.mxu3 %v191_v38  ;;  %277 = vmatpush.bf16.msrb.mxu0 %v194_v42 }
  0x1d   :  { %3478 = vmatmul.msk.bf16.vlgmr.msra.gmra.mxu1 %vm170_vm2, %v3951_v33  ;;  %3480 = vmatmul.msk.bf16.vlgmr.msra.gmra.mxu2 %vm170_vm2, %v3951_v33 }
  0x1e   :  { %95 = vperm.xlu0 %4066, %v90_v48   ;;  %295 = vmatpush.bf16.msrb.mxu1 %v197_v49 }
  0x20   :  { %260 = vmatpush.bf16.msrb.mxu3 %v3443_v44  ;;  %278 = vmatpush.bf16.msrb.mxu0 %v3447_v47 }
  0x21   :  { %341 = vperm.xlu1 %4067, %v338_v53  }
  0x22   :  { %296 = vmatpush.bf16.msrb.mxu1 %v3451_v52 }
  0x2b   :  { %3482 = vmatmul.msk.bf16.vlgmr.msrb.gmra.mxu3 %vm170_vm2, %v3951_v33  ;;  %3484 = vmatmul.msk.bf16.vlgmr.msrb.gmra.mxu0 %vm170_vm2, %v3951_v33 }
  0x2d   :  { %3479 = vmatmul.msk.bf16.gmra.mxu1 %vm170_vm2, %v115_v37  ;;  %3481 = vmatmul.msk.bf16.gmra.mxu2 %vm170_vm2, %v115_v37 }
  0x3b   :  { %3483 = vmatmul.msk.bf16.gmra.mxu3 %vm170_vm2, %v115_v37  ;;  %3485 = vmatmul.msk.bf16.gmra.mxu0 %vm170_vm2, %v115_v37 }
  0x3d   :  { %3486 = vmatmul.msk.bf16.vlgmr.msrb.gmra.mxu1 %vm170_vm2, %v3951_v33 }
  0x4d   :  { %3487 = vmatmul.msk.bf16.gmra.mxu1 %vm170_vm2, %v115_v37 }
  0x87   :  { %v4316_v54 = vpop.permute.xlu0 %105 }
  0x8b   :  { %v4322_v61 = vpop.permute.xlu1 %100 }
  0x90   :  { %v4318_v57 = vpop.permute.xlu0 %95 }
  0x98   :  { %v208_v55 = vpop.f32.mrf.mxu0 }
  0x99   :  { %v209_v59 = vadd.f32 %v208_v55, %v4318_v57 }
  0x9a   :  { %v226_v56 = vpop.f32.mrf.mxu1 }
  0x9b   :  { %v307_v3 = vmax.f32 %v209_v59, 0.0  ;;  %v227_v16 = vadd.f32 %v226_v56, %v4318_v57 }
  0x9d   :  { %v308_v25 = vmax.f32 %v227_v16, 0.0 }
  0x9e   :  { %v213_v58 = vpop.f32.mrf.mxu3 }
  0x9f   :  { %v214_v60 = vadd.f32 %v213_v58, %v4316_v54 }
  0xa0   :  { %v244_v62 = vpop.f32.mrf.mxu2  ;;  %v210_v63 = vpop.f32.mrf.mxu0 }
  0xa1   :  { %v319_v0 = vmax.f32 %v214_v60, 0.0  ;;  %v211_v1 = vadd.f32 %v210_v63, %v4322_v61  ;;  %v245_v26 = vadd.f32 %v244_v62, %v4318_v57 }
  0xa2   :  { %v228_v2 = vpop.f32.mrf.mxu1 }
  0xa3   :  { %v331_v4 = vpack.c.bf16 %v319_v0, %v319_v0  ;;  %v313_v5 = vmax.f32 %v211_v1, 0.0  ;;  %v229_v14 = vadd.f32 %v228_v2, %v4322_v61  ;;  %v309_v31 = vmax.f32 %v245_v26, 0.0 }
  0xa5   :  { %v4326_v6 = vsel %vm348_vm3, %v331_v4, 0  ;;  %v4329_v8 = vpack.c.bf16 %v313_v5, %v307_v3  ;;  %v314_v19 = vmax.f32 %v229_v14, 0.0 }
  0xa6   :  { %v215_v7 = vpop.f32.mrf.mxu3  ;;  %373 = vmatpush.bf16.msrb.mxu2 %v4326_v6 }
  0xa7   :  { %v4349_v29 = vpack.c.bf16 %v314_v19, %v308_v25 }
  0xa8   :  { %v246_v9 = vpop.f32.mrf.mxu2  ;;  %v280_v10 = vpop.f32.mrf.mxu0 }
  0xa9   :  { %v247_v27 = vadd.f32 %v246_v9, %v4322_v61  ;;  %v281_v42 = vadd.f32 %v280_v10, %v4318_v57 }
  0xaa   :  { %v231_v11 = vpop.f32.mrf.mxu1  ;;  %374 = vmatpush.bf16.msrb.mxu2 %v4329_v8 }
  0xab   :  { %v232_v12 = vadd.f32 %v231_v11, %v4316_v54  ;;  %v315_v32 = vmax.f32 %v247_v27, 0.0  ;;  %v311_v48 = vmax.f32 %v281_v42, 0.0 }
  0xad   :  { %v320_v15 = vmax.f32 %v232_v12, 0.0  ;;  %3488 = vmatmul.msk.bf16.vlgmr.msrb.gmra.mxu2 %vm344_vm4, %v4336_v13  ;;  %v4360_v40 = vpack.c.bf16 %v315_v32, %v309_v31 }
  0xae   :  { %v262_v18 = vpop.f32.mrf.mxu3 }
  0xaf   :  { %v332_v17 = vpack.c.bf16 %v320_v15, %v320_v15  ;;  %v263_v53 = vadd.f32 %v262_v18, %v4318_v57  ;;  %v451_v15 = vld [vmem:[%s5688_s0] sm:$0x3f]  ;;  %s5690_s0 = sld [smem:[#allocation9_spill]] }
  0xb0   :  { %v249_v20 = vpop.f32.mrf.mxu2  ;;  %v282_v21 = vpop.f32.mrf.mxu0  ;;  %v453_v18 = vperm.slane %v451_v15, 0  ;;  %v456_v42 = vperm.slane %v451_v15, 3 }
  0xb1   :  { %v4343_v22 = vsel %vm348_vm3, %v332_v17, 0  ;;  %v250_v23 = vadd.f32 %v249_v20, %v4316_v54  ;;  %v283_v39 = vadd.f32 %v282_v21, %v4322_v61  ;;  %v310_v60 = vmax.f32 %v263_v53, 0.0 }
  0xb2   :  { %v233_v24 = vpop.f32.mrf.mxu1  ;;  %386 = vmatpush.bf16.msra.mxu3 %v4343_v22  ;;  %v454_v20 = vperm.slane %v451_v15, 1 }
  0xb3   :  { %v321_v28 = vmax.f32 %v250_v23, 0.0  ;;  %v317_v44 = vmax.f32 %v283_v39, 0.0  ;;  %v455_v39 = vperm.slane %v451_v15, 2 }
  0xb5   :  { %v333_v30 = vpack.c.bf16 %v321_v28, %v321_v28  ;;  %v4373_v55 = vpack.c.bf16 %v317_v44, %v311_v48 }
  0xb6   :  { %387 = vmatpush.bf16.msra.mxu3 %v4349_v29  ;;  %v264_v33 = vpop.f32.mrf.mxu3 }
  0xb7   :  { %v4353_v34 = vsel %vm348_vm3, %v333_v30, 0  ;;  %v265_v49 = vadd.f32 %v264_v33, %v4322_v61 }
  0xb8   :  { %399 = vmatpush.bf16.msra.mxu2 %v4353_v34  ;;  %v285_v35 = vpop.f32.mrf.mxu0  ;;  %v251_v36 = vpop.f32.mrf.mxu2 }
  0xb9   :  { %3489 = vmatmul.msk.bf16.vlgmr.msra.gmra.mxu3 %vm344_vm4, %v4336_v13  ;;  %v286_v37 = vadd.f32 %v285_v35, %v4316_v54  ;;  %v316_v58 = vmax.f32 %v265_v49, 0.0 }
  0xba   :  { %v298_v38 = vpop.f32.mrf.mxu1 }
  0xbb   :  { %v323_v41 = vmax.f32 %v286_v37, 0.0  ;;  %v4382_v63 = vpack.c.bf16 %v316_v58, %v310_v60  ;;  %v299_v4 = vadd.f32 %v298_v38, %v4318_v57 }
  0xbc   :  { %400 = vmatpush.bf16.msra.mxu2 %v4360_v40 }
  0xbd   :  { %v335_v43 = vpack.c.bf16 %v323_v41, %v323_v41  ;;  %v312_v10 = vmax.f32 %v299_v4, 0.0 }
  0xbe   :  { %v267_v45 = vpop.f32.mrf.mxu3 }
  0xbf   :  { %3490 = vmatmul.msk.bf16.vlgmr.msra.gmra.mxu2 %vm344_vm4, %v4336_v13  ;;  %v268_v46 = vadd.f32 %v267_v45, %v4316_v54  ;;  %v4368_v47 = vsel %vm348_vm3, %v335_v43, 0 }
  0xc0   :  { %425 = vmatpush.bf16.msra.mxu0 %v4368_v47  ;;  %v287_v50 = vpop.f32.mrf.mxu0 }
  0xc1   :  { %v322_v51 = vmax.f32 %v268_v46, 0.0  ;;  %v457_v50 = vperm.slane %v451_v15, 4 }
  0xc2   :  { %v300_v52 = vpop.f32.mrf.mxu1 }
  0xc3   :  { %v334_v56 = vpack.c.bf16 %v322_v51, %v322_v51  ;;  %v301_v2 = vadd.f32 %v300_v52, %v4322_v61  ;;  %v342_v61 = vpop.permute.xlu1 %341  ;;  %v458_v52 = vperm.slane %v451_v15, 5 }
  0xc4   :  { %426 = vmatpush.bf16.msra.mxu0 %v4373_v55 }
  0xc5   :  { %v4377_v59 = vsel %vm348_vm3, %v334_v56, 0  ;;  %v318_v7 = vmax.f32 %v301_v2, 0.0 }
  0xc6   :  { %v269_v62 = vpop.f32.mrf.mxu3  ;;  %412 = vmatpush.bf16.msrb.mxu3 %v4377_v59 }
  0xc7   :  { %3492 = vmatmul.msk.bf16.vlgmr.msra.gmra.mxu0 %vm344_vm4, %v4336_v13 }
  0xca   :  { %v303_v0 = vpop.f32.mrf.mxu1  ;;  %413 = vmatpush.bf16.msrb.mxu3 %v4382_v63 }
  0xcb   :  { %v304_v1 = vadd.f32 %v303_v0, %v4316_v54  ;;  %v4394_v54 = vpack.c.bf16 %v318_v7, %v312_v10 }
  0xcd   :  { %v324_v3 = vmax.f32 %v304_v1, 0.0  ;;  %3491 = vmatmul.msk.bf16.vlgmr.msrb.gmra.mxu3 %vm344_vm4, %v4336_v13 }
  0xcf   :  { %v336_v5 = vpack.c.bf16 %v324_v3, %v324_v3 }
  0xd1   :  { %v4391_v9 = vsel %vm348_vm3, %v336_v5, 0 }
  0xd2   :  { %438 = vmatpush.bf16.msra.mxu1 %v4391_v9  ;;  %v305_v11 = vpop.f32.mrf.mxu1 }
  0xd6   :  { %439 = vmatpush.bf16.msra.mxu1 %v4394_v54 }
  0xd9   :  { %3493 = vmatmul.msk.bf16.vlgmr.msra.gmra.mxu1 %vm344_vm4, %v4336_v13 }
 0x130   :  { %v376_v57 = vpop.f32.mrf.mxu2 }
 0x131   :  { %v377_v12 = vadd.f32 %v376_v57, %v342_v61 }
 0x133   :  { %v445_v17 = vmax.f32 %v377_v12, 0.0 }
 0x135   :  { %v465_v23 = vmul.f32 %v453_v18, %v445_v17 }
 0x138   :  { %v378_v14 = vpop.f32.mrf.mxu2 }
 0x13c   :  { %v389_v16 = vpop.f32.mrf.mxu3 }
 0x13d   :  { %v390_v19 = vadd.f32 %v389_v16, %v342_v61 }
 0x13f   :  { %v446_v21 = vmax.f32 %v390_v19, 0.0 }
 0x141   :  { %v466_v24 = vmul.f32 %v454_v20, %v446_v21 }
 0x142   :  { %v402_v25 = vpop.f32.mrf.mxu2 }
 0x143   :  { %v471_v26 = vpack.c.bf16 %v466_v24, %v465_v23  ;;  %v403_v35 = vadd.f32 %v402_v25, %v342_v61 }
 0x144   :  { %v391_v27 = vpop.f32.mrf.mxu3  ;;  %v428_v13 = vpop.f32.mrf.mxu0 }
 0x145   :  { %v477_v28 = vunpack.c.l.b16 %v471_v26  ;;  %v478_v31 = vunpack.c.h.b16 %v471_v26  ;;  %v447_v38 = vmax.f32 %v403_v35, 0.0  ;;  %v429_v43 = vadd.f32 %v428_v13, %v342_v61 }
 0x147   :  { %v483_v30 = vpack.c.b16 %v477_v28, %v477_v28  ;;  %v484_v36 = vpack.c.b16 %v478_v31, %v478_v31  ;;  %v467_v45 = vmul.f32 %v455_v39, %v447_v38  ;;  %v449_v49 = vmax.f32 %v429_v43, 0.0 }
 0x149   :  { %489 = vrot.lane.b32.xlu2 %v483_v30, %s4071_s3  ;;  %v469_v62 = vmul.f32 %v457_v50, %v449_v49  ;;  %v4479_v30 = vld [vmem:[%s5689_s24 + $0x4] sm:$0xf] }
 0x14a   :  { %v404_v32 = vpop.f32.mrf.mxu2 }
 0x14c   :  { %v430_v33 = vpop.f32.mrf.mxu0 }
 0x150   :  { %v415_v37 = vpop.f32.mrf.mxu3 }
 0x151   :  { %491 = vrot.lane.b32.xlu2 %v484_v36, %s4071_s3  ;;  %v416_v41 = vadd.f32 %v415_v37, %v342_v61 }
 0x153   :  { %v448_v44 = vmax.f32 %v416_v41, 0.0 }
 0x155   :  { %v468_v46 = vmul.f32 %v456_v42, %v448_v44 }
 0x156   :  { %v441_v48 = vpop.f32.mrf.mxu1 }
 0x157   :  { %v442_v51 = vadd.f32 %v441_v48, %v342_v61  ;;  %v472_v53 = vpack.c.bf16 %v468_v46, %v467_v45 }
 0x158   :  { %v417_v58 = vpop.f32.mrf.mxu3 }
 0x159   :  { %v450_v56 = vmax.f32 %v442_v51, 0.0  ;;  %v479_v60 = vunpack.c.l.b16 %v472_v53  ;;  %v480_v7 = vunpack.c.h.b16 %v472_v53  ;;  %v1608_v53 = vld [vmem:[%s5654_s6] sm:$0xff]  ;;  %s4084_s6 = smov 107  }
 0x15b   :  { %v470_v0 = vmul.f32 %v458_v52, %v450_v56  ;;  %v485_v1 = vpack.c.b16 %v479_v60, %v479_v60  ;;  %v486_v57 = vpack.c.b16 %v480_v7, %v480_v7  ;;  %v1636_v52 = vld [vmem:[%s5690_s0 + $0x8] sm:$0xff] }
 0x15d   :  { %v473_v2 = vpack.c.bf16 %v470_v0, %v469_v62  ;;  %493 = vrot.lane.b32.xlu0 %v485_v1, %s4071_s3 }
 0x15e   :  { %v443_v3 = vpop.f32.mrf.mxu1 }
 0x15f   :  { %v481_v4 = vunpack.c.l.b16 %v473_v2  ;;  %v482_v5 = vunpack.c.h.b16 %v473_v2 }
 0x161   :  { %v487_v10 = vpack.c.b16 %v481_v4, %v481_v4  ;;  %v488_v11 = vpack.c.b16 %v482_v5, %v482_v5  ;;  %v1637_v4 = vld [vmem:[%s5690_s0 + $0x10] sm:$0xff]  ;;  %v1796_v5 = vld [vmem:[%s5655_s10] sm:$0xff] }
 0x163   :  { %497 = vrot.lane.b32.xlu1 %v487_v10, %s4071_s3  ;;  %499 = vrot.lane.b32.xlu2 %v488_v11, %s4071_s3 }
 0x165   :  { %495 = vrot.lane.b32.xlu0 %v486_v57, %s4071_s3 }
 0x1a3   :  { %v490_v61 = vpop.permute.xlu2 %489 }
 0x1a4   :  { %v4409_v12 = vsel %vm501_vm5, 0, %v490_v61 }
 0x1a5   :  { %518 = vrot.lane.b32.xlu1 %v4409_v12, %s4072_s25  ;;  %v639_v49 = vsel %vm348_vm3, %v4409_v12, 0 }
 0x1ab   :  { %v492_v14 = vpop.permute.xlu2 %491 }
 0x1ac   :  { %v4414_v15 = vsel %vm501_vm5, %v490_v61, %v492_v14  ;;  %v513_v61 = vld [vmem:[%s5689_s24] sm:$0xf] }
 0x1ad   :  { %520 = vrot.lane.b32.xlu2 %v4414_v15, %s4072_s25  ;;  %v642_v50 = vsel %vm348_vm3, %v4414_v15, 0 }
 0x1bd   :  { %v500_v18 = vpop.permute.xlu2 %499 }
 0x1cf   :  { %v494_v16 = vpop.permute.xlu0 %493 }
 0x1d0   :  { %v4419_v17 = vsel %vm501_vm5, %v492_v14, %v494_v16 }
 0x1d1   :  { %522 = vrot.lane.b32.xlu0 %v4419_v17, %s4072_s25  ;;  %v645_v51 = vsel %vm348_vm3, %v4419_v17, 0 }
 0x1d5   :  { %v498_v19 = vpop.permute.xlu1 %497 }
 0x1d6   :  { %v506_v20 = vsel %vm501_vm5, %v498_v19, %v500_v18 }
 0x1d7   :  { %v4425_v21 = vsel %vm170_vm2, %v506_v20, 0  ;;  %v496_v23 = vpop.permute.xlu0 %495  ;;  %vm2900_vm2 = vcmask 965632  }
 0x1d8   :  { %528 = vrot.lane.b32.xlu2 %v4425_v21, %s4072_s25  ;;  %v4430_v24 = vsel %vm501_vm5, %v494_v16, %v496_v23  ;;  %v4433_v25 = vsel %vm501_vm5, %v496_v23, %v498_v19  ;;  %v653_v60 = vsel %vm348_vm3, %v4425_v21, 0  ;;  %vm2990_vm5 = vcmask 949248  }
 0x1d9   :  { %526 = vrot.lane.b32.xlu1 %v4433_v25, %s4072_s25  ;;  %524 = vrot.lane.b32.xlu0 %v4430_v24, %s4072_s25  ;;  %v648_v38 = vsel %vm348_vm3, %v4430_v24, 0  ;;  %v651_v56 = vsel %vm348_vm3, %v4433_v25, 0 }
 0x1e0   :  { %737 = vrot.lane.b32.xlu2 %v4414_v15, %s4073_s20 }
 0x1e1   :  { %735 = vrot.lane.b32.xlu1 %v4409_v12, %s4073_s20  ;;  %739 = vrot.lane.b32.xlu0 %v4419_v17, %s4073_s20 }
 0x1e8   :  { %745 = vrot.lane.b32.xlu2 %v4425_v21, %s4073_s20 }
 0x1e9   :  { %743 = vrot.lane.b32.xlu1 %v4433_v25, %s4073_s20  ;;  %864 = vrot.lane.b32.xlu0 %v4419_v17, %s4074_s1 }
 0x1f0   :  { %741 = vrot.lane.b32.xlu2 %v4430_v24, %s4073_s20 }
 0x1f1   :  { %866 = vrot.lane.b32.xlu1 %v4430_v24, %s4074_s1  ;;  %868 = vrot.lane.b32.xlu0 %v4433_v25, %s4074_s1 }
 0x1f8   :  { %987 = vrot.lane.b32.xlu2 %v4414_v15, %s4075_s26 }
 0x1f9   :  { %985 = vrot.lane.b32.xlu1 %v4409_v12, %s4075_s26  ;;  %860 = vrot.lane.b32.xlu0 %v4409_v12, %s4074_s1 }
 0x200   :  { %989 = vrot.lane.b32.xlu2 %v4419_v17, %s4075_s26 }
 0x201   :  { %993 = vrot.lane.b32.xlu0 %v4433_v25, %s4075_s26  ;;  %862 = vrot.lane.b32.xlu1 %v4414_v15, %s4074_s1 }
 0x207   :  { %v521_v26 = vpop.permute.xlu2 %520 }
 0x208   :  { %870 = vrot.lane.b32.xlu2 %v4425_v21, %s4074_s1 }
 0x209   :  { %1114 = vrot.lane.b32.xlu0 %v4419_v17, %s4076_s2  ;;  %995 = vrot.lane.b32.xlu1 %v4425_v21, %s4075_s26 }
 0x210   :  { %991 = vrot.lane.b32.xlu2 %v4430_v24, %s4075_s26  ;;  %s4085_s26 = smov 106  }
 0x211   :  { %1118 = vrot.lane.b32.xlu0 %v4433_v25, %s4076_s2  ;;  %1116 = vrot.lane.b32.xlu1 %v4430_v24, %s4076_s2 }
 0x217   :  { %v519_v27 = vpop.permute.xlu1 %518 }
 0x218   :  { %v531_v13 = vsel %vm530_vm6, %v519_v27, %v521_v26  ;;  %1237 = vrot.lane.b32.xlu2 %v4414_v15, %s4077_s30  ;;  %v3507_v27 = vld [vmem:[%s5689_s24 + $0x8] sm:$0xf] }
 0x219   :  { %v541_v28 = vsel %vm348_vm3, %v531_v13, 0  ;;  %1110 = vrot.lane.b32.xlu0 %v4409_v12, %s4076_s2  ;;  %1235 = vrot.lane.b32.xlu1 %v4409_v12, %s4077_s30 }
 0x21a   :  { %565 = vmatpush.bf16.msrb.mxu2 %v541_v28 }
 0x21d   :  { %3495 = vmatmul.msk.bf16.vlgmr.msrb.gmra.mxu2 %vm536_vm7, %v4479_v30 }
 0x220   :  { %1239 = vrot.lane.b32.xlu2 %v4419_v17, %s4077_s30 }
 0x221   :  { %1243 = vrot.lane.b32.xlu0 %v4433_v25, %s4077_s30  ;;  %1112 = vrot.lane.b32.xlu1 %v4414_v15, %s4076_s2 }
 0x228   :  { %1120 = vrot.lane.b32.xlu2 %v4425_v21, %s4076_s2 }
 0x229   :  { %1364 = vrot.lane.b32.xlu0 %v4419_v17, %s4078_s27  ;;  %1245 = vrot.lane.b32.xlu1 %v4425_v21, %s4077_s30 }
 0x230   :  { %1241 = vrot.lane.b32.xlu2 %v4430_v24, %s4077_s30 }
 0x231   :  { %1368 = vrot.lane.b32.xlu0 %v4433_v25, %s4078_s27  ;;  %1366 = vrot.lane.b32.xlu1 %v4430_v24, %s4078_s27 }
 0x232   :  { %v529_v31 = vpop.permute.xlu2 %528 }
 0x233   :  { %v556_v36 = vsel %vm348_vm3, %v529_v31, 0 }
 0x238   :  { %1487 = vrot.lane.b32.xlu2 %v4414_v15, %s4079_s8 }
 0x239   :  { %1360 = vrot.lane.b32.xlu0 %v4409_v12, %s4078_s27  ;;  %1485 = vrot.lane.b32.xlu1 %v4409_v12, %s4079_s8 }
 0x23a   :  { %v738_v37 = vpop.permute.xlu2 %737 }
 0x240   :  { %1489 = vrot.lane.b32.xlu2 %v4419_v17, %s4079_s8 }
 0x241   :  { %1370 = vrot.lane.b32.xlu0 %v4425_v21, %s4078_s27  ;;  %1362 = vrot.lane.b32.xlu1 %v4414_v15, %s4078_s27  ;;  %v1798_v15 = vld [vmem:[%s5655_s10 + $0x10] sm:$0xff] }
 0x242   :  { %v746_v58 = vpop.permute.xlu2 %745 }
 0x243   :  { %v523_v32 = vpop.permute.xlu0 %522  ;;  %v772_v23 = vsel %vm348_vm3, %v746_v58, 0 }
 0x244   :  { %v532_v33 = vsel %vm530_vm6, %v521_v26, %v523_v32 }
 0x245   :  { %v544_v35 = vsel %vm348_vm3, %v532_v33, 0 }
 0x246   :  { %578 = vmatpush.bf16.msra.mxu3 %v544_v35 }
 0x248   :  { %1495 = vrot.lane.b32.xlu2 %v4425_v21, %s4079_s8 }
 0x249   :  { %1491 = vrot.lane.b32.xlu0 %v4430_v24, %s4079_s8  ;;  %3496 = vmatmul.msk.bf16.vlgmr.msra.gmra.mxu3 %vm536_vm7, %v4479_v30 }
 0x24a   :  { %630 = vmatpush.bf16.msrb.mxu3 %v556_v36  ;;  %1493 = vrot.lane.b32.xlu1 %v4433_v25, %s4079_s8  ;;  %v742_v11 = vpop.permute.xlu2 %741 }
 0x24b   :  { %v527_v39 = vpop.permute.xlu1 %526  ;;  %v525_v41 = vpop.permute.xlu0 %524 }
 0x24c   :  { %v535_v42 = vsel %vm530_vm6, %v527_v39, %v529_v31  ;;  %v533_v43 = vsel %vm530_vm6, %v523_v32, %v525_v41  ;;  %v534_v44 = vsel %vm530_vm6, %v525_v41, %v527_v39 }
 0x24d   :  { %v553_v45 = vsel %vm348_vm3, %v535_v42, 0  ;;  %v547_v46 = vsel %vm348_vm3, %v533_v43, 0  ;;  %v550_v48 = vsel %vm348_vm3, %v534_v44, 0 }
 0x24e   :  { %701 = vmatpush.bf16.msra.mxu3 %v648_v38  ;;  %591 = vmatpush.bf16.msrb.mxu0 %v547_v46 }
 0x24f   :  { %604 = vmatpush.bf16.msrb.mxu1 %v550_v48  ;;  %617 = vmatpush.bf16.msra.mxu2 %v553_v45 }
 0x251   :  { %3497 = vmatmul.msk.bf16.vlgmr.msrb.gmra.mxu0 %vm536_vm7, %v4479_v30  ;;  %1645 = vperm.xlu0 %4066, %v1636_v52  }
 0x252   :  { %662 = vmatpush.bf16.msra.mxu0 %v639_v49  ;;  %3498 = vmatmul.msk.bf16.vlgmr.msrb.gmra.mxu1 %vm536_vm7, %v4479_v30  ;;  %v988_v21 = vpop.permute.xlu2 %987 }
 0x253   :  { %675 = vmatpush.bf16.msra.mxu1 %v642_v50  ;;  %688 = vmatpush.bf16.msrb.mxu2 %v645_v51  ;;  %v736_v62 = vpop.permute.xlu1 %735  ;;  %v740_v1 = vpop.permute.xlu0 %739 }
 0x254   :  { %1611 = vperm.xlu1 %4067, %v1608_v53   ;;  %3499 = vmatmul.msk.bf16.vlgmr.msra.gmra.mxu2 %vm536_vm7, %v4479_v30  ;;  %v748_v0 = vsel %vm747_vm8, %v736_v62, %v738_v37  ;;  %v749_v3 = vsel %vm747_vm8, %v738_v37, %v740_v1  ;;  %v750_v57 = vsel %vm747_vm8, %v740_v1, %v742_v11 }
 0x255   :  { %v757_v2 = vsel %vm348_vm3, %v748_v0, 0  ;;  %v760_v7 = vsel %vm348_vm3, %v749_v3, 0  ;;  %v763_v17 = vsel %vm348_vm3, %v750_v57, 0 }
 0x256   :  { %714 = vmatpush.bf16.msrb.mxu0 %v651_v56 }
 0x257   :  { %727 = vmatpush.bf16.msrb.mxu1 %v653_v60  ;;  %781 = vmatpush.bf16.msra.mxu2 %v757_v2  ;;  %v3514_v60 = vld [vmem:[%s5689_s24 + $0xc] sm:$0xf] }
 0x259   :  { %3500 = vmatmul.msk.bf16.vlgmr.msrb.gmra.mxu3 %vm536_vm7, %v4479_v30  ;;  %1650 = vperm.xlu0 %4066, %v1637_v4  }
 0x25a   :  { %794 = vmatpush.bf16.msrb.mxu3 %v760_v7  ;;  %v990_v13 = vpop.permute.xlu2 %989 }
 0x25b   :  { %v744_v10 = vpop.permute.xlu1 %743  ;;  %v865_v14 = vpop.permute.xlu0 %864  ;;  %v999_v49 = vsel %vm997_vm10, %v988_v21, %v990_v13 }
 0x25c   :  { %1801 = vperm.xlu1 %4067, %v1796_v5   ;;  %v751_v12 = vsel %vm747_vm8, %v742_v11, %v744_v10  ;;  %v752_v16 = vsel %vm747_vm8, %v744_v10, %v746_v58  ;;  %v1010_v51 = vsel %vm348_vm3, %v999_v49, 0 }
 0x25d   :  { %v766_v18 = vsel %vm348_vm3, %v751_v12, 0  ;;  %v769_v19 = vsel %vm348_vm3, %v752_v16, 0 }
 0x261   :  { %3501 = vmatmul.msk.bf16.vlgmr.msra.gmra.mxu0 %vm536_vm7, %v513_v61 }
 0x262   :  { %3502 = vmatmul.msk.bf16.vlgmr.msra.gmra.mxu1 %vm536_vm7, %v513_v61  ;;  %807 = vmatpush.bf16.msra.mxu0 %v763_v17  ;;  %v871_v39 = vpop.permute.xlu2 %870 }
 0x263   :  { %820 = vmatpush.bf16.msra.mxu1 %v766_v18  ;;  %v867_v20 = vpop.permute.xlu1 %866  ;;  %v869_v24 = vpop.permute.xlu0 %868  ;;  %v897_v45 = vsel %vm348_vm3, %v871_v39, 0 }
 0x264   :  { %1811 = vperm.xlu1 %4067, %v1798_v15   ;;  %3503 = vmatmul.msk.bf16.vlgmr.msrb.gmra.mxu2 %vm536_vm7, %v513_v61  ;;  %v875_v26 = vsel %vm872_vm9, %v865_v14, %v867_v20  ;;  %v876_v37 = vsel %vm872_vm9, %v867_v20, %v869_v24  ;;  %v877_v42 = vsel %vm872_vm9, %v869_v24, %v871_v39 }
 0x265   :  { %833 = vmatpush.bf16.msrb.mxu2 %v769_v19  ;;  %v888_v28 = vsel %vm348_vm3, %v875_v26, 0  ;;  %v891_v38 = vsel %vm348_vm3, %v876_v37, 0  ;;  %v894_v46 = vsel %vm348_vm3, %v877_v42, 0 }
 0x269   :  { %3504 = vmatmul.msk.bf16.vlgmr.msra.gmra.mxu3 %vm536_vm7, %v513_v61 }
 0x26a   :  { %846 = vmatpush.bf16.msra.mxu3 %v772_v23  ;;  %v992_v53 = vpop.permute.xlu2 %991 }
 0x26b   :  { %v986_v25 = vpop.permute.xlu1 %985  ;;  %v861_v30 = vpop.permute.xlu0 %860  ;;  %v1000_v56 = vsel %vm997_vm10, %v990_v13, %v992_v53 }
 0x26c   :  { %v998_v44 = vsel %vm997_vm10, %v986_v25, %v988_v21  ;;  %v1013_v0 = vsel %vm348_vm3, %v1000_v56, 0 }
 0x26d   :  { %v1007_v48 = vsel %vm348_vm3, %v998_v44, 0 }
 0x271   :  { %3505 = vmatmul.msk.bf16.vlgmr.msrb.gmra.mxu0 %vm536_vm7, %v513_v61 }
 0x272   :  { %3506 = vmatmul.msk.bf16.vlgmr.msrb.gmra.mxu1 %vm536_vm7, %v513_v61  ;;  %v1238_v5 = vpop.permute.xlu2 %1237 }
 0x273   :  { %v863_v31 = vpop.permute.xlu1 %862  ;;  %v994_v43 = vpop.permute.xlu0 %993 }
 0x274   :  { %3508 = vmatmul.msk.bf16.vlgmr.msra.gmra.mxu2 %vm536_vm7, %v3507_v27  ;;  %v873_v32 = vsel %vm872_vm9, %v861_v30, %v863_v31  ;;  %v874_v33 = vsel %vm872_vm9, %v863_v31, %v865_v14  ;;  %v1001_v58 = vsel %vm997_vm10, %v992_v53, %v994_v43  ;;  %v3521_v14 = vld [vmem:[%s5689_s24 + $0x10] sm:$0xf] }
 0x275   :  { %932 = vmatpush.bf16.msra.mxu2 %v888_v28  ;;  %v882_v35 = vsel %vm348_vm3, %v873_v32, 0  ;;  %v885_v36 = vsel %vm348_vm3, %v874_v33, 0  ;;  %v1016_v1 = vsel %vm348_vm3, %v1001_v58, 0 }
 0x276   :  { %906 = vmatpush.bf16.msrb.mxu0 %v882_v35  ;;  %919 = vmatpush.bf16.msrb.mxu1 %v885_v36 }
 0x279   :  { %3509 = vmatmul.msk.bf16.vlgmr.msrb.gmra.mxu3 %vm536_vm7, %v3507_v27 }
 0x27a   :  { %945 = vmatpush.bf16.msrb.mxu3 %v891_v38  ;;  %v1240_v17 = vpop.permute.xlu2 %1239 }
 0x27b   :  { %v996_v41 = vpop.permute.xlu1 %995  ;;  %v1115_v52 = vpop.permute.xlu0 %1114  ;;  %v1249_v32 = vsel %vm1247_vm12, %v1238_v5, %v1240_v17 }
 0x27c   :  { %v1002_v62 = vsel %vm997_vm10, %v994_v43, %v996_v41  ;;  %v1022_v7 = vsel %vm348_vm3, %v996_v41, 0  ;;  %v1260_v35 = vsel %vm348_vm3, %v1249_v32, 0  ;;  %v3528_v41 = vld [vmem:[%s5689_s24 + $0x14] sm:$0xf] }
 0x27d   :  { %v1019_v3 = vsel %vm348_vm3, %v1002_v62, 0 }
 0x281   :  { %3510 = vmatmul.msk.bf16.vlgmr.msra.gmra.mxu0 %vm536_vm7, %v3507_v27 }
 0x282   :  { %3511 = vmatmul.msk.bf16.vlgmr.msra.gmra.mxu1 %vm536_vm7, %v3507_v27  ;;  %958 = vmatpush.bf16.msra.mxu0 %v894_v46  ;;  %v1121_v24 = vpop.permute.xlu2 %1120 }
 0x283   :  { %971 = vmatpush.bf16.msra.mxu1 %v897_v45  ;;  %v1117_v50 = vpop.permute.xlu1 %1116  ;;  %v1119_v4 = vpop.permute.xlu0 %1118  ;;  %v1147_v28 = vsel %vm348_vm3, %v1121_v24, 0 }
 0x284   :  { %3512 = vmatmul.msk.bf16.vlgmr.msrb.gmra.mxu2 %vm536_vm7, %v3507_v27  ;;  %v1125_v12 = vsel %vm1122_vm11, %v1115_v52, %v1117_v50  ;;  %v1126_v20 = vsel %vm1122_vm11, %v1117_v50, %v1119_v4  ;;  %v1127_v26 = vsel %vm1122_vm11, %v1119_v4, %v1121_v24 }
 0x285   :  { %1031 = vmatpush.bf16.msrb.mxu2 %v1007_v48  ;;  %v1138_v18 = vsel %vm348_vm3, %v1125_v12, 0  ;;  %v1141_v21 = vsel %vm348_vm3, %v1126_v20, 0  ;;  %v1144_v30 = vsel %vm348_vm3, %v1127_v26, 0 }
 0x289   :  { %3513 = vmatmul.msk.bf16.vlgmr.msra.gmra.mxu3 %vm536_vm7, %v3507_v27 }
 0x28a   :  { %1044 = vmatpush.bf16.msra.mxu3 %v1010_v51  ;;  %v1242_v37 = vpop.permute.xlu2 %1241 }
 0x28b   :  { %v1236_v2 = vpop.permute.xlu1 %1235  ;;  %v1111_v11 = vpop.permute.xlu0 %1110  ;;  %v1250_v38 = vsel %vm1247_vm12, %v1240_v17, %v1242_v37 }
 0x28c   :  { %v1248_v13 = vsel %vm1247_vm12, %v1236_v2, %v1238_v5  ;;  %v1263_v43 = vsel %vm348_vm3, %v1250_v38, 0 }
 0x28d   :  { %v1257_v31 = vsel %vm348_vm3, %v1248_v13, 0 }
 0x291   :  { %3515 = vmatmul.msk.bf16.vlgmr.msrb.gmra.mxu0 %vm536_vm7, %v3514_v60 }
 0x292   :  { %3516 = vmatmul.msk.bf16.vlgmr.msrb.gmra.mxu1 %vm536_vm7, %v3514_v60  ;;  %1057 = vmatpush.bf16.msrb.mxu0 %v1013_v0  ;;  %v3535_v0 = vld [vmem:[%s5689_s24 + $0x18] sm:$0xf] }
 0x293   :  { %1070 = vmatpush.bf16.msrb.mxu1 %v1016_v1  ;;  %v1113_v10 = vpop.permute.xlu1 %1112  ;;  %v1244_v27 = vpop.permute.xlu0 %1243 }
 0x294   :  { %3517 = vmatmul.msk.bf16.vlgmr.msra.gmra.mxu2 %vm536_vm7, %v3514_v60  ;;  %v1123_v57 = vsel %vm1122_vm11, %v1111_v11, %v1113_v10  ;;  %v1124_v61 = vsel %vm1122_vm11, %v1113_v10, %v1115_v52  ;;  %v1251_v39 = vsel %vm1247_vm12, %v1242_v37, %v1244_v27 }
 0x295   :  { %1083 = vmatpush.bf16.msra.mxu2 %v1019_v3  ;;  %v1132_v15 = vsel %vm348_vm3, %v1123_v57, 0  ;;  %v1135_v16 = vsel %vm348_vm3, %v1124_v61, 0  ;;  %v1266_v44 = vsel %vm348_vm3, %v1251_v39, 0  ;;  %v1488_v57 = vpop.permute.xlu2 %1487 }
 0x299   :  { %3518 = vmatmul.msk.bf16.vlgmr.msrb.gmra.mxu3 %vm536_vm7, %v3514_v60 }
 0x29a   :  { %1096 = vmatpush.bf16.msrb.mxu3 %v1022_v7 }
 0x29b   :  { %v1246_v25 = vpop.permute.xlu1 %1245  ;;  %v1365_v36 = vpop.permute.xlu0 %1364 }
 0x29c   :  { %v1252_v42 = vsel %vm1247_vm12, %v1244_v27, %v1246_v25  ;;  %v1272_v49 = vsel %vm348_vm3, %v1246_v25, 0 }
 0x29d   :  { %v1269_v46 = vsel %vm348_vm3, %v1252_v42, 0  ;;  %v1490_v26 = vpop.permute.xlu2 %1489 }
 0x29e   :  { %v1499_v13 = vsel %vm1497_vm14, %v1488_v57, %v1490_v26 }
 0x2a0   :  { %v4618_v19 = vpop.f32.mrf.mxu2 }
 0x2a1   :  { %3519 = vmatmul.msk.bf16.vlgmr.msra.gmra.mxu0 %vm536_vm7, %v3514_v60 }
 0x2a2   :  { %3520 = vmatmul.msk.bf16.vlgmr.msra.gmra.mxu1 %vm536_vm7, %v3514_v60  ;;  %1156 = vmatpush.bf16.msra.mxu0 %v1132_v15 }
 0x2a3   :  { %1169 = vmatpush.bf16.msra.mxu1 %v1135_v16  ;;  %v1367_v33 = vpop.permute.xlu1 %1366  ;;  %v1369_v48 = vpop.permute.xlu0 %1368 }
 0x2a4   :  { %3522 = vmatmul.msk.bf16.vlgmr.msrb.gmra.mxu2 %vm536_vm7, %v3521_v14  ;;  %v1375_v62 = vsel %vm1372_vm13, %v1365_v36, %v1367_v33  ;;  %v1376_v5 = vsel %vm1372_vm13, %v1367_v33, %v1369_v48  ;;  %v1510_v33 = vsel %vm348_vm3, %v1499_v13, 0 }
 0x2a5   :  { %1182 = vmatpush.bf16.msrb.mxu2 %v1138_v18  ;;  %v1388_v3 = vsel %vm348_vm3, %v1375_v62, 0  ;;  %v1391_v61 = vsel %vm348_vm3, %v1376_v5, 0 }
 0x2a8   :  { %v569_v23 = vpop.f32.mrf.mxu2 }
 0x2a9   :  { %3523 = vmatmul.msk.bf16.vlgmr.msra.gmra.mxu3 %vm536_vm7, %v3521_v14 }
 0x2aa   :  { %1195 = vmatpush.bf16.msra.mxu3 %v1141_v21 }
 0x2ab   :  { %v1486_v45 = vpop.permute.xlu1 %1485  ;;  %v1361_v51 = vpop.permute.xlu0 %1360 }
 0x2ac   :  { %v1498_v21 = vsel %vm1497_vm14, %v1486_v45, %v1488_v57  ;;  %v1496_v45 = vpop.permute.xlu2 %1495  ;;  %v3549_v57 = vld [vmem:[%s5689_s24 + $0x20] sm:$0xf] }
 0x2ad   :  { %v1507_v27 = vsel %vm348_vm3, %v1498_v21, 0 }
 0x2b1   :  { %3524 = vmatmul.msk.bf16.vlgmr.msrb.gmra.mxu0 %vm536_vm7, %v3521_v14 }
 0x2b2   :  { %3525 = vmatmul.msk.bf16.vlgmr.msrb.gmra.mxu1 %vm536_vm7, %v3521_v14  ;;  %1208 = vmatpush.bf16.msrb.mxu0 %v1144_v30 }
 0x2b3   :  { %1221 = vmatpush.bf16.msrb.mxu1 %v1147_v28  ;;  %v1363_v50 = vpop.permute.xlu1 %1362  ;;  %v1371_v12 = vpop.permute.xlu0 %1370 }
 0x2b4   :  { %3526 = vmatmul.msk.bf16.vlgmr.msra.gmra.mxu2 %vm536_vm7, %v3521_v14  ;;  %v1373_v53 = vsel %vm1372_vm13, %v1361_v51, %v1363_v50  ;;  %v1374_v56 = vsel %vm1372_vm13, %v1363_v50, %v1365_v36  ;;  %v1377_v15 = vsel %vm1372_vm13, %v1369_v48, %v1371_v12  ;;  %v1397_v25 = vsel %vm348_vm3, %v1371_v12, 0 }
 0x2b5   :  { %1281 = vmatpush.bf16.msra.mxu2 %v1257_v31  ;;  %v1382_v1 = vsel %vm348_vm3, %v1373_v53, 0  ;;  %v1385_v2 = vsel %vm348_vm3, %v1374_v56, 0  ;;  %v1394_v24 = vsel %vm348_vm3, %v1377_v15, 0 }
 0x2b9   :  { %3527 = vmatmul.msk.bf16.vlgmr.msrb.gmra.mxu3 %vm536_vm7, %v3521_v14 }
 0x2ba   :  { %1294 = vmatpush.bf16.msrb.mxu3 %v1260_v35 }
 0x2bb   :  { %v1492_v35 = vpop.permute.xlu0 %1491 }
 0x2bc   :  { %v1494_v36 = vpop.permute.xlu1 %1493  ;;  %v1500_v38 = vsel %vm1497_vm14, %v1490_v26, %v1492_v35 }
 0x2bd   :  { %v1501_v39 = vsel %vm1497_vm14, %v1492_v35, %v1494_v36  ;;  %v1513_v51 = vsel %vm348_vm3, %v1500_v38, 0 }
 0x2c1   :  { %3529 = vmatmul.msk.bf16.vlgmr.msra.gmra.mxu0 %vm536_vm7, %v3528_v41 }
 0x2c2   :  { %3530 = vmatmul.msk.bf16.vlgmr.msra.gmra.mxu1 %vm536_vm7, %v3528_v41  ;;  %1307 = vmatpush.bf16.msra.mxu0 %v1263_v43 }
 0x2c3   :  { %1320 = vmatpush.bf16.msra.mxu1 %v1266_v44  ;;  %v3542_v44 = vld [vmem:[%s5689_s24 + $0x1c] sm:$0xf]  ;;  %s4083_s24 = smov 116  }
 0x2c4   :  { %3531 = vmatmul.msk.bf16.vlgmr.msrb.gmra.mxu2 %vm536_vm7, %v3528_v41 }
 0x2c5   :  { %1333 = vmatpush.bf16.msrb.mxu2 %v1269_v46 }
 0x2c9   :  { %3532 = vmatmul.msk.bf16.vlgmr.msra.gmra.mxu3 %vm536_vm7, %v3528_v41 }
 0x2ca   :  { %1346 = vmatpush.bf16.msra.mxu3 %v1272_v49  ;;  %v1502_v49 = vsel %vm1497_vm14, %v1494_v36, %v1496_v45 }
 0x2cb   :  { %v1519_v53 = vsel %vm348_vm3, %v1502_v49, 0 }
 0x2cc   :  { %v580_v52 = vpop.f32.mrf.mxu3 }
 0x2ce   :  { %v593_v58 = vpop.f32.mrf.mxu0 }
 0x2cf   :  { %v606_v60 = vpop.f32.mrf.mxu1 }
 0x2d1   :  { %3533 = vmatmul.msk.bf16.vlgmr.msrb.gmra.mxu0 %vm536_vm7, %v3528_v41 }
 0x2d2   :  { %3534 = vmatmul.msk.bf16.vlgmr.msrb.gmra.mxu1 %vm536_vm7, %v3528_v41  ;;  %1406 = vmatpush.bf16.msrb.mxu0 %v1382_v1  ;;  %v1522_v1 = vsel %vm348_vm3, %v1496_v45, 0 }
 0x2d3   :  { %1419 = vmatpush.bf16.msrb.mxu1 %v1385_v2 }
 0x2d4   :  { %3536 = vmatmul.msk.bf16.vlgmr.msra.gmra.mxu2 %vm536_vm7, %v3535_v0  ;;  %v582_v4 = vpop.f32.mrf.mxu3 }
 0x2d5   :  { %1432 = vmatpush.bf16.msra.mxu2 %v1388_v3 }
 0x2d6   :  { %v595_v10 = vpop.f32.mrf.mxu0 }
 0x2d7   :  { %v619_v7 = vpop.f32.mrf.mxu2  ;;  %v608_v11 = vpop.f32.mrf.mxu1 }
 0x2d9   :  { %3537 = vmatmul.msk.bf16.vlgmr.msrb.gmra.mxu3 %vm536_vm7, %v3535_v0 }
 0x2da   :  { %1445 = vmatpush.bf16.msrb.mxu3 %v1391_v61 }
 0x2dc   :  { %v632_v14 = vpop.f32.mrf.mxu3 }
 0x2de   :  { %v664_v17 = vpop.f32.mrf.mxu0 }
 0x2df   :  { %v621_v16 = vpop.f32.mrf.mxu2  ;;  %v665_v18 = vadd.f32 %v664_v17, %v4618_v19  ;;  %v677_v20 = vpop.f32.mrf.mxu1 }
 0x2e0   :  { %v678_v23 = vadd.f32 %v677_v20, %v580_v52  ;;  %v1516_v52 = vsel %vm348_vm3, %v1501_v39, 0 }
 0x2e1   :  { %3538 = vmatmul.msk.bf16.vlgmr.msra.gmra.mxu0 %vm536_vm7, %v3535_v0 }
 0x2e2   :  { %3539 = vmatmul.msk.bf16.vlgmr.msra.gmra.mxu1 %vm536_vm7, %v3535_v0  ;;  %1458 = vmatpush.bf16.msra.mxu0 %v1394_v24 }
 0x2e3   :  { %1471 = vmatpush.bf16.msra.mxu1 %v1397_v25 }
 0x2e4   :  { %3540 = vmatmul.msk.bf16.vlgmr.msrb.gmra.mxu2 %vm536_vm7, %v3535_v0  ;;  %v634_v19 = vpop.f32.mrf.mxu3 }
 0x2e5   :  { %1531 = vmatpush.bf16.msrb.mxu2 %v1507_v27 }
 0x2e6   :  { %v666_v30 = vpop.f32.mrf.mxu0 }
 0x2e7   :  { %v690_v28 = vpop.f32.mrf.mxu2  ;;  %v679_v32 = vpop.f32.mrf.mxu1 }
 0x2e8   :  { %v691_v31 = vadd.f32 %v690_v28, %v593_v58 }
 0x2e9   :  { %3541 = vmatmul.msk.bf16.vlgmr.msra.gmra.mxu3 %vm536_vm7, %v3535_v0 }
 0x2ea   :  { %1544 = vmatpush.bf16.msra.mxu3 %v1510_v33 }
 0x2ec   :  { %v703_v37 = vpop.f32.mrf.mxu3 }
 0x2ed   :  { %v704_v42 = vadd.f32 %v703_v37, %v606_v60 }
 0x2ee   :  { %v716_v43 = vpop.f32.mrf.mxu0 }
 0x2ef   :  { %v692_v41 = vpop.f32.mrf.mxu2  ;;  %v717_v46 = vadd.f32 %v716_v43, %v619_v7  ;;  %v729_v48 = vpop.f32.mrf.mxu1 }
 0x2f0   :  { %v730_v50 = vadd.f32 %v729_v48, %v632_v14 }
 0x2f1   :  { %3543 = vmatmul.msk.bf16.vlgmr.msrb.gmra.mxu0 %vm536_vm7, %v3542_v44 }
 0x2f2   :  { %3544 = vmatmul.msk.bf16.vlgmr.msrb.gmra.mxu1 %vm536_vm7, %v3542_v44  ;;  %1557 = vmatpush.bf16.msrb.mxu0 %v1513_v51 }
 0x2f3   :  { %1570 = vmatpush.bf16.msrb.mxu1 %v1516_v52 }
 0x2f4   :  { %3545 = vmatmul.msk.bf16.vlgmr.msra.gmra.mxu2 %vm536_vm7, %v3542_v44  ;;  %v705_v56 = vpop.f32.mrf.mxu3 }
 0x2f5   :  { %1583 = vmatpush.bf16.msra.mxu2 %v1519_v53 }
 0x2f6   :  { %v718_v60 = vpop.f32.mrf.mxu0 }
 0x2f7   :  { %v783_v58 = vpop.f32.mrf.mxu2  ;;  %v731_v0 = vpop.f32.mrf.mxu1 }
 0x2f8   :  { %v852_v62 = vadd.f32 %v783_v58, %v665_v18 }
 0x2f9   :  { %3546 = vmatmul.msk.bf16.vlgmr.msrb.gmra.mxu3 %vm536_vm7, %v3542_v44 }
 0x2fa   :  { %1596 = vmatpush.bf16.msrb.mxu3 %v1522_v1 }
 0x2fc   :  { %v796_v2 = vpop.f32.mrf.mxu3 }
 0x2fd   :  { %v853_v4 = vadd.f32 %v796_v2, %v678_v23 }
 0x2fe   :  { %v809_v5 = vpop.f32.mrf.mxu0 }
 0x2ff   :  { %v785_v3 = vpop.f32.mrf.mxu2  ;;  %v854_v7 = vadd.f32 %v809_v5, %v691_v31  ;;  %v822_v10 = vpop.f32.mrf.mxu1 }
 0x300   :  { %v855_v11 = vadd.f32 %v822_v10, %v704_v42 }
 0x301   :  { %3547 = vmatmul.msk.bf16.vlgmr.msra.gmra.mxu0 %vm536_vm7, %v3542_v44 }
 0x302   :  { %3548 = vmatmul.msk.bf16.vlgmr.msra.gmra.mxu1 %vm536_vm7, %v3542_v44 }
 0x304   :  { %3550 = vmatmul.msk.bf16.vlgmr.msrb.gmra.mxu2 %vm536_vm7, %v3549_v57  ;;  %v798_v61 = vpop.f32.mrf.mxu3 }
 0x306   :  { %v811_v14 = vpop.f32.mrf.mxu0 }
 0x307   :  { %v835_v12 = vpop.f32.mrf.mxu2  ;;  %v824_v16 = vpop.f32.mrf.mxu1 }
 0x308   :  { %v856_v15 = vadd.f32 %v835_v12, %v717_v46 }
 0x309   :  { %3551 = vmatmul.msk.bf16.vlgmr.msra.gmra.mxu3 %vm536_vm7, %v3549_v57 }
 0x30c   :  { %v848_v17 = vpop.f32.mrf.mxu3 }
 0x30d   :  { %v857_v20 = vadd.f32 %v848_v17, %v730_v50 }
 0x30e   :  { %v908_v21 = vpop.f32.mrf.mxu0 }
 0x30f   :  { %v837_v18 = vpop.f32.mrf.mxu2  ;;  %v977_v23 = vadd.f32 %v908_v21, %v852_v62  ;;  %v921_v24 = vpop.f32.mrf.mxu1 }
 0x310   :  { %v978_v25 = vadd.f32 %v921_v24, %v853_v4 }
 0x311   :  { %3552 = vmatmul.msk.bf16.vlgmr.msrb.gmra.mxu0 %vm536_vm7, %v3549_v57 }
 0x312   :  { %3553 = vmatmul.msk.bf16.vlgmr.msrb.gmra.mxu1 %vm536_vm7, %v3549_v57 }
 0x314   :  { %3554 = vmatmul.msk.bf16.vlgmr.msra.gmra.mxu2 %vm536_vm7, %v3549_v57  ;;  %v850_v26 = vpop.f32.mrf.mxu3 }
 0x316   :  { %v910_v19 = vpop.f32.mrf.mxu0 }
 0x317   :  { %v934_v27 = vpop.f32.mrf.mxu2  ;;  %v923_v28 = vpop.f32.mrf.mxu1 }
 0x318   :  { %v979_v13 = vadd.f32 %v934_v27, %v854_v7 }
 0x319   :  { %3555 = vmatmul.msk.bf16.vlgmr.msrb.gmra.mxu3 %vm536_vm7, %v3549_v57 }
 0x31c   :  { %v947_v30 = vpop.f32.mrf.mxu3 }
 0x31d   :  { %v980_v32 = vadd.f32 %v947_v30, %v855_v11 }
 0x31e   :  { %v960_v33 = vpop.f32.mrf.mxu0 }
 0x31f   :  { %v936_v31 = vpop.f32.mrf.mxu2  ;;  %v981_v35 = vadd.f32 %v960_v33, %v856_v15  ;;  %v973_v36 = vpop.f32.mrf.mxu1 }
 0x320   :  { %v982_v37 = vadd.f32 %v973_v36, %v857_v20 }
 0x324   :  { %v949_v38 = vpop.f32.mrf.mxu3 }
 0x326   :  { %v962_v41 = vpop.f32.mrf.mxu0 }
 0x327   :  { %v1033_v39 = vpop.f32.mrf.mxu2  ;;  %v975_v43 = vpop.f32.mrf.mxu1 }
 0x328   :  { %v1102_v42 = vadd.f32 %v1033_v39, %v977_v23 }
 0x32c   :  { %v1046_v44 = vpop.f32.mrf.mxu3 }
 0x32d   :  { %v1103_v46 = vadd.f32 %v1046_v44, %v978_v25 }
 0x32e   :  { %v1059_v48 = vpop.f32.mrf.mxu0 }
 0x32f   :  { %v1035_v45 = vpop.f32.mrf.mxu2  ;;  %v1104_v49 = vadd.f32 %v1059_v48, %v979_v13  ;;  %v1072_v50 = vpop.f32.mrf.mxu1 }
 0x330   :  { %v1105_v51 = vadd.f32 %v1072_v50, %v980_v32 }
 0x334   :  { %v1048_v52 = vpop.f32.mrf.mxu3 }
 0x336   :  { %v1061_v56 = vpop.f32.mrf.mxu0 }
 0x337   :  { %v1085_v53 = vpop.f32.mrf.mxu2  ;;  %v1074_v60 = vpop.f32.mrf.mxu1 }
 0x338   :  { %v1106_v58 = vadd.f32 %v1085_v53, %v981_v35 }
 0x33c   :  { %v1098_v62 = vpop.f32.mrf.mxu3 }
 0x33d   :  { %v1107_v1 = vadd.f32 %v1098_v62, %v982_v37 }
 0x33e   :  { %v1158_v2 = vpop.f32.mrf.mxu0 }
 0x33f   :  { %v1087_v0 = vpop.f32.mrf.mxu2  ;;  %v1227_v3 = vadd.f32 %v1158_v2, %v1102_v42  ;;  %v1171_v4 = vpop.f32.mrf.mxu1 }
 0x340   :  { %v1228_v5 = vadd.f32 %v1171_v4, %v1103_v46 }
 0x344   :  { %v1100_v7 = vpop.f32.mrf.mxu3 }
 0x346   :  { %v1160_v11 = vpop.f32.mrf.mxu0 }
 0x347   :  { %v1184_v10 = vpop.f32.mrf.mxu2  ;;  %v1173_v61 = vpop.f32.mrf.mxu1 }
 0x348   :  { %v1229_v57 = vadd.f32 %v1184_v10, %v1104_v49 }
 0x34c   :  { %v1197_v12 = vpop.f32.mrf.mxu3 }
 0x34d   :  { %v1230_v62 = vadd.f32 %v1197_v12, %v1105_v51  ;;  %v4713_v51 = vld [vmem:[%s5656_s7] sm:$0xff] }
 0x34e   :  { %v1210_v15 = vpop.f32.mrf.mxu0 }
 0x34f   :  { %v1186_v14 = vpop.f32.mrf.mxu2  ;;  %v1231_v16 = vadd.f32 %v1210_v15, %v1106_v58  ;;  %v1223_v17 = vpop.f32.mrf.mxu1 }
 0x350   :  { %v4700_v18 = vadd.f32 %v1223_v17, %v1107_v1  ;;  %v4706_v58 = vpop.permute.xlu1 %1611 }
 0x354   :  { %v1199_v20 = vpop.f32.mrf.mxu3 }
 0x356   :  { %v1212_v23 = vpop.f32.mrf.mxu0 }
 0x357   :  { %v1283_v21 = vpop.f32.mrf.mxu2  ;;  %v1225_v24 = vpop.f32.mrf.mxu1 }
 0x358   :  { %v1352_v46 = vadd.f32 %v1283_v21, %v1227_v3 }
 0x35c   :  { %v1296_v25 = vpop.f32.mrf.mxu3 }
 0x35d   :  { %v1353_v0 = vadd.f32 %v1296_v25, %v1228_v5 }
 0x35e   :  { %v1309_v27 = vpop.f32.mrf.mxu0 }
 0x35f   :  { %v1285_v26 = vpop.f32.mrf.mxu2  ;;  %v1322_v19 = vpop.f32.mrf.mxu1  ;;  %v1354_v1 = vadd.f32 %v1309_v27, %v1229_v57 }
 0x360   :  { %v1355_v4 = vadd.f32 %v1322_v19, %v1230_v62  ;;  %v3710_v62 = vld [vmem:[%s5659_s22 + $0xf0] sm:$0xf] }
 0x364   :  { %v1298_v13 = vpop.f32.mrf.mxu3 }
 0x366   :  { %v1311_v30 = vpop.f32.mrf.mxu0 }
 0x367   :  { %v1335_v28 = vpop.f32.mrf.mxu2  ;;  %v1324_v31 = vpop.f32.mrf.mxu1 }
 0x368   :  { %v1356_v26 = vadd.f32 %v1335_v28, %v1231_v16  ;;  %v1634_v28 = vld [vmem:[%s5656_s7 + $0x8] sm:$0xf] }
 0x36c   :  { %v4702_v32 = vpop.f32.mrf.mxu3 }
 0x36e   :  { %v1408_v35 = vpop.f32.mrf.mxu0 }
 0x36f   :  { %v1337_v33 = vpop.f32.mrf.mxu2  ;;  %v1421_v36 = vpop.f32.mrf.mxu1  ;;  %v1477_v48 = vadd.f32 %v1408_v35, %v1352_v46  ;;  %v1635_v46 = vld [vmem:[%s5690_s0] sm:$0xff] }
 0x370   :  { %v1478_v7 = vadd.f32 %v1421_v36, %v1353_v0  ;;  %1640 = vperm.xlu2 %4068, %v1635_v46  }
 0x374   :  { %v1350_v37 = vpop.f32.mrf.mxu3 }
 0x376   :  { %v1410_v39 = vpop.f32.mrf.mxu0 }
 0x377   :  { %v1434_v38 = vpop.f32.mrf.mxu2  ;;  %v1423_v41 = vpop.f32.mrf.mxu1 }
 0x378   :  { %v1479_v10 = vadd.f32 %v1434_v38, %v1354_v1  ;;  %v3997_v1 = vld [vmem:[%s5659_s22 + $0xf4] sm:$0xf0] }
 0x37c   :  { %v1447_v42 = vpop.f32.mrf.mxu3 }
 0x37d   :  { %v1480_v3 = vadd.f32 %v1447_v42, %v1355_v4  ;;  %v3979_v4 = vld [vmem:[%s5659_s22 + $0x64] sm:$0xf0] }
 0x37e   :  { %v1460_v44 = vpop.f32.mrf.mxu0 }
 0x37f   :  { %v1436_v43 = vpop.f32.mrf.mxu2  ;;  %v4704_v45 = vpop.f32.mrf.mxu1  ;;  %v1481_v30 = vadd.f32 %v1460_v44, %v1356_v26  ;;  %v1357_v44 = vadd.f32 %v4702_v32, %v4700_v18 }
 0x384   :  { %v1449_v49 = vpop.f32.mrf.mxu3 }
 0x385   :  { %v1658_v49 = vunpack.c.l.b16 %v1634_v28  ;;  %v3606_v28 = vld [vmem:[%s5659_s22 + $0x20] sm:$0xf] }
 0x386   :  { %v1462_v52 = vpop.f32.mrf.mxu0 }
 0x387   :  { %v1533_v50 = vpop.f32.mrf.mxu2  ;;  %v1475_v56 = vpop.f32.mrf.mxu1 }
 0x388   :  { %v1602_v53 = vadd.f32 %v1533_v50, %v1477_v48 }
 0x38a   :  { %v1614_v60 = vadd.f32 %v4706_v58, %v1602_v53  ;;  %v1660_v53 = vpack.c.b16 %v1658_v49, %v1658_v49  ;;  %v3766_v49 = vld [vmem:[%s5659_s22 + $0x160] sm:$0xf] }
 0x38c   :  { %v1620_v2 = vmax.f32 %v1614_v60, 0.0  ;;  %v1546_v61 = vpop.f32.mrf.mxu3  ;;  %v3981_v60 = vld [vmem:[%s5659_s22 + $0x74] sm:$0xf0] }
 0x38d   :  { %v1603_v15 = vadd.f32 %v1546_v61, %v1478_v7  ;;  %v3711_v7 = vor.u32 %v3997_v1, %v3710_v62  ;;  %v3967_v62 = vld [vmem:[%s5659_s22 + $0x4] sm:$0xf0] }
 0x38e   :  { %v1626_v11 = vpack.c.bf16 %v1620_v2, %v1620_v2  ;;  %v1559_v17 = vpop.f32.mrf.mxu0  ;;  %v3638_v2 = vld [vmem:[%s5659_s22 + $0x60] sm:$0xf]  ;;  %v3983_v1 = vld [vmem:[%s5659_s22 + $0x84] sm:$0xf0] }
 0x38f   :  { %v1535_v14 = vpop.f32.mrf.mxu2  ;;  %v1604_v20 = vadd.f32 %v1559_v17, %v1479_v10  ;;  %v1572_v21 = vpop.f32.mrf.mxu1  ;;  %v1615_v5 = vadd.f32 %v4706_v58, %v1603_v15  ;;  %v3702_v10 = vld [vmem:[%s5659_s22 + $0xe0] sm:$0xf]  ;;  %v3639_v61 = vor.u32 %v3979_v4, %v3638_v2  ;;  %v3630_v17 = vld [vmem:[%s5659_s22 + $0x50] sm:$0xf] }
 0x390   :  { %v1668_v23 = vsel %vm348_vm3, %v1626_v11, 0  ;;  %v1605_v57 = vadd.f32 %v1572_v21, %v1480_v3  ;;  %v3995_v11 = vld [vmem:[%s5659_s22 + $0xe4] sm:$0xf0]  ;;  %v3694_v21 = vld [vmem:[%s5659_s22 + $0xd0] sm:$0xf] }
 0x391   :  { %1692 = vmatpush.bf16.msra.mxu0 %v1668_v23  ;;  %v1616_v12 = vadd.f32 %v4706_v58, %v1604_v20  ;;  %v1621_v24 = vmax.f32 %v1615_v5, 0.0  ;;  %v3703_v3 = vor.u32 %v3995_v11, %v3702_v10  ;;  %v3977_v20 = vld [vmem:[%s5659_s22 + $0x54] sm:$0xf0]  ;;  %v3622_v5 = vld [vmem:[%s5659_s22 + $0x40] sm:$0xf] }
 0x392   :  { %v1617_v25 = vadd.f32 %v4706_v58, %v1605_v57  ;;  %v3631_v23 = vor.u32 %v3977_v20, %v3630_v17  ;;  %v3975_v57 = vld [vmem:[%s5659_s22 + $0x44] sm:$0xf0]  ;;  %v3830_v11 = vld [vmem:[%s5659_s22 + $0x1e0] sm:$0xf] }
 0x393   :  { %v1622_v27 = vmax.f32 %v1616_v12, 0.0  ;;  %v1627_v19 = vpack.c.bf16 %v1621_v24, %v1621_v24  ;;  %v3686_v24 = vld [vmem:[%s5659_s22 + $0xc0] sm:$0xf]  ;;  %v3623_v26 = vor.u32 %v3975_v57, %v3622_v5  ;;  %v4007_v10 = vld [vmem:[%s5659_s22 + $0x144] sm:$0xf0] }
 0x394   :  { %3560 = vmatmul.msk.bf16.vlgmr.msra.gmra.mxu0 %vm536_vm7, %v4713_v51  ;;  %v1623_v13 = vmax.f32 %v1617_v25, 0.0  ;;  %v1548_v33 = vpop.f32.mrf.mxu3  ;;  %v3991_v25 = vld [vmem:[%s5659_s22 + $0xc4] sm:$0xf0]  ;;  %v3742_v5 = vld [vmem:[%s5659_s22 + $0x130] sm:$0xf] }
 0x395   :  { %v1628_v31 = vpack.c.bf16 %v1622_v27, %v1622_v27  ;;  %v1671_v37 = vsel %vm348_vm3, %v1627_v19, 0  ;;  %v3687_v27 = vor.u32 %v3991_v25, %v3686_v24  ;;  %v3614_v33 = vld [vmem:[%s5659_s22 + $0x30] sm:$0xf]  ;;  %v4005_v57 = vld [vmem:[%s5659_s22 + $0x134] sm:$0xf0] }
 0x396   :  { %v1629_v35 = vpack.c.bf16 %v1623_v13, %v1623_v13  ;;  %v1561_v38 = vpop.f32.mrf.mxu0  ;;  %1710 = vmatpush.bf16.msra.mxu1 %v1671_v37  ;;  %v3743_v24 = vor.u32 %v4005_v57, %v3742_v5  ;;  %v4025_v25 = vld [vmem:[%s5659_s22 + $0x1d4] sm:$0xf0]  ;;  %v3648_v5 = vld [vmem:[%s5659_s22 + $0x78] sm:$0xf0]  ;;  %v5046_v57 = vpop.permute.xlu1 %1801 }
 0x397   :  { %v1585_v36 = vpop.f32.mrf.mxu2  ;;  %v1674_v41 = vsel %vm348_vm3, %v1628_v31, 0  ;;  %v1574_v42 = vpop.f32.mrf.mxu1  ;;  %v3989_v38 = vld [vmem:[%s5659_s22 + $0xb4] sm:$0xf0] }
 0x398   :  { %v1606_v39 = vadd.f32 %v1585_v36, %v1481_v30  ;;  %1728 = vmatpush.bf16.msrb.mxu2 %v1674_v41  ;;  %v1677_v16 = vsel %vm348_vm3, %v1629_v35, 0  ;;  %v3973_v35 = vld [vmem:[%s5659_s22 + $0x34] sm:$0xf0]  ;;  %v3678_v36 = vld [vmem:[%s5659_s22 + $0xb0] sm:$0xf] }
 0x399   :  { %1746 = vmatpush.bf16.msra.mxu3 %v1677_v16  ;;  %3562 = vmatmul.msk.bf16.vlgmr.msra.gmra.mxu1 %vm536_vm7, %v4713_v51  ;;  %v3615_v37 = vor.u32 %v3973_v35, %v3614_v33  ;;  %v4013_v41 = vld [vmem:[%s5659_s22 + $0x174] sm:$0xf0]  ;;  %v3679_v42 = vor.u32 %v3989_v38, %v3678_v36  ;;  %v3734_v36 = vld [vmem:[%s5659_s22 + $0x120] sm:$0xf] }
 0x39a   :  { %v1618_v43 = vadd.f32 %v4706_v58, %v1606_v39  ;;  %v3774_v39 = vld [vmem:[%s5659_s22 + $0x170] sm:$0xf]  ;;  %v3814_v38 = vld [vmem:[%s5659_s22 + $0x1c0] sm:$0xf] }
 0x39b   :  { %3564 = vmatmul.msk.bf16.vlgmr.msrb.gmra.mxu2 %vm536_vm7, %v4713_v51  ;;  %v3775_v16 = vor.u32 %v4013_v41, %v3774_v39  ;;  %v4023_v41 = vld [vmem:[%s5659_s22 + $0x1c4] sm:$0xf0] }
 0x39c   :  { %1834 = vmatpush.bf16.msra.mxu2 %v4326_v6  ;;  %v1624_v48 = vmax.f32 %v1618_v43, 0.0  ;;  %v1482_v6 = vadd.f32 %v4704_v45, %v1357_v44  ;;  %3566 = vmatmul.msk.bf16.vlgmr.msra.gmra.mxu3 %vm536_vm7, %v4713_v51  ;;  %v1598_v32 = vpop.f32.mrf.mxu3  ;;  %v3971_v43 = vld [vmem:[%s5659_s22 + $0x24] sm:$0xf0]  ;;  %v3670_v44 = vld [vmem:[%s5659_s22 + $0xa0] sm:$0xf] }
 0x39d   :  { %1852 = vmatpush.bf16.msrb.mxu3 %v4343_v22  ;;  %v3607_v46 = vor.u32 %v3971_v43, %v3606_v28  ;;  %v3815_v43 = vor.u32 %v4023_v41, %v3814_v38  ;;  %v3862_v38 = vld [vmem:[%s5659_s22 + $0x220] sm:$0xf]  ;;  %v3978_v41 = vld [vmem:[%s5659_s22 + $0x64] sm:$0xf] }
 0x39e   :  { %v1630_v18 = vpack.c.bf16 %v1624_v48, %v1624_v48  ;;  %v1607_v22 = vadd.f32 %v1598_v32, %v1482_v6  ;;  %v3987_v48 = vld [vmem:[%s5659_s22 + $0xa4] sm:$0xf0] }
 0x39f   :  { %v1587_v50 = vpop.f32.mrf.mxu2  ;;  %v4011_v6 = vld [vmem:[%s5659_s22 + $0x164] sm:$0xf0]  ;;  %v3671_v32 = vor.u32 %v3987_v48, %v3670_v44 }
 0x3a0   :  { %1835 = vmatpush.bf16.msra.mxu2 %v4329_v8  ;;  %v1680_v52 = vsel %vm348_vm3, %v1630_v18, 0  ;;  %v1619_v45 = vadd.f32 %v4706_v58, %v1607_v22  ;;  %v3646_v58 = vld [vmem:[%s5659_s22 + $0x70] sm:$0xf]  ;;  %v3767_v22 = vor.u32 %v4011_v6, %v3766_v49 }
 0x3a1   :  { %1853 = vmatpush.bf16.msrb.mxu3 %v4349_v29  ;;  %1764 = vmatpush.bf16.msrb.mxu0 %v1680_v52  ;;  %v3647_v0 = vor.u32 %v3981_v60, %v3646_v58  ;;  %v3590_v58 = vld [vmem:[%s5659_s22] sm:$0xf]  ;;  %v3726_v6 = vld [vmem:[%s5659_s22 + $0x110] sm:$0xf] }
 0x3a2   :  { %v1625_v56 = vmax.f32 %v1619_v45, 0.0  ;;  %v3598_v45 = vld [vmem:[%s5659_s22 + $0x10] sm:$0xf]  ;;  %v3591_v2 = vor.u32 %v3967_v62, %v3590_v58  ;;  %v3878_v58 = vld [vmem:[%s5659_s22 + $0x240] sm:$0xf] }
 0x3a4   :  { %1906 = vmatpush.bf16.msrb.mxu2 %v4368_v47  ;;  %3561 = vmatmul.msk.bf16.gmra.mxu0 %vm536_vm7, %v1660_v53  ;;  %v1631_v8 = vpack.c.bf16 %v1625_v56, %v1625_v56  ;;  %v1600_v29 = vpop.f32.mrf.mxu3  ;;  %v3969_v56 = vld [vmem:[%s5659_s22 + $0x14] sm:$0xf0] }
 0x3a5   :  { %1924 = vmatpush.bf16.msra.mxu3 %v4391_v9  ;;  %1870 = vmatpush.bf16.msra.mxu0 %v4353_v34  ;;  %v3965_v34 = vld [vmem:[%s5657_s9] sm:$0xff]  ;;  %v3599_v29 = vor.u32 %v3969_v56, %v3598_v45  ;;  %v4021_v45 = vld [vmem:[%s5659_s22 + $0x1b4] sm:$0xf0]  ;;  %v3886_v56 = vld [vmem:[%s5659_s22 + $0x250] sm:$0xf] }
 0x3a6   :  { %v1683_v47 = vsel %vm348_vm3, %v1631_v8, 0  ;;  %v2703_v9 = vld [vmem:[%s5658_s12] sm:$0xff]  ;;  %v3662_v8 = vld [vmem:[%s5659_s22 + $0x90] sm:$0xf]  ;;  %s4082_s12 = smov 118  }
 0x3a7   :  { %1782 = vmatpush.bf16.msrb.mxu1 %v1683_v47  ;;  %v3985_v47 = vld [vmem:[%s5659_s22 + $0x94] sm:$0xf0] }
 0x3a8   :  { %1907 = vmatpush.bf16.msrb.mxu2 %v4373_v55 }
 0x3a9   :  { %1925 = vmatpush.bf16.msra.mxu3 %v4394_v54  ;;  %1871 = vmatpush.bf16.msra.mxu0 %v4360_v40  ;;  %v1795_v40 = vld [vmem:[%s5657_s9 + $0x8] sm:$0xf] }
 0x3aa   :  { %3563 = vmatmul.msk.bf16.gmra.mxu1 %vm536_vm7, %v1660_v53  ;;  %v1819_v55 = vunpack.c.l.b16 %v1795_v40  ;;  %v4009_v40 = vld [vmem:[%s5659_s22 + $0x154] sm:$0xf0] }
 0x3ab   :  { %1888 = vmatpush.bf16.msra.mxu1 %v4377_v59  ;;  %3565 = vmatmul.msk.bf16.gmra.mxu2 %vm536_vm7, %v1660_v53 }
 0x3ac   :  { %3567 = vmatmul.msk.bf16.gmra.mxu3 %vm536_vm7, %v1660_v53  ;;  %v1821_v59 = vpack.c.b16 %v1819_v55, %v1819_v55  ;;  %v3663_v55 = vor.u32 %v3985_v47, %v3662_v8  ;;  %v4041_v8 = vld [vmem:[%s5659_s22 + $0x254] sm:$0xf0] }
 0x3ad   :  { %v3887_v47 = vor.u32 %v4041_v8, %v3886_v56 }
 0x3af   :  { %1889 = vmatpush.bf16.msra.mxu1 %v4382_v63  ;;  %v1797_v63 = vld [vmem:[%s5655_s10 + $0x8] sm:$0xff]  ;;  %s4080_s10 = smov 11  }
 0x3b0   :  { %1806 = vperm.xlu2 %4068, %v1797_v63   ;;  %v3838_v63 = vld [vmem:[%s5659_s22 + $0x1f0] sm:$0xf] }
 0x3b4   :  { %3568 = vmatmul.msk.bf16.vlgmr.msrb.gmra.mxu0 %vm536_vm7, %v4713_v51 }
 0x3b5   :  { %2482 = vmatpush.bf16.msrb.mxu0 %v3647_v0  ;;  %v3654_v0 = vld [vmem:[%s5659_s22 + $0x80] sm:$0xf] }
 0x3b6   :  { %v3655_v4 = vor.u32 %v3983_v1, %v3654_v0 }
 0x3b8   :  { %2706 = vperm.xlu2 %4068, %v2703_v9   ;;  %v4029_v9 = vld [vmem:[%s5659_s22 + $0x1f4] sm:$0xf0] }
 0x3b9   :  { %2483 = vmatpush.bf16.msrb.mxu0 %v3639_v61  ;;  %v3839_v60 = vor.u32 %v4029_v9, %v3838_v63  ;;  %v4019_v9 = vld [vmem:[%s5659_s22 + $0x1a4] sm:$0xf0] }
 0x3ba   :  { %3570 = vmatmul.msk.bf16.vlgmr.msrb.gmra.mxu1 %vm536_vm7, %v4713_v51  ;;  %v3993_v51 = vld [vmem:[%s5659_s22 + $0xd4] sm:$0xf0] }
 0x3bb   :  { %3576 = vmatmul.msk.bf16.vlgmr.msra.gmra.mxu2 %vm344_vm4, %v3965_v34  ;;  %2500 = vmatpush.bf16.msrb.mxu1 %v3711_v7  ;;  %v3695_v12 = vor.u32 %v3993_v51, %v3694_v21  ;;  %v3750_v7 = vld [vmem:[%s5659_s22 + $0x140] sm:$0xf] }
 0x3bc   :  { %3578 = vmatmul.msk.bf16.vlgmr.msrb.gmra.mxu3 %vm344_vm4, %v3965_v34  ;;  %2518 = vmatpush.bf16.msra.mxu2 %v3775_v16  ;;  %v3751_v61 = vor.u32 %v4007_v10, %v3750_v7  ;;  %v4043_v16 = vld [vmem:[%s5659_s22 + $0x264] sm:$0xf0]  ;;  %v3790_v10 = vld [vmem:[%s5659_s22 + $0x190] sm:$0xf] }
 0x3bd   :  { %2484 = vmatpush.bf16.msrb.mxu0 %v3631_v23  ;;  %2536 = vmatpush.bf16.msrb.mxu3 %v3839_v60  ;;  %v4039_v60 = vld [vmem:[%s5659_s22 + $0x244] sm:$0xf0] }
 0x3be   :  { %v3879_v1 = vor.u32 %v4039_v60, %v3878_v58 }
 0x3bf   :  { %2501 = vmatpush.bf16.msrb.mxu1 %v3703_v3  ;;  %v4027_v3 = vld [vmem:[%s5659_s22 + $0x1e4] sm:$0xf0] }
 0x3c0   :  { %2519 = vmatpush.bf16.msra.mxu2 %v3767_v22  ;;  %v3831_v20 = vor.u32 %v4027_v3, %v3830_v11  ;;  %v3806_v22 = vld [vmem:[%s5659_s22 + $0x1b0] sm:$0xf]  ;;  %v4017_v11 = vld [vmem:[%s5659_s22 + $0x194] sm:$0xf0] }
 0x3c1   :  { %2485 = vmatpush.bf16.msrb.mxu0 %v3623_v26  ;;  %v3902_v26 = vld [vmem:[%s5659_s22 + $0x270] sm:$0xf]  ;;  %v3791_v3 = vor.u32 %v4017_v11, %v3790_v10 }
 0x3c2   :  { %2537 = vmatpush.bf16.msrb.mxu3 %v3831_v20  ;;  %v4037_v20 = vld [vmem:[%s5659_s22 + $0x234] sm:$0xf0] }
 0x3c3   :  { %2502 = vmatpush.bf16.msrb.mxu1 %v3695_v12  ;;  %v3822_v12 = vld [vmem:[%s5659_s22 + $0x1d0] sm:$0xf] }
 0x3c4   :  { %3569 = vmatmul.msk.bf16.gmra.mxu0 %vm536_vm7, %v1660_v53  ;;  %v3823_v33 = vor.u32 %v4025_v25, %v3822_v12 }
 0x3c5   :  { %2486 = vmatpush.bf16.msrb.mxu0 %v3615_v37  ;;  %v4003_v37 = vld [vmem:[%s5659_s22 + $0x124] sm:$0xf0] }
 0x3c6   :  { %2538 = vmatpush.bf16.msrb.mxu3 %v3823_v33  ;;  %v3735_v39 = vor.u32 %v4003_v37, %v3734_v36  ;;  %v3782_v33 = vld [vmem:[%s5659_s22 + $0x180] sm:$0xf] }
 0x3c7   :  { %2503 = vmatpush.bf16.msrb.mxu1 %v3687_v27  ;;  %v4045_v27 = vld [vmem:[%s5659_s22 + $0x274] sm:$0xf0] }
 0x3c8   :  { %v3903_v35 = vor.u32 %v4045_v27, %v3902_v26 }
 0x3c9   :  { %2487 = vmatpush.bf16.msrb.mxu0 %v3607_v46 }
 0x3ca   :  { %3571 = vmatmul.msk.bf16.gmra.mxu1 %vm536_vm7, %v1660_v53  ;;  %2539 = vmatpush.bf16.msrb.mxu3 %v3815_v43  ;;  %v3640_v43 = vld [vmem:[%s5659_s22 + $0x68] sm:$0xf0] }
 0x3cb   :  { %3577 = vmatmul.msk.bf16.gmra.mxu2 %vm344_vm4, %v1821_v59  ;;  %2504 = vmatpush.bf16.msrb.mxu1 %v3679_v42  ;;  %v3894_v42 = vld [vmem:[%s5659_s22 + $0x260] sm:$0xf] }
 0x3cc   :  { %3579 = vmatmul.msk.bf16.gmra.mxu3 %vm344_vm4, %v1821_v59  ;;  %v3895_v44 = vor.u32 %v4043_v16, %v3894_v42  ;;  %v5069_v42 = vpop.permute.xlu0 %1645 }
 0x3cd   :  { %2488 = vmatpush.bf16.msrb.mxu0 %v3599_v29  ;;  %v3807_v29 = vor.u32 %v4021_v45, %v3806_v22 }
 0x3cf   :  { %2505 = vmatpush.bf16.msrb.mxu1 %v3671_v32  ;;  %v4001_v32 = vld [vmem:[%s5659_s22 + $0x114] sm:$0xf0]  ;;  %2540 = vmatpush.bf16.msrb.mxu3 %v3807_v29  ;;  %v3854_v29 = vld [vmem:[%s5659_s22 + $0x210] sm:$0xf] }
 0x3d1   :  { %2489 = vmatpush.bf16.msrb.mxu0 %v3591_v2 }
 0x3d3   :  { %2506 = vmatpush.bf16.msrb.mxu1 %v3663_v55  ;;  %v3999_v55 = vld [vmem:[%s5659_s22 + $0x104] sm:$0xf0] }
 0x3d4   :  { %3580 = vmatmul.msk.bf16.vlgmr.msra.gmra.mxu0 %vm344_vm4, %v3965_v34 }
 0x3d5   :  { %2554 = vmatpush.bf16.msra.mxu0 %v3903_v35  ;;  %v4015_v35 = vld [vmem:[%s5659_s22 + $0x184] sm:$0xf0] }
 0x3d6   :  { %v3783_v37 = vor.u32 %v4015_v35, %v3782_v33 }
 0x3d7   :  { %2507 = vmatpush.bf16.msrb.mxu1 %v3655_v4 }
 0x3d9   :  { %2555 = vmatpush.bf16.msra.mxu0 %v3895_v44 }
 0x3da   :  { %3582 = vmatmul.msk.bf16.vlgmr.msra.gmra.mxu1 %vm344_vm4, %v3965_v34 }
 0x3db   :  { %3584 = vmatmul.msk.bf16.vlgmr.msrb.gmra.mxu2 %vm344_vm4, %v3965_v34 }
 0x3dc   :  { %3586 = vmatmul.msk.bf16.vlgmr.msra.gmra.mxu3 %vm344_vm4, %v3965_v34  ;;  %v3758_v34 = vld [vmem:[%s5659_s22 + $0x150] sm:$0xf] }
 0x3dd   :  { %2556 = vmatpush.bf16.msra.mxu0 %v3887_v47  ;;  %v3976_v47 = vld [vmem:[%s5659_s22 + $0x54] sm:$0xf] }
 0x3e1   :  { %2557 = vmatpush.bf16.msra.mxu0 %v3879_v1 }
 0x3e4   :  { %3581 = vmatmul.msk.bf16.gmra.mxu0 %vm344_vm4, %v1821_v59 }
 0x3ea   :  { %3583 = vmatmul.msk.bf16.gmra.mxu1 %vm344_vm4, %v1821_v59 }
 0x3eb   :  { %3585 = vmatmul.msk.bf16.gmra.mxu2 %vm344_vm4, %v1821_v59 }
 0x3ec   :  { %3587 = vmatmul.msk.bf16.gmra.mxu3 %vm344_vm4, %v1821_v59  ;;  %v3759_v59 = vor.u32 %v4009_v40, %v3758_v34  ;;  %v5004_v34 = vpop.permute.xlu2 %1640  ;;  %v3718_v40 = vld [vmem:[%s5659_s22 + $0x100] sm:$0xf] }
 0x3ed   :  { %v3719_v63 = vor.u32 %v3999_v55, %v3718_v40  ;;  %v3632_v55 = vld [vmem:[%s5659_s22 + $0x58] sm:$0xf0] }
 0x3ee   :  { %2520 = vmatpush.bf16.msra.mxu2 %v3759_v59  ;;  %v3798_v59 = vld [vmem:[%s5659_s22 + $0x1a0] sm:$0xf]  ;;  %v3635_v58 = vor.u32 %v3976_v47, %v3632_v55  ;;  %v3840_v47 = vld [vmem:[%s5659_s22 + $0x1f8] sm:$0xf0] }
 0x3ef   :  { %v3799_v0 = vor.u32 %v4019_v9, %v3798_v59  ;;  %v3996_v59 = vld [vmem:[%s5659_s22 + $0xf4] sm:$0xf] }
 0x3f1   :  { %2541 = vmatpush.bf16.msrb.mxu3 %v3799_v0 }
 0x3f2   :  { %2521 = vmatpush.bf16.msra.mxu2 %v3751_v61  ;;  %v3870_v61 = vld [vmem:[%s5659_s22 + $0x230] sm:$0xf] }
 0x3f3   :  { %v3871_v12 = vor.u32 %v4037_v20, %v3870_v61  ;;  %v3846_v61 = vld [vmem:[%s5659_s22 + $0x200] sm:$0xf] }
 0x3f5   :  { %2558 = vmatpush.bf16.msra.mxu0 %v3871_v12  ;;  %2542 = vmatpush.bf16.msrb.mxu3 %v3791_v3  ;;  %v4031_v3 = vld [vmem:[%s5659_s22 + $0x204] sm:$0xf0]  ;;  %v3974_v12 = vld [vmem:[%s5659_s22 + $0x44] sm:$0xf] }
 0x3f6   :  { %2522 = vmatpush.bf16.msra.mxu2 %v3743_v24 }
 0x3f9   :  { %2543 = vmatpush.bf16.msrb.mxu3 %v3783_v37  ;;  %v3704_v37 = vld [vmem:[%s5659_s22 + $0xe8] sm:$0xf0] }
 0x3fa   :  { %2523 = vmatpush.bf16.msra.mxu2 %v3735_v39  ;;  %v4035_v39 = vld [vmem:[%s5659_s22 + $0x224] sm:$0xf0] }
 0x40a   :  { %v5050_v27 = vpop.permute.xlu2 %1806 }
 0x411   :  { %v4788_v54 = vpop.f32.mrf.mxu0 }
 0x412   :  { %v1695_v36 = vadd.f32 %v4788_v54, %v5004_v34 }
 0x416   :  { %v4814_v14 = vpop.f32.mrf.mxu1 }
 0x417   :  { %v1713_v16 = vadd.f32 %v4814_v14, %v5004_v34 }
 0x419   :  { %v4816_v15 = vpop.f32.mrf.mxu0 }
 0x41a   :  { %v1697_v44 = vadd.f32 %v4816_v15, %v5069_v42  ;;  %v4033_v15 = vld [vmem:[%s5659_s22 + $0x214] sm:$0xf0] }
 0x41e   :  { %v4842_v19 = vpop.f32.mrf.mxu2  ;;  %v4844_v13 = vpop.f32.mrf.mxu1 }
 0x41f   :  { %v4846_v30 = vpop.f32.mrf.mxu3  ;;  %v1715_v45 = vadd.f32 %v4844_v13, %v5069_v42  ;;  %v3855_v13 = vor.u32 %v4033_v15, %v3854_v29  ;;  %v3776_v29 = vld [vmem:[%s5659_s22 + $0x178] sm:$0xf0] }
 0x421   :  { %v4848_v31 = vpop.f32.mrf.mxu0 }
 0x426   :  { %v4886_v18 = vpop.f32.mrf.mxu2 }
 0x427   :  { %v4888_v50 = vpop.f32.mrf.mxu1  ;;  %v4890_v52 = vpop.f32.mrf.mxu3 }
 0x429   :  { %v1701_v53 = vpop.f32.mrf.mxu0 }
 0x42a   :  { %v3727_v53 = vor.u32 %v4001_v32, %v3726_v6 }
 0x42c   :  { %2524 = vmatpush.bf16.msra.mxu2 %v3727_v53  ;;  %v3643_v53 = vor.u32 %v3978_v41, %v3640_v43 }
 0x42e   :  { %v4940_v17 = vpop.f32.mrf.mxu2 }
 0x42f   :  { %v1719_v21 = vpop.f32.mrf.mxu1  ;;  %v4942_v23 = vpop.f32.mrf.mxu3 }
 0x430   :  { %2525 = vmatpush.bf16.msra.mxu2 %v3719_v63  ;;  %v3980_v21 = vld [vmem:[%s5659_s22 + $0x74] sm:$0xf]  ;;  %v3712_v63 = vld [vmem:[%s5659_s22 + $0xf8] sm:$0xf0] }
 0x431   :  { %v4944_v51 = vpop.f32.mrf.mxu0  ;;  %v3651_v24 = vor.u32 %v3980_v21, %v3648_v5  ;;  %v3715_v60 = vor.u32 %v3996_v59, %v3712_v63  ;;  %v3847_v21 = vor.u32 %v4031_v3, %v3846_v61  ;;  %v3970_v59 = vld [vmem:[%s5659_s22 + $0x24] sm:$0xf]  ;;  %v3608_v63 = vld [vmem:[%s5659_s22 + $0x28] sm:$0xf0]  ;;  %v1731_v3 = vadd.f32 %v4842_v19, %v5004_v34  ;;  %v3600_v19 = vld [vmem:[%s5659_s22 + $0x18] sm:$0xf0] }
 0x432   :  { %v4026_v61 = vld [vmem:[%s5659_s22 + $0x1e4] sm:$0xf] }
 0x433   :  { %2608 = vmatpush.bf16.msra.mxu3 %v3715_v60  ;;  %v3990_v60 = vld [vmem:[%s5659_s22 + $0xc4] sm:$0xf] }
 0x434   :  { %2590 = vmatpush.bf16.msrb.mxu2 %v3651_v24  ;;  %v3624_v24 = vld [vmem:[%s5659_s22 + $0x48] sm:$0xf0] }
 0x436   :  { %v1737_v28 = vpop.f32.mrf.mxu2 }
 0x437   :  { %v1755_v46 = vpop.f32.mrf.mxu3  ;;  %v4982_v48 = vpop.f32.mrf.mxu1  ;;  %v3863_v28 = vor.u32 %v4035_v39, %v3862_v38 }
 0x438   :  { %2591 = vmatpush.bf16.msrb.mxu2 %v3643_v53 }
 0x439   :  { %v4984_v49 = vpop.f32.mrf.mxu0  ;;  %2559 = vmatpush.bf16.msra.mxu0 %v3863_v28  ;;  %v5135_v28 = vpop.permute.xlu0 %1650 }
 0x43a   :  { %v1700_v53 = vadd.f32 %v4848_v31, %v5135_v28 }
 0x43c   :  { %2592 = vmatpush.bf16.msrb.mxu2 %v3635_v58  ;;  %v3611_v58 = vor.u32 %v3970_v59, %v3608_v63 }
 0x43d   :  { %2560 = vmatpush.bf16.msra.mxu0 %v3855_v13 }
 0x43e   :  { %v1837_v62 = vpop.f32.mrf.mxu2 }
 0x43f   :  { %v5024_v2 = vpop.f32.mrf.mxu1  ;;  %v1855_v4 = vpop.f32.mrf.mxu3  ;;  %v1838_v25 = vadd.f32 %v1837_v62, %v5046_v57  ;;  %v5105_v62 = vld [vmem:[%s5659_s22 + $0x280] sm:$0xff] }
 0x440   :  { %v1856_v26 = vadd.f32 %v1855_v4, %v5046_v57  ;;  %v2306_v4 = vunpack.c.l.b16 %v5105_v62 }
 0x441   :  { %v5026_v7 = vpop.f32.mrf.mxu0  ;;  %v1936_v46 = vadd.f32 %v1838_v25, %v1695_v36  ;;  %v3994_v25 = vld [vmem:[%s5659_s22 + $0xe4] sm:$0xf]  ;;  %v3627_v36 = vor.u32 %v3974_v12, %v3624_v24  ;;  %2561 = vmatpush.bf16.msra.mxu0 %v3847_v21 }
 0x442   :  { %v1937_v14 = vadd.f32 %v1856_v26, %v1713_v16  ;;  %v2388_v5 = vpack.c.b16 %v2306_v4, %v2306_v4  ;;  %v5125_v26 = vpop.permute.xlu1 %1811 }
 0x443   :  { %v1954_v0 = vmax.f32 %v1936_v46, 0.0  ;;  %v3972_v46 = vld [vmem:[%s5659_s22 + $0x34] sm:$0xf]  ;;  %2593 = vmatpush.bf16.msrb.mxu2 %v3627_v36  ;;  %v1733_v36 = vadd.f32 %v4886_v18, %v5069_v42 }
 0x444   :  { %v1955_v10 = vmax.f32 %v1937_v14, 0.0  ;;  %v2477_v16 = vsel %vm348_vm3, %v2388_v5, 0 }
 0x445   :  { %2579 = vmatpush.bf16.msra.mxu1 %v2477_v16 }
 0x446   :  { %v1839_v54 = vpop.f32.mrf.mxu2 }
 0x447   :  { %v5078_v6 = vpop.f32.mrf.mxu1  ;;  %v1857_v32 = vpop.f32.mrf.mxu3  ;;  %v1840_v22 = vadd.f32 %v1839_v54, %v5050_v27  ;;  %v3707_v54 = vor.u32 %v3994_v25, %v3704_v37 }
 0x448   :  { %v1858_v8 = vadd.f32 %v1857_v32, %v5050_v27  ;;  %v3616_v32 = vld [vmem:[%s5659_s22 + $0x38] sm:$0xf0] }
 0x449   :  { %v1773_v56 = vpop.f32.mrf.mxu0  ;;  %v1942_v40 = vadd.f32 %v1840_v22, %v1697_v44  ;;  %v3992_v22 = vld [vmem:[%s5659_s22 + $0xd4] sm:$0xf]  ;;  %v3619_v14 = vor.u32 %v3972_v46, %v3616_v32  ;;  %2609 = vmatpush.bf16.msra.mxu3 %v3707_v54  ;;  %v3760_v46 = vld [vmem:[%s5659_s22 + $0x158] sm:$0xf0] }
 0x44a   :  { %v1943_v9 = vadd.f32 %v1858_v8, %v1715_v45  ;;  %v1718_v45 = vadd.f32 %v4888_v50, %v5135_v28  ;;  %v3696_v56 = vld [vmem:[%s5659_s22 + $0xd8] sm:$0xf0]  ;;  %v4012_v8 = vld [vmem:[%s5659_s22 + $0x174] sm:$0xf] }
 0x44b   :  { %v1960_v1 = vmax.f32 %v1942_v40, 0.0  ;;  %v3699_v31 = vor.u32 %v3992_v22, %v3696_v56  ;;  %v3779_v15 = vor.u32 %v4012_v8, %v3776_v29  ;;  %v4028_v50 = vld [vmem:[%s5659_s22 + $0x1f4] sm:$0xf]  ;;  %2594 = vmatpush.bf16.msrb.mxu2 %v3619_v14  ;;  %v3966_v14 = vld [vmem:[%s5659_s22 + $0x4] sm:$0xf] }
 0x44c   :  { %v1961_v11 = vmax.f32 %v1943_v9, 0.0  ;;  %v3843_v55 = vor.u32 %v4028_v50, %v3840_v47  ;;  %v3592_v29 = vld [vmem:[%s5659_s22 + $0x8] sm:$0xf0]  ;;  %v1749_v50 = vadd.f32 %v4846_v30, %v5004_v34  ;;  %v4022_v30 = vld [vmem:[%s5659_s22 + $0x1c4] sm:$0xf] }
 0x44d   :  { %v5114_v20 = vpack.c.bf16 %v1960_v1, %v1954_v0  ;;  %v3688_v0 = vld [vmem:[%s5659_s22 + $0xc8] sm:$0xf0]  ;;  %2610 = vmatpush.bf16.msra.mxu3 %v3699_v31  ;;  %v3986_v31 = vld [vmem:[%s5659_s22 + $0xa4] sm:$0xf] }
 0x44e   :  { %v1842_v33 = vpop.f32.mrf.mxu2  ;;  %v5127_v35 = vpack.c.bf16 %v1961_v11, %v1955_v10  ;;  %v3691_v4 = vor.u32 %v3990_v60, %v3688_v0  ;;  %v4010_v10 = vld [vmem:[%s5659_s22 + $0x164] sm:$0xf]  ;;  %v3768_v11 = vld [vmem:[%s5659_s22 + $0x168] sm:$0xf0] }
 0x44f   :  { %v1791_v38 = vpop.f32.mrf.mxu1  ;;  %v1843_v39 = vadd.f32 %v1842_v33, %v5125_v26  ;;  %v1860_v41 = vpop.f32.mrf.mxu3  ;;  %2490 = vmatmul.bf16.vlgmr.msrb.gmra.mxu0 %v5114_v20  ;;  %v3771_v25 = vor.u32 %v4010_v10, %v3768_v11  ;;  %v3832_v33 = vld [vmem:[%s5659_s22 + $0x1e8] sm:$0xf0]  ;;  %2595 = vmatpush.bf16.msrb.mxu2 %v3611_v58 }
 0x450   :  { %v1861_v43 = vadd.f32 %v1860_v41, %v5125_v26  ;;  %2508 = vmatmul.bf16.vlgmr.msrb.gmra.mxu1 %v5127_v35  ;;  %2626 = vmatpush.bf16.msrb.mxu0 %v3779_v15  ;;  %v3835_v38 = vor.u32 %v4026_v61, %v3832_v33  ;;  %v3988_v41 = vld [vmem:[%s5659_s22 + $0xb4] sm:$0xf]  ;;  %v3672_v15 = vld [vmem:[%s5659_s22 + $0xa8] sm:$0xf0]  ;;  %v3664_v33 = vld [vmem:[%s5659_s22 + $0x98] sm:$0xf0] }
 0x451   :  { %v1873_v44 = vpop.f32.mrf.mxu0  ;;  %v1948_v40 = vadd.f32 %v1843_v39, %v1700_v53  ;;  %2644 = vmatpush.bf16.msrb.mxu1 %v3843_v55  ;;  %v3968_v39 = vld [vmem:[%s5659_s22 + $0x14] sm:$0xf]  ;;  %2611 = vmatpush.bf16.msra.mxu3 %v3691_v4  ;;  %v3816_v58 = vld [vmem:[%s5659_s22 + $0x1c8] sm:$0xf0]  ;;  %v3675_v4 = vor.u32 %v3986_v31, %v3672_v15  ;;  %v4018_v31 = vld [vmem:[%s5659_s22 + $0x1a4] sm:$0xf]  ;;  %v1736_v15 = vadd.f32 %v4940_v17, %v5135_v28 }
 0x452   :  { %v5167_v13 = vadd.f32 %v1861_v43, %v1718_v45  ;;  %v1874_v9 = vadd.f32 %v1873_v44, %v5046_v57  ;;  %v3603_v18 = vor.u32 %v3968_v39, %v3600_v19  ;;  %v3680_v43 = vld [vmem:[%s5659_s22 + $0xb8] sm:$0xf0]  ;;  %v4008_v44 = vld [vmem:[%s5659_s22 + $0x154] sm:$0xf] }
 0x453   :  { %v1966_v21 = vmax.f32 %v1948_v40, 0.0  ;;  %v3683_v32 = vor.u32 %v3988_v41, %v3680_v43  ;;  %v3763_v22 = vor.u32 %v4008_v44, %v3760_v46  ;;  %v4024_v53 = vld [vmem:[%s5659_s22 + $0x1d4] sm:$0xf]  ;;  %v3824_v45 = vld [vmem:[%s5659_s22 + $0x1d8] sm:$0xf0] }
 0x454   :  { %v1967_v5 = vmax.f32 %v5167_v13, 0.0  ;;  %v1938_v16 = vadd.f32 %v1874_v9, %v1731_v3  ;;  %2627 = vmatpush.bf16.msrb.mxu0 %v3771_v25  ;;  %v3827_v8 = vor.u32 %v4024_v53, %v3824_v45  ;;  %v4006_v40 = vld [vmem:[%s5659_s22 + $0x144] sm:$0xf]  ;;  %v3752_v13 = vld [vmem:[%s5659_s22 + $0x148] sm:$0xf0]  ;;  %2596 = vmatpush.bf16.msrb.mxu2 %v3603_v18  ;;  %v3819_v3 = vor.u32 %v4022_v30, %v3816_v58 }
 0x455   :  { %2645 = vmatpush.bf16.msrb.mxu1 %v3835_v38  ;;  %v5245_v55 = vpack.c.bf16 %v1966_v21, %v1966_v21  ;;  %v3755_v9 = vor.u32 %v4006_v40, %v3752_v13  ;;  %2612 = vmatpush.bf16.msra.mxu3 %v3683_v32  ;;  %v1751_v21 = vadd.f32 %v4890_v52, %v5069_v42  ;;  %v3984_v25 = vld [vmem:[%s5659_s22 + $0x94] sm:$0xf]  ;;  %v3808_v39 = vld [vmem:[%s5659_s22 + $0x1b8] sm:$0xf0]  ;;  %v3982_v32 = vld [vmem:[%s5659_s22 + $0x84] sm:$0xf] }
 0x456   :  { %v1844_v1 = vpop.f32.mrf.mxu2  ;;  %v1956_v59 = vmax.f32 %v1938_v16, 0.0  ;;  %v5253_v60 = vpack.c.bf16 %v1967_v5, %v1967_v5  ;;  %v4020_v38 = vld [vmem:[%s5659_s22 + $0x1b4] sm:$0xf]  ;;  %v3667_v41 = vor.u32 %v3984_v25, %v3664_v33  ;;  %v3904_v18 = vld [vmem:[%s5659_s22 + $0x278] sm:$0xf0]  ;;  %v1767_v45 = vadd.f32 %v4944_v51, %v5004_v34 }
 0x457   :  { %v1862_v12 = vpop.f32.mrf.mxu3  ;;  %v1891_v24 = vpop.f32.mrf.mxu1  ;;  %v3595_v1 = vor.u32 %v3966_v14, %v3592_v29  ;;  %v3811_v44 = vor.u32 %v4020_v38, %v3808_v39  ;;  %v4002_v53 = vld [vmem:[%s5659_s22 + $0x124] sm:$0xf]  ;;  %v3736_v29 = vld [vmem:[%s5659_s22 + $0x128] sm:$0xf0]  ;;  %v1769_v40 = vadd.f32 %v4984_v49, %v5069_v42  ;;  %v1787_v49 = vadd.f32 %v5024_v2, %v5069_v42  ;;  %v4040_v42 = vld [vmem:[%s5659_s22 + $0x254] sm:$0xf] }
 0x458   :  { %v1892_v47 = vadd.f32 %v1891_v24, %v5046_v57  ;;  %2628 = vmatpush.bf16.msrb.mxu0 %v3763_v22  ;;  %v3656_v22 = vld [vmem:[%s5659_s22 + $0x88] sm:$0xf0]  ;;  %v3739_v51 = vor.u32 %v4002_v53, %v3736_v29 }
 0x459   :  { %v1875_v37 = vpop.f32.mrf.mxu0  ;;  %2646 = vmatpush.bf16.msrb.mxu1 %v3827_v8  ;;  %2597 = vmatpush.bf16.msrb.mxu2 %v3595_v1  ;;  %v3720_v38 = vld [vmem:[%s5659_s22 + $0x108] sm:$0xf0] }
 0x45a   :  { %v1876_v54 = vadd.f32 %v1875_v37, %v5050_v27  ;;  %v1939_v12 = vadd.f32 %v1892_v47, %v1749_v50  ;;  %v3744_v37 = vld [vmem:[%s5659_s22 + $0x138] sm:$0xf0]  ;;  %2613 = vmatpush.bf16.msra.mxu3 %v3675_v4  ;;  %v1785_v50 = vadd.f32 %v4982_v48, %v5004_v34  ;;  %v4042_v47 = vld [vmem:[%s5659_s22 + $0x264] sm:$0xf]  ;;  %v3659_v48 = vor.u32 %v3982_v32, %v3656_v22  ;;  %v3896_v34 = vld [vmem:[%s5659_s22 + $0x268] sm:$0xf0] }
 0x45b   :  { %v3899_v1 = vor.u32 %v4042_v47, %v3896_v34  ;;  %v3880_v32 = vld [vmem:[%s5659_s22 + $0x248] sm:$0xf0] }
 0x45c   :  { %v1944_v56 = vadd.f32 %v1876_v54, %v1733_v36  ;;  %v4004_v36 = vld [vmem:[%s5659_s22 + $0x134] sm:$0xf]  ;;  %2629 = vmatpush.bf16.msrb.mxu0 %v3755_v9  ;;  %v1957_v14 = vmax.f32 %v1939_v12, 0.0  ;;  %v3864_v34 = vld [vmem:[%s5659_s22 + $0x228] sm:$0xf0] }
 0x45d   :  { %v3747_v16 = vor.u32 %v4004_v36, %v3744_v37  ;;  %v4044_v54 = vld [vmem:[%s5659_s22 + $0x274] sm:$0xf]  ;;  %2647 = vmatpush.bf16.msrb.mxu1 %v3819_v3  ;;  %v3998_v37 = vld [vmem:[%s5659_s22 + $0x104] sm:$0xf] }
 0x45e   :  { %v1962_v63 = vmax.f32 %v1944_v56, 0.0  ;;  %v1909_v0 = vpop.f32.mrf.mxu2  ;;  %v3907_v46 = vor.u32 %v4044_v54, %v3904_v18  ;;  %2614 = vmatpush.bf16.msra.mxu3 %v3667_v41  ;;  %v4000_v3 = vld [vmem:[%s5659_s22 + $0x114] sm:$0xf]  ;;  %v4038_v54 = vld [vmem:[%s5659_s22 + $0x244] sm:$0xf]  ;;  %v1754_v18 = vadd.f32 %v4942_v23, %v5135_v28  ;;  %v3723_v53 = vor.u32 %v3998_v37, %v3720_v38 }
 0x45f   :  { %v1893_v11 = vpop.f32.mrf.mxu1  ;;  %v1927_v61 = vpop.f32.mrf.mxu3  ;;  %2495 = vmatmul.bf16.gmra.mxu0 %v5245_v55  ;;  %v1910_v52 = vadd.f32 %v1909_v0, %v5046_v57  ;;  %v4016_v12 = vld [vmem:[%s5659_s22 + $0x194] sm:$0xf] }
 0x460   :  { %v5255_v10 = vpack.c.bf16 %v1962_v63, %v1956_v59  ;;  %v1894_v5 = vadd.f32 %v1893_v11, %v5050_v27  ;;  %2513 = vmatmul.bf16.gmra.mxu1 %v5253_v60  ;;  %v1928_v8 = vadd.f32 %v1927_v61, %v5046_v57  ;;  %2630 = vmatpush.bf16.msrb.mxu0 %v3747_v16  ;;  %v3800_v57 = vld [vmem:[%s5659_s22 + $0x1a8] sm:$0xf0]  ;;  %v4014_v16 = vld [vmem:[%s5659_s22 + $0x184] sm:$0xf] }
 0x461   :  { %v1878_v24 = vpop.f32.mrf.mxu0  ;;  %v1940_v17 = vadd.f32 %v1910_v52, %v1767_v45  ;;  %2648 = vmatpush.bf16.msrb.mxu1 %v3811_v44  ;;  %v3803_v0 = vor.u32 %v4018_v31, %v3800_v57 }
 0x462   :  { %2526 = vmatmul.bf16.vlgmr.msra.gmra.mxu2 %v5255_v10  ;;  %v1945_v19 = vadd.f32 %v1894_v5, %v1751_v21  ;;  %v1879_v43 = vadd.f32 %v1878_v24, %v5125_v26  ;;  %v1941_v4 = vadd.f32 %v1928_v8, %v1785_v50  ;;  %v3728_v21 = vld [vmem:[%s5659_s22 + $0x118] sm:$0xf0]  ;;  %2615 = vmatpush.bf16.msra.mxu3 %v3659_v48  ;;  %v4036_v50 = vld [vmem:[%s5659_s22 + $0x234] sm:$0xf]  ;;  %v4034_v48 = vld [vmem:[%s5659_s22 + $0x224] sm:$0xf] }
 0x463   :  { %2662 = vmatpush.bf16.msra.mxu2 %v3907_v46  ;;  %v3731_v2 = vor.u32 %v4000_v3, %v3728_v21  ;;  %v3888_v5 = vld [vmem:[%s5659_s22 + $0x258] sm:$0xf0]  ;;  %v1958_v25 = vmax.f32 %v1940_v17, 0.0  ;;  %v3784_v46 = vld [vmem:[%s5659_s22 + $0x188] sm:$0xf0]  ;;  %v3883_v8 = vor.u32 %v4038_v54, %v3880_v32 }
 0x464   :  { %v1963_v56 = vmax.f32 %v1945_v19, 0.0  ;;  %v1950_v63 = vadd.f32 %v1879_v43, %v1736_v15  ;;  %2631 = vmatpush.bf16.msrb.mxu0 %v3739_v51  ;;  %v3891_v52 = vor.u32 %v4040_v42, %v3888_v5  ;;  %v1959_v43 = vmax.f32 %v1941_v4, 0.0  ;;  %v3872_v51 = vld [vmem:[%s5659_s22 + $0x238] sm:$0xf0] }
 0x465   :  { %2649 = vmatpush.bf16.msrb.mxu1 %v3803_v0  ;;  %v3787_v15 = vor.u32 %v4014_v16, %v3784_v46  ;;  %v3875_v17 = vor.u32 %v4036_v50, %v3872_v51  ;;  %v3867_v0 = vor.u32 %v4034_v48, %v3864_v34  ;;  %v2702_v34 = vld [vmem:[%s5660_s11] sm:$0xf] }
 0x466   :  { %v5319_v13 = vpack.c.bf16 %v1963_v56, %v1957_v14  ;;  %v1911_v59 = vpop.f32.mrf.mxu2  ;;  %v1968_v39 = vmax.f32 %v1950_v63, 0.0  ;;  %v1790_v63 = vadd.f32 %v5078_v6, %v5135_v28 }
 0x467   :  { %v1896_v9 = vpop.f32.mrf.mxu1  ;;  %v1912_v30 = vadd.f32 %v1911_v59, %v5050_v27  ;;  %v1929_v58 = vpop.f32.mrf.mxu3  ;;  %2663 = vmatpush.bf16.msra.mxu2 %v3899_v1  ;;  %v1772_v59 = vadd.f32 %v5026_v7, %v5135_v28  ;;  %v4032_v7 = vld [vmem:[%s5659_s22 + $0x214] sm:$0xf]  ;;  %v4030_v28 = vld [vmem:[%s5659_s22 + $0x204] sm:$0xf] }
 0x468   :  { %v1930_v11 = vadd.f32 %v1929_v58, %v5050_v27  ;;  %2544 = vmatmul.bf16.vlgmr.msrb.gmra.mxu3 %v5319_v13  ;;  %v3792_v27 = vld [vmem:[%s5659_s22 + $0x198] sm:$0xf0]  ;;  %v1897_v33 = vadd.f32 %v1896_v9, %v5125_v26  ;;  %2632 = vmatpush.bf16.msrb.mxu0 %v3731_v2  ;;  %v1980_v23 = vpack.c.bf16 %v1968_v39, %v1968_v39 }
 0x469   :  { %v1880_v61 = vpop.f32.mrf.mxu0  ;;  %v1946_v24 = vadd.f32 %v1912_v30, %v1769_v40  ;;  %v3795_v41 = vor.u32 %v4016_v12, %v3792_v27 }
 0x46a   :  { %v1947_v36 = vadd.f32 %v1930_v11, %v1787_v49  ;;  %v1951_v45 = vadd.f32 %v1897_v33, %v1754_v18  ;;  %v3856_v49 = vld [vmem:[%s5659_s22 + $0x218] sm:$0xf0]  ;;  %v3848_v61 = vld [vmem:[%s5659_s22 + $0x208] sm:$0xf0] }
 0x46b   :  { %v1964_v19 = vmax.f32 %v1946_v24, 0.0  ;;  %2664 = vmatpush.bf16.msra.mxu2 %v3891_v52  ;;  %2650 = vmatpush.bf16.msrb.mxu1 %v3795_v41  ;;  %v3859_v6 = vor.u32 %v4032_v7, %v3856_v49  ;;  %v3851_v12 = vor.u32 %v4030_v28, %v3848_v61  ;;  %v2307_v24 = vunpack.c.h.b16 %v5105_v62 }
 0x46c   :  { %v1965_v44 = vmax.f32 %v1947_v36, 0.0  ;;  %2633 = vmatpush.bf16.msrb.mxu0 %v3723_v53  ;;  %v1969_v47 = vmax.f32 %v1951_v45, 0.0 }
 0x46d   :  { %v5368_v22 = vpack.c.bf16 %v1964_v19, %v1958_v25  ;;  %v2389_v2 = vpack.c.b16 %v2307_v24, %v2307_v24 }
 0x46e   :  { %v1977_v14 = vpack.c.bf16 %v1965_v44, %v1959_v43  ;;  %v1914_v56 = vpop.f32.mrf.mxu2  ;;  %v1981_v30 = vpack.c.bf16 %v1969_v47, %v1969_v47 }
 0x46f   :  { %v1898_v29 = vpop.f32.mrf.mxu1  ;;  %v1932_v31 = vpop.f32.mrf.mxu3  ;;  %2562 = vmatmul.bf16.vlgmr.msra.gmra.mxu0 %v5368_v22  ;;  %v1915_v57 = vadd.f32 %v1914_v56, %v5125_v26  ;;  %2665 = vmatpush.bf16.msra.mxu2 %v3883_v8  ;;  %v2480_v27 = vsel %vm348_vm3, %v2389_v2, 0 }
 0x470   :  { %3908 = vmatmul.msk.bf16.vlgmr.msra.gmra.mxu1 %vm536_vm7, %v1977_v14  ;;  %v1933_v40 = vadd.f32 %v1932_v31, %v5125_v26  ;;  %2687 = vmatpush.bf16.msrb.mxu3 %v2480_v27 }
 0x471   :  { %2651 = vmatpush.bf16.msrb.mxu1 %v3787_v15  ;;  %v1952_v9 = vadd.f32 %v1915_v57, %v1772_v59 }
 0x472   :  { %2531 = vmatmul.bf16.gmra.mxu2 %v1980_v23  ;;  %v1953_v26 = vadd.f32 %v1933_v40, %v1790_v63 }
 0x473   :  { %2666 = vmatpush.bf16.msra.mxu2 %v3875_v17  ;;  %v1970_v4 = vmax.f32 %v1952_v9, 0.0 }
 0x474   :  { %v1971_v11 = vmax.f32 %v1953_v26, 0.0 }
 0x475   :  { %v1982_v3 = vpack.c.bf16 %v1970_v4, %v1970_v4 }
 0x476   :  { %v1916_v58 = vpop.f32.mrf.mxu2  ;;  %v1983_v21 = vpack.c.bf16 %v1971_v11, %v1971_v11 }
 0x477   :  { %v1934_v1 = vpop.f32.mrf.mxu3  ;;  %2667 = vmatpush.bf16.msra.mxu2 %v3867_v0 }
 0x478   :  { %2549 = vmatmul.bf16.gmra.mxu3 %v1981_v30 }
 0x47b   :  { %2668 = vmatpush.bf16.msra.mxu2 %v3859_v6 }
 0x47f   :  { %2567 = vmatmul.bf16.gmra.mxu0 %v1982_v3  ;;  %2669 = vmatpush.bf16.msra.mxu2 %v3851_v12 }
 0x480   :  { %3909 = vmatmul.msk.bf16.gmra.mxu1 %vm536_vm7, %v1983_v21 }
 0x482   :  { %2598 = vmatmul.bf16.vlgmr.msrb.gmra.mxu2 %v5114_v20 }
 0x488   :  { %2616 = vmatmul.bf16.vlgmr.msra.gmra.mxu3 %v5127_v35 }
 0x48f   :  { %2634 = vmatmul.bf16.vlgmr.msrb.gmra.mxu0 %v5255_v10 }
 0x490   :  { %2652 = vmatmul.bf16.vlgmr.msrb.gmra.mxu1 %v5319_v13 }
 0x492   :  { %2603 = vmatmul.bf16.gmra.mxu2 %v5245_v55 }
 0x498   :  { %2621 = vmatmul.bf16.gmra.mxu3 %v5253_v60 }
 0x49f   :  { %2639 = vmatmul.bf16.gmra.mxu0 %v1980_v23 }
 0x4a0   :  { %2657 = vmatmul.bf16.gmra.mxu1 %v1981_v30 }
 0x4a2   :  { %2670 = vmatmul.bf16.vlgmr.msra.gmra.mxu2 %v5368_v22 }
 0x4a8   :  { %3910 = vmatmul.msk.bf16.vlgmr.msrb.gmra.mxu3 %vm536_vm7, %v1977_v14 }
 0x4b2   :  { %2675 = vmatmul.bf16.gmra.mxu2 %v1982_v3 }
 0x4b8   :  { %3911 = vmatmul.msk.bf16.gmra.mxu3 %vm536_vm7, %v1983_v21 }
 0x4cc   :  { %v2491_v62 = vpop.f32.mrf.mxu0 }
 0x4cd   :  { %v2509_v20 = vpop.f32.mrf.mxu1 }
 0x4ce   :  { %v2510_v54 = vadd.f32 %v2509_v20, %v2491_v62 }
 0x4d4   :  { %v2493_v35 = vpop.f32.mrf.mxu0 }
 0x4d5   :  { %v2511_v42 = vpop.f32.mrf.mxu1 }
 0x4d6   :  { %v2512_v41 = vadd.f32 %v2511_v42, %v2493_v35 }
 0x4dc   :  { %v2496_v10 = vpop.f32.mrf.mxu0 }
 0x4dd   :  { %v2514_v5 = vpop.f32.mrf.mxu1 }
 0x4de   :  { %v2515_v16 = vadd.f32 %v2514_v5, %v2496_v10 }
 0x4e4   :  { %v2498_v25 = vpop.f32.mrf.mxu0 }
 0x4e5   :  { %v2527_v13 = vpop.f32.mrf.mxu2  ;;  %v2516_v55 = vpop.f32.mrf.mxu1 }
 0x4e6   :  { %v2528_v44 = vadd.f32 %v2527_v13, %v2510_v54 }
 0x4eb   :  { %v2545_v33 = vpop.f32.mrf.mxu3 }
 0x4ec   :  { %v2563_v36 = vpop.f32.mrf.mxu0  ;;  %v2546_v14 = vadd.f32 %v2545_v33, %v2528_v44 }
 0x4ed   :  { %v2529_v60 = vpop.f32.mrf.mxu2  ;;  %v2581_v52 = vpop.f32.mrf.mxu1 }
 0x4ee   :  { %v2530_v18 = vadd.f32 %v2529_v60, %v2512_v41  ;;  %v2564_v31 = vadd.f32 %v2563_v36, %v2546_v14 }
 0x4f0   :  { %v5421_v17 = vadd.f32 %v2581_v52, %v2564_v31 }
 0x4f3   :  { %v2547_v37 = vpop.f32.mrf.mxu3 }
 0x4f4   :  { %v2565_v39 = vpop.f32.mrf.mxu0  ;;  %v2548_v46 = vadd.f32 %v2547_v37, %v2530_v18 }
 0x4f5   :  { %v2532_v38 = vpop.f32.mrf.mxu2  ;;  %v2583_v19 = vpop.f32.mrf.mxu1 }
 0x4f6   :  { %v2533_v43 = vadd.f32 %v2532_v38, %v2515_v16  ;;  %v2566_v23 = vadd.f32 %v2565_v39, %v2548_v46  ;;  %v2707_v46 = vpop.permute.xlu2 %2706 }
 0x4f8   :  { %v5418_v50 = vadd.f32 %v2583_v19, %v2566_v23 }
 0x4fa   :  { %v2698_v48 = vpack.c.bf16 %v5418_v50, %v5421_v17 }
 0x4fb   :  { %v2550_v32 = vpop.f32.mrf.mxu3 }
 0x4fc   :  { %v2551_v53 = vadd.f32 %v2550_v32, %v2533_v43  ;;  %v2568_v45 = vpop.f32.mrf.mxu0 }
 0x4fd   :  { %v2534_v22 = vpop.f32.mrf.mxu2  ;;  %v2586_v56 = vpop.f32.mrf.mxu1 }
 0x4fe   :  { %v2569_v8 = vadd.f32 %v2568_v45, %v2551_v53  ;;  %v2746_v22 = vld [vmem:[%s5661_s21] sm:$0x3]  ;;  %s4081_s21 = smov 117  }
 0x4ff   :  { %v2748_v14 = vperm.slane %v2746_v22, 0 }
 0x500   :  { %v5414_v29 = vadd.f32 %v2586_v56, %v2569_v8  ;;  %v2749_v8 = vperm.slane %v2746_v22, 1 }
 0x502   :  { %v2700_v15 = vpack.c.bf16 %v5414_v29, %v5414_v29 }
 0x503   :  { %v2552_v51 = vpop.f32.mrf.mxu3 }
 0x504   :  { %v2570_v47 = vpop.f32.mrf.mxu0  ;;  %v2713_v40 = vsel %vm348_vm3, %v2700_v15, 0 }
 0x505   :  { %v2599_v57 = vpop.f32.mrf.mxu2  ;;  %v2588_v59 = vpop.f32.mrf.mxu1  ;;  %2724 = vmatpush.bf16.msra.mxu0 %v2713_v40 }
 0x509   :  { %2725 = vmatpush.bf16.msra.mxu0 %v2698_v48 }
 0x50b   :  { %v2617_v63 = vpop.f32.mrf.mxu3 }
 0x50c   :  { %3912 = vmatmul.msk.bf16.vlgmr.msra.gmra.mxu0 %vm344_vm4, %v2702_v34  ;;  %v2635_v30 = vpop.f32.mrf.mxu0  ;;  %v2618_v42 = vadd.f32 %v2617_v63, %v2599_v57 }
 0x50d   :  { %v2601_v9 = vpop.f32.mrf.mxu2  ;;  %v2653_v26 = vpop.f32.mrf.mxu1 }
 0x50e   :  { %v2636_v13 = vadd.f32 %v2635_v30, %v2618_v42  ;;  %v3919_v42 = vld [vmem:[%s5664_s13 + $0x8] sm:$0xf] }
 0x510   :  { %v2654_v52 = vadd.f32 %v2653_v26, %v2636_v13 }
 0x513   :  { %v2619_v58 = vpop.f32.mrf.mxu3 }
 0x514   :  { %v2637_v1 = vpop.f32.mrf.mxu0  ;;  %v2620_v27 = vadd.f32 %v2619_v58, %v2601_v9 }
 0x515   :  { %v2604_v0 = vpop.f32.mrf.mxu2  ;;  %v2655_v7 = vpop.f32.mrf.mxu1 }
 0x516   :  { %v2638_v10 = vadd.f32 %v2637_v1, %v2620_v27  ;;  %v3163_v1 = vld [vmem:[%s5662_s14] sm:$0xff] }
 0x518   :  { %v2656_v55 = vadd.f32 %v2655_v7, %v2638_v10  ;;  %v3180_v7 = vld [vmem:[%s5663_s16 + $0x10] sm:$0xff] }
 0x51b   :  { %v2622_v49 = vpop.f32.mrf.mxu3 }
 0x51c   :  { %v2640_v11 = vpop.f32.mrf.mxu0  ;;  %v2623_v2 = vadd.f32 %v2622_v49, %v2604_v0  ;;  %v3178_v49 = vld [vmem:[%s5663_s16] sm:$0xff] }
 0x51d   :  { %v2606_v4 = vpop.f32.mrf.mxu2  ;;  %v2658_v6 = vpop.f32.mrf.mxu1 }
 0x51e   :  { %v2641_v20 = vadd.f32 %v2640_v11, %v2623_v2  ;;  %v3179_v4 = vld [vmem:[%s5663_s16 + $0x8] sm:$0xff]  ;;  %v2772_v11 = vld [vmem:[%s5664_s13] sm:$0xf] }
 0x520   :  { %v2659_v5 = vadd.f32 %v2658_v6, %v2641_v20 }
 0x523   :  { %v2624_v28 = vpop.f32.mrf.mxu3 }
 0x524   :  { %v2642_v3 = vpop.f32.mrf.mxu0 }
 0x525   :  { %v2671_v61 = vpop.f32.mrf.mxu2  ;;  %v2660_v21 = vpop.f32.mrf.mxu1 }
 0x526   :  { %v2672_v39 = vadd.f32 %v2671_v61, %v2654_v52  ;;  %v3914_v61 = vld [vmem:[%s5664_s13 + $0x4] sm:$0xf] }
 0x52b   :  { %v2689_v12 = vpop.f32.mrf.mxu3 }
 0x52c   :  { %v5436_v16 = vadd.f32 %v2689_v12, %v2672_v39 }
 0x52d   :  { %v2673_v24 = vpop.f32.mrf.mxu2 }
 0x52e   :  { %v2674_v37 = vadd.f32 %v2673_v24, %v2656_v55 }
 0x533   :  { %v2691_v62 = vpop.f32.mrf.mxu3 }
 0x534   :  { %v5433_v19 = vadd.f32 %v2691_v62, %v2674_v37  ;;  %v3922_v37 = vld [vmem:[%s5664_s13 + $0xc] sm:$0xf] }
 0x535   :  { %v2676_v35 = vpop.f32.mrf.mxu2 }
 0x536   :  { %v2677_v25 = vadd.f32 %v2676_v35, %v2659_v5  ;;  %v2699_v54 = vpack.c.bf16 %v5433_v19, %v5436_v16 }
 0x53b   :  { %v2694_v33 = vpop.f32.mrf.mxu3 }
 0x53c   :  { %v5429_v36 = vadd.f32 %v2694_v33, %v2677_v25 }
 0x53d   :  { %v2678_v60 = vpop.f32.mrf.mxu2 }
 0x53e   :  { %v2701_v38 = vpack.c.bf16 %v5429_v36, %v5429_v36 }
 0x540   :  { %v2716_v41 = vsel %vm348_vm3, %v2701_v38, 0 }
 0x541   :  { %2737 = vmatpush.bf16.msra.mxu1 %v2716_v41 }
 0x543   :  { %v2696_v18 = vpop.f32.mrf.mxu3 }
 0x545   :  { %2738 = vmatpush.bf16.msra.mxu1 %v2699_v54 }
 0x548   :  { %3913 = vmatmul.msk.bf16.vlgmr.msra.gmra.mxu1 %vm344_vm4, %v2702_v34 }
 0x589   :  { %v2727_v43 = vpop.f32.mrf.mxu0 }
 0x58a   :  { %v2728_v32 = vadd.f32 %v2727_v43, %v2707_v46 }
 0x58c   :  { %v2744_v45 = vmax.f32 %v2728_v32, 0.0 }
 0x58e   :  { %v2752_v31 = vmul.f32 %v2748_v14, %v2744_v45 }
 0x591   :  { %v2729_v44 = vpop.f32.mrf.mxu0 }
 0x592   :  { %v3925_v44 = vld [vmem:[%s5664_s13 + $0x10] sm:$0xf] }
 0x5c5   :  { %v2740_v53 = vpop.f32.mrf.mxu1 }
 0x5c6   :  { %v2741_v56 = vadd.f32 %v2740_v53, %v2707_v46 }
 0x5c8   :  { %v2745_v23 = vmax.f32 %v2741_v56, 0.0 }
 0x5ca   :  { %v2753_v15 = vmul.f32 %v2749_v8, %v2745_v23  ;;  %v3928_v8 = vld [vmem:[%s5664_s13 + $0x14] sm:$0xf] }
 0x5cc   :  { %v2754_v51 = vpack.c.bf16 %v2753_v15, %v2752_v31 }
 0x5cd   :  { %v2742_v57 = vpop.f32.mrf.mxu1 }
 0x5ce   :  { %v2757_v47 = vunpack.c.h.b16 %v2754_v51  ;;  %v2756_v40 = vunpack.c.l.b16 %v2754_v51 }
 0x5d0   :  { %v2759_v59 = vpack.c.b16 %v2757_v47, %v2757_v47  ;;  %v2758_v48 = vpack.c.b16 %v2756_v40, %v2756_v40 }
 0x5d2   :  { %2762 = vrot.lane.b32.xlu1 %v2759_v59, %s4080_s10  ;;  %2760 = vrot.lane.b32.xlu0 %v2758_v48, %s4080_s10  ;;  %v3931_v59 = vld [vmem:[%s5664_s13 + $0x18] sm:$0xf] }
 0x644   :  { %v2763_v34 = vpop.permute.xlu1 %2762  ;;  %v2761_v63 = vpop.permute.xlu0 %2760 }
 0x645   :  { %v2765_v9 = vsel %vm2764_vm15, %v2761_v63, %v2763_v34  ;;  %v2768_v30 = vsel %vm2764_vm15, 0, %v2761_v63  ;;  %v3934_v34 = vld [vmem:[%s5664_s13 + $0x1c] sm:$0xf]  ;;  %v3937_v63 = vld [vmem:[%s5664_s13 + $0x20] sm:$0xf] }
 0x646   :  { %v2771_v26 = vsel %vm2769_vm0, %v2765_v9, 0  ;;  %2777 = vrot.lane.b32.xlu0 %v2768_v30, %s4072_s25  ;;  %v2820_v58 = vsel %vm348_vm3, %v2768_v30, 0 }
 0x647   :  { %2831 = vmatpush.bf16.msrb.mxu0 %v2820_v58  ;;  %2854 = vrot.lane.b32.xlu1 %v2771_v26, %s4073_s20  ;;  %v2822_v0 = vsel %vm348_vm3, %v2771_v26, 0 }
 0x648   :  { %2779 = vrot.lane.b32.xlu2 %v2771_v26, %s4072_s25  ;;  %2844 = vmatpush.bf16.msrb.mxu1 %v2822_v0 }
 0x64a   :  { %3917 = vmatmul.msk.bf16.vlgmr.msrb.gmra.mxu0 %vm536_vm7, %v2772_v11 }
 0x64b   :  { %3918 = vmatmul.msk.bf16.vlgmr.msrb.gmra.mxu1 %vm536_vm7, %v2772_v11 }
 0x64e   :  { %2943 = vrot.lane.b32.xlu0 %v2771_v26, %s4081_s21 }
 0x64f   :  { %2898 = vrot.lane.b32.xlu1 %v2771_v26, %s4082_s12 }
 0x650   :  { %2852 = vrot.lane.b32.xlu2 %v2768_v30, %s4073_s20 }
 0x656   :  { %2896 = vrot.lane.b32.xlu0 %v2768_v30, %s4082_s12 }
 0x657   :  { %3033 = vrot.lane.b32.xlu1 %v2771_v26, %s4076_s2 }
 0x658   :  { %2941 = vrot.lane.b32.xlu2 %v2768_v30, %s4081_s21 }
 0x65e   :  { %3031 = vrot.lane.b32.xlu0 %v2768_v30, %s4076_s2 }
 0x65f   :  { %2986 = vrot.lane.b32.xlu1 %v2768_v30, %s4083_s24 }
 0x660   :  { %2988 = vrot.lane.b32.xlu2 %v2771_v26, %s4083_s24 }
 0x666   :  { %3077 = vrot.lane.b32.xlu0 %v2771_v26, %s4084_s6 }
 0x667   :  { %3120 = vrot.lane.b32.xlu1 %v2768_v30, %s4085_s26 }
 0x668   :  { %3122 = vrot.lane.b32.xlu2 %v2771_v26, %s4085_s26 }
 0x66e   :  { %3166 = vperm.xlu0 %4066, %v3163_v1  }
 0x66f   :  { %3193 = vperm.xlu1 %4067, %v3180_v7  }
 0x670   :  { %3075 = vrot.lane.b32.xlu2 %v2768_v30, %s4084_s6 }
 0x676   :  { %3183 = vperm.xlu0 %4066, %v3178_v49  }
 0x678   :  { %3188 = vperm.xlu2 %4068, %v3179_v4  }
 0x6a2   :  { %v2780_v6 = vpop.permute.xlu2 %2779 }
 0x6a3   :  { %v2789_v28 = vsel %vm348_vm3, %v2780_v6, 0 }
 0x6a4   :  { %2811 = vmatpush.bf16.msra.mxu3 %v2789_v28 }
 0x6a7   :  { %3916 = vmatmul.msk.bf16.vlgmr.msra.gmra.mxu3 %vm536_vm7, %v3914_v61 }
 0x6aa   :  { %v2853_v3 = vpop.permute.xlu2 %2852 }
 0x6b2   :  { %v2942_v21 = vpop.permute.xlu2 %2941 }
 0x6b8   :  { %v2778_v12 = vpop.permute.xlu0 %2777 }
 0x6b9   :  { %v2781_v24 = vsel %vm530_vm6, %v2778_v12, %v2780_v6  ;;  %v2855_v2 = vpop.permute.xlu1 %2854  ;;  %vm3079_vm6 = vcmask 875520  }
 0x6ba   :  { %v2786_v27 = vsel %vm348_vm3, %v2781_v24, 0  ;;  %v2856_v62 = vsel %vm747_vm8, %v2853_v3, %v2855_v2  ;;  %v2864_v20 = vsel %vm348_vm3, %v2855_v2, 0  ;;  %v2989_v10 = vpop.permute.xlu2 %2988  ;;  %vm3124_vm8 = vcmask 867328  }
 0x6bb   :  { %v2861_v35 = vsel %vm348_vm3, %v2856_v62, 0  ;;  %2798 = vmatpush.bf16.msrb.mxu2 %v2786_v27  ;;  %2886 = vmatpush.bf16.msrb.mxu3 %v2864_v20  ;;  %v2999_v52 = vsel %vm348_vm3, %v2989_v10, 0 }
 0x6be   :  { %3915 = vmatmul.msk.bf16.vlgmr.msrb.gmra.mxu2 %vm536_vm7, %v3914_v61  ;;  %3921 = vmatmul.msk.bf16.vlgmr.msrb.gmra.mxu3 %vm536_vm7, %v3919_v42 }
 0x6bf   :  { %2873 = vmatpush.bf16.msra.mxu2 %v2861_v35 }
 0x6c0   :  { %v2944_v5 = vpop.permute.xlu0 %2943 }
 0x6c1   :  { %v2946_v13 = vsel %vm2945_vm1, %v2942_v21, %v2944_v5  ;;  %v2954_v25 = vsel %vm348_vm3, %v2944_v5, 0  ;;  %v2899_v55 = vpop.permute.xlu1 %2898 }
 0x6c2   :  { %v2951_v33 = vsel %vm348_vm3, %v2946_v13, 0  ;;  %v2909_v60 = vsel %vm348_vm3, %v2899_v55, 0  ;;  %2976 = vmatpush.bf16.msra.mxu3 %v2954_v25  ;;  %v3123_v43 = vpop.permute.xlu2 %3122 }
 0x6c3   :  { %2931 = vmatpush.bf16.msra.mxu1 %v2909_v60  ;;  %2963 = vmatpush.bf16.msrb.mxu2 %v2951_v33  ;;  %v3133_v46 = vsel %vm348_vm3, %v3123_v43, 0 }
 0x6c6   :  { %3924 = vmatmul.msk.bf16.vlgmr.msra.gmra.mxu1 %vm536_vm7, %v3922_v37 }
 0x6c7   :  { %3021 = vmatpush.bf16.msrb.mxu1 %v2999_v52  ;;  %v2833_v26 = vpop.f32.mrf.mxu0 }
 0x6c8   :  { %v2897_v38 = vpop.permute.xlu0 %2896  ;;  %v2846_v9 = vpop.f32.mrf.mxu1 }
 0x6c9   :  { %v2901_v39 = vsel %vm2900_vm2, %v2897_v38, %v2899_v55  ;;  %v3034_v41 = vpop.permute.xlu1 %3033 }
 0x6ca   :  { %v2906_v54 = vsel %vm348_vm3, %v2901_v39, 0  ;;  %v3043_v18 = vsel %vm348_vm3, %v3034_v41, 0  ;;  %v3076_v23 = vpop.permute.xlu2 %3075 }
 0x6cb   :  { %2918 = vmatpush.bf16.msra.mxu0 %v2906_v54  ;;  %3065 = vmatpush.bf16.msrb.mxu3 %v3043_v18 }
 0x6ce   :  { %3920 = vmatmul.msk.bf16.vlgmr.msra.gmra.mxu2 %vm536_vm7, %v3919_v42  ;;  %3927 = vmatmul.msk.bf16.vlgmr.msra.gmra.mxu3 %vm536_vm7, %v3925_v44 }
 0x6cf   :  { %3155 = vmatpush.bf16.msra.mxu3 %v3133_v46  ;;  %3923 = vmatmul.msk.bf16.vlgmr.msra.gmra.mxu0 %vm536_vm7, %v3922_v37  ;;  %v2835_v0 = vpop.f32.mrf.mxu0 }
 0x6d0   :  { %v3032_v32 = vpop.permute.xlu0 %3031  ;;  %v2848_v30 = vpop.f32.mrf.mxu1 }
 0x6d1   :  { %v3035_v22 = vsel %vm1122_vm11, %v3032_v32, %v3034_v41  ;;  %v2987_v53 = vpop.permute.xlu1 %2986 }
 0x6d2   :  { %v3040_v45 = vsel %vm348_vm3, %v3035_v22, 0  ;;  %v2991_v14 = vsel %vm2990_vm5, %v2987_v53, %v2989_v10 }
 0x6d3   :  { %v2996_v56 = vsel %vm348_vm3, %v2991_v14, 0  ;;  %3052 = vmatpush.bf16.msra.mxu2 %v3040_v45 }
 0x6d4   :  { %3008 = vmatpush.bf16.msrb.mxu0 %v2996_v56 }
 0x6d6   :  { %3930 = vmatmul.msk.bf16.vlgmr.msrb.gmra.mxu1 %vm536_vm7, %v3928_v8 }
 0x6d8   :  { %v3078_v31 = vpop.permute.xlu0 %3077 }
 0x6d9   :  { %v3080_v15 = vsel %vm3079_vm6, %v3076_v23, %v3078_v31  ;;  %v3088_v51 = vsel %vm348_vm3, %v3078_v31, 0  ;;  %v3121_v57 = vpop.permute.xlu1 %3120 }
 0x6da   :  { %v3085_v47 = vsel %vm348_vm3, %v3080_v15, 0  ;;  %3110 = vmatpush.bf16.msra.mxu1 %v3088_v51  ;;  %v3125_v40 = vsel %vm3124_vm8, %v3121_v57, %v3123_v43 }
 0x6db   :  { %3097 = vmatpush.bf16.msra.mxu0 %v3085_v47  ;;  %v3130_v48 = vsel %vm348_vm3, %v3125_v40, 0  ;;  %v4046_v47 = vld [vmem:[%s5665_s15] sm:$0xff] }
 0x6de   :  { %3926 = vmatmul.msk.bf16.vlgmr.msrb.gmra.mxu2 %vm536_vm7, %v3925_v44  ;;  %3933 = vmatmul.msk.bf16.vlgmr.msrb.gmra.mxu3 %vm536_vm7, %v3931_v59 }
 0x6df   :  { %3142 = vmatpush.bf16.msrb.mxu2 %v3130_v48  ;;  %3929 = vmatmul.msk.bf16.vlgmr.msrb.gmra.mxu0 %vm536_vm7, %v3928_v8 }
 0x6e0   :  { %v3167_v22 = vpop.permute.xlu0 %3166 }
 0x6e6   :  { %3936 = vmatmul.msk.bf16.vlgmr.msra.gmra.mxu1 %vm536_vm7, %v3934_v34 }
 0x6ee   :  { %3932 = vmatmul.msk.bf16.vlgmr.msra.gmra.mxu2 %vm536_vm7, %v3931_v59  ;;  %3939 = vmatmul.msk.bf16.vlgmr.msra.gmra.mxu3 %vm536_vm7, %v3937_v63 }
 0x6ef   :  { %3935 = vmatmul.msk.bf16.vlgmr.msra.gmra.mxu0 %vm536_vm7, %v3934_v34 }
 0x6fe   :  { %3938 = vmatmul.msk.bf16.vlgmr.msrb.gmra.mxu2 %vm536_vm7, %v3937_v63  ;;  %v3177_v63 = vld [vmem:[%s5665_s15 + $0x8] sm:$0xf] }
 0x72a   :  { %v2813_v58 = vpop.f32.mrf.mxu3 }
 0x72b   :  { %v2847_v35 = vadd.f32 %v2846_v9, %v2813_v58 }
 0x732   :  { %v2815_v1 = vpop.f32.mrf.mxu3 }
 0x741   :  { %v2800_v7 = vpop.f32.mrf.mxu2  ;;  %v2888_v49 = vpop.f32.mrf.mxu3 }
 0x742   :  { %v2893_v42 = vadd.f32 %v2888_v49, %v2847_v35  ;;  %v2834_v54 = vadd.f32 %v2833_v26, %v2800_v7  ;;  %v3201_v26 = vunpack.c.l.b16 %v3177_v63  ;;  %v3343_v63 = vld [vmem:[%s5666_s19] sm:$0xff] }
 0x743   :  { %v2933_v4 = vpop.f32.mrf.mxu1 }
 0x744   :  { %v2938_v25 = vadd.f32 %v2933_v4, %v2893_v42  ;;  %v3203_v7 = vpack.c.b16 %v3201_v26, %v3201_v26 }
 0x749   :  { %v2802_v11 = vpop.f32.mrf.mxu2  ;;  %v2890_v6 = vpop.f32.mrf.mxu3 }
 0x74a   :  { %v3358_v11 = vld [vmem:[%s5666_s19 + $0x78] sm:$0xff]  ;;  %v3357_v6 = vld [vmem:[%s5666_s19 + $0x70] sm:$0xff] }
 0x74b   :  { %v2935_v28 = vpop.f32.mrf.mxu1 }
 0x74c   :  { %v2920_v61 = vpop.f32.mrf.mxu0  ;;  %v3189_v28 = vpop.permute.xlu2 %3188 }
 0x751   :  { %v2875_v3 = vpop.f32.mrf.mxu2  ;;  %v2978_v21 = vpop.f32.mrf.mxu3 }
 0x752   :  { %v2983_v33 = vadd.f32 %v2978_v21, %v2938_v25  ;;  %v2892_v18 = vadd.f32 %v2875_v3, %v2834_v54  ;;  %v3194_v3 = vpop.permute.xlu1 %3193  ;;  %v3184_v21 = vpop.permute.xlu0 %3183 }
 0x753   :  { %v3023_v12 = vpop.f32.mrf.mxu1 }
 0x754   :  { %v2922_v24 = vpop.f32.mrf.mxu0  ;;  %v3028_v37 = vadd.f32 %v3023_v12, %v2983_v33  ;;  %v2937_v53 = vadd.f32 %v2920_v61, %v2892_v18  ;;  %v3356_v61 = vld [vmem:[%s5666_s19 + $0x68] sm:$0xff] }
 0x759   :  { %v2877_v2 = vpop.f32.mrf.mxu2  ;;  %v2980_v27 = vpop.f32.mrf.mxu3 }
 0x75a   :  { %v3355_v27 = vld [vmem:[%s5666_s19 + $0x60] sm:$0xff] }
 0x75b   :  { %v3025_v62 = vpop.f32.mrf.mxu1 }
 0x75c   :  { %v3010_v20 = vpop.f32.mrf.mxu0 }
 0x761   :  { %v2965_v10 = vpop.f32.mrf.mxu2  ;;  %v3067_v5 = vpop.f32.mrf.mxu3 }
 0x762   :  { %v3072_v39 = vadd.f32 %v3067_v5, %v3028_v37  ;;  %v2982_v56 = vadd.f32 %v2965_v10, %v2937_v53  ;;  %v3352_v53 = vld [vmem:[%s5666_s19 + $0x48] sm:$0xff] }
 0x763   :  { %v3112_v13 = vpop.f32.mrf.mxu1 }
 0x764   :  { %v3012_v55 = vpop.f32.mrf.mxu0  ;;  %v3117_v43 = vadd.f32 %v3112_v13, %v3072_v39  ;;  %v3027_v51 = vadd.f32 %v3010_v20, %v2982_v56  ;;  %v3361_v56 = vld [vmem:[%s5666_s19 + $0x90] sm:$0xff] }
 0x769   :  { %v2967_v60 = vpop.f32.mrf.mxu2  ;;  %v3069_v52 = vpop.f32.mrf.mxu3 }
 0x76a   :  { %v3264_v60 = vld [vmem:[%s5667_s17] sm:$0xff] }
 0x76b   :  { %v3114_v38 = vpop.f32.mrf.mxu1 }
 0x76c   :  { %v3099_v41 = vpop.f32.mrf.mxu0 }
 0x771   :  { %v3054_v44 = vpop.f32.mrf.mxu2  ;;  %v3157_v46 = vpop.f32.mrf.mxu3 }
 0x772   :  { %v3162_v32 = vadd.f32 %v3157_v46, %v3117_v43  ;;  %v3071_v40 = vadd.f32 %v3054_v44, %v3027_v51  ;;  %v3367_v44 = vld [vmem:[%s5666_s19 + $0xc0] sm:$0xff]  ;;  %v3364_v46 = vld [vmem:[%s5666_s19 + $0xa8] sm:$0xff] }
 0x773   :  { %v3348_v51 = vld [vmem:[%s5666_s19 + $0x28] sm:$0xff] }
 0x774   :  { %v3170_v45 = vadd.f32 %v3167_v22, %v3162_v32  ;;  %v3101_v14 = vpop.f32.mrf.mxu0  ;;  %v3116_v59 = vadd.f32 %v3099_v41, %v3071_v40  ;;  %v3353_v32 = vld [vmem:[%s5666_s19 + $0x50] sm:$0xff] }
 0x775   :  { %v3362_v14 = vld [vmem:[%s5666_s19 + $0x98] sm:$0xff]  ;;  %v3345_v40 = vld [vmem:[%s5666_s19 + $0x10] sm:$0xff] }
 0x776   :  { %v3172_v8 = vmax.f32 %v3170_v45, 0.0  ;;  %v3351_v45 = vld [vmem:[%s5666_s19 + $0x40] sm:$0xff] }
 0x778   :  { %v3174_v23 = vpack.c.bf16 %v3172_v8, %v3172_v8  ;;  %v3350_v8 = vld [vmem:[%s5666_s19 + $0x38] sm:$0xff] }
 0x779   :  { %v3056_v31 = vpop.f32.mrf.mxu2  ;;  %v3159_v15 = vpop.f32.mrf.mxu3 }
 0x77a   :  { %v3214_v57 = vsel %vm348_vm3, %v3174_v23, 0  ;;  %v3360_v23 = vld [vmem:[%s5666_s19 + $0x88] sm:$0xff]  ;;  %v3349_v31 = vld [vmem:[%s5666_s19 + $0x30] sm:$0xff]  ;;  %v3359_v15 = vld [vmem:[%s5666_s19 + $0x80] sm:$0xff] }
 0x77b   :  { %3241 = vmatpush.bf16.msrb.mxu1 %v3214_v57  ;;  %v3347_v57 = vld [vmem:[%s5666_s19 + $0x20] sm:$0xff] }
 0x77e   :  { %3946 = vmatmul.msk.bf16.vlgmr.msrb.gmra.mxu1 %vm536_vm7, %v4046_v47 }
 0x781   :  { %v3144_v48 = vpop.f32.mrf.mxu2 }
 0x782   :  { %v3161_v34 = vadd.f32 %v3144_v48, %v3116_v59  ;;  %v3344_v59 = vld [vmem:[%s5666_s19 + $0x8] sm:$0xff] }
 0x783   :  { %v3309_v48 = vld [vmem:[%s5668_s18 + $0x8] sm:$0xff] }
 0x784   :  { %v3169_v9 = vadd.f32 %v3167_v22, %v3161_v34  ;;  %v3363_v22 = vld [vmem:[%s5666_s19 + $0xa0] sm:$0xff]  ;;  %v3311_v34 = vld [vmem:[%s5668_s18 + $0x18] sm:$0xff] }
 0x786   :  { %v3171_v30 = vmax.f32 %v3169_v9, 0.0 }
 0x788   :  { %v3173_v58 = vpack.c.bf16 %v3171_v30, %v3171_v30 }
 0x789   :  { %v3146_v0 = vpop.f32.mrf.mxu2 }
 0x78a   :  { %v3211_v1 = vsel %vm348_vm3, %v3173_v58, 0  ;;  %vm3322_vm3 = vcmask 588800  }
 0x78b   :  { %3223 = vmatpush.bf16.msrb.mxu0 %v3211_v1 }
 0x78e   :  { %3944 = vmatmul.msk.bf16.vlgmr.msrb.gmra.mxu0 %vm536_vm7, %v4046_v47  ;;  %3947 = vmatmul.msk.bf16.gmra.mxu1 %vm536_vm7, %v3203_v7  ;;  %v3346_v47 = vld [vmem:[%s5666_s19 + $0x18] sm:$0xff] }
 0x78f   :  { %3378 = vmatpush.msra.mxu0 %v3358_v11 }
 0x791   :  { %3379 = vmatpush.msra.mxu0 %v3357_v6 }
 0x793   :  { %3380 = vmatpush.msra.mxu0 %v3356_v61 }
 0x795   :  { %3381 = vmatpush.msra.mxu0 %v3355_v27  ;;  %v3310_v27 = vld [vmem:[%s5668_s18 + $0x10] sm:$0xff] }
 0x79e   :  { %3945 = vmatmul.msk.bf16.gmra.mxu0 %vm536_vm7, %v3203_v7  ;;  %vm3418_vm7 = vcmask 9216  }
 0x7fb   :  { %v3243_v49 = vpop.f32.mrf.mxu1 }
 0x7fc   :  { %v3244_v62 = vadd.f32 %v3243_v49, %v3184_v21 }
 0x7fe   :  { %v3253_v10 = vadd.f32 %v3244_v62, %v5436_v16 }
 0x800   :  { %v3259_v33 = vmax.f32 %v3253_v10, 0.0 }
 0x803   :  { %v3245_v4 = vpop.f32.mrf.mxu1 }
 0x804   :  { %v3246_v12 = vadd.f32 %v3245_v4, %v3189_v28 }
 0x806   :  { %v3255_v35 = vadd.f32 %v3246_v12, %v5433_v19 }
 0x808   :  { %v3261_v13 = vmax.f32 %v3255_v35, 0.0 }
 0x80b   :  { %v3225_v24 = vpop.f32.mrf.mxu0  ;;  %v3248_v2 = vpop.f32.mrf.mxu1 }
 0x80c   :  { %v3249_v20 = vadd.f32 %v3248_v2, %v3194_v3  ;;  %v3308_v2 = vld [vmem:[%s5668_s18] sm:$0xff] }
 0x80e   :  { %v3257_v42 = vadd.f32 %v3249_v20, %v5429_v36  ;;  %v3226_v36 = vadd.f32 %v3225_v24, %v3184_v21 }
 0x810   :  { %v3263_v5 = vmax.f32 %v3257_v42, 0.0  ;;  %v3252_v39 = vadd.f32 %v3226_v36, %v5421_v17  ;;  %v3354_v17 = vld [vmem:[%s5666_s19 + $0x58] sm:$0xff] }
 0x811   :  { %3382 = vmatpush.msra.mxu0 %v3354_v17 }
 0x812   :  { %3301 = vmatpush.msrb.mxu3 %v3263_v5  ;;  %v3258_v43 = vmax.f32 %v3252_v39, 0.0 }
 0x813   :  { %v3227_v25 = vpop.f32.mrf.mxu0  ;;  %v3250_v55 = vpop.f32.mrf.mxu1  ;;  %3383 = vmatpush.msra.mxu0 %v3353_v32 }
 0x814   :  { %3302 = vmatpush.msrb.mxu3 %v3261_v13  ;;  %v3228_v19 = vadd.f32 %v3227_v25, %v3189_v28 }
 0x815   :  { %3384 = vmatpush.msra.mxu0 %v3352_v53 }
 0x816   :  { %3303 = vmatpush.msrb.mxu3 %v3259_v33  ;;  %v3254_v16 = vadd.f32 %v3228_v19, %v5418_v50  ;;  %v3365_v50 = vld [vmem:[%s5666_s19 + $0xb0] sm:$0xff] }
 0x817   :  { %3949 = vmatmul.msk.f32.vlgmr.msrb.gmra.mxu3 %vm344_vm4, %v3264_v60  ;;  %3385 = vmatpush.msra.mxu0 %v3351_v45 }
 0x818   :  { %v3260_v54 = vmax.f32 %v3254_v16, 0.0 }
 0x819   :  { %3386 = vmatpush.msra.mxu0 %v3350_v8 }
 0x81b   :  { %v3230_v52 = vpop.f32.mrf.mxu0  ;;  %3387 = vmatpush.msra.mxu0 %v3349_v31 }
 0x81c   :  { %v3231_v37 = vadd.f32 %v3230_v52, %v3194_v3 }
 0x81d   :  { %3388 = vmatpush.msra.mxu0 %v3348_v51 }
 0x81e   :  { %v3256_v38 = vadd.f32 %v3231_v37, %v5414_v29  ;;  %v3366_v29 = vld [vmem:[%s5666_s19 + $0xb8] sm:$0xff] }
 0x81f   :  { %3389 = vmatpush.msra.mxu0 %v3347_v57 }
 0x820   :  { %v3262_v41 = vmax.f32 %v3256_v38, 0.0 }
 0x821   :  { %3390 = vmatpush.msra.mxu0 %v3346_v47 }
 0x822   :  { %3281 = vmatpush.msra.mxu2 %v3262_v41 }
 0x823   :  { %v3232_v18 = vpop.f32.mrf.mxu0  ;;  %3391 = vmatpush.msra.mxu0 %v3345_v40 }
 0x824   :  { %3282 = vmatpush.msra.mxu2 %v3260_v54 }
 0x825   :  { %3392 = vmatpush.msra.mxu0 %v3344_v59 }
 0x826   :  { %3283 = vmatpush.msra.mxu2 %v3258_v43 }
 0x827   :  { %3948 = vmatmul.msk.f32.vlgmr.msra.gmra.mxu2 %vm344_vm4, %v3264_v60  ;;  %3393 = vmatpush.msra.mxu0 %v3343_v63  ;;  %vm3372_vm4 = vcmask 1041409  }
 0x828   :  { %3405 = vmatpush.msrb.mxu2 %v3367_v44 }
 0x82a   :  { %3406 = vmatpush.msrb.mxu2 %v3366_v29 }
 0x82c   :  { %3407 = vmatpush.msrb.mxu2 %v3365_v50 }
 0x82e   :  { %3408 = vmatpush.msrb.mxu2 %v3364_v46 }
 0x830   :  { %3409 = vmatpush.msrb.mxu2 %v3363_v22 }
 0x832   :  { %3410 = vmatpush.msrb.mxu2 %v3362_v14 }
 0x834   :  { %3411 = vmatpush.msrb.mxu2 %v3361_v56 }
 0x836   :  { %3412 = vmatpush.msrb.mxu2 %v3360_v23 }
 0x838   :  { %3413 = vmatpush.msrb.mxu2 %v3359_v15 }
 0x89a   :  { %v3305_v9 = vpop.f32.mrf.mxu3 }
 0x89b   :  { %v3313_v30 = vmul.f32 %v3309_v48, %v3305_v9  ;;  %v3315_v26 = vmul.f32 %v3311_v34, %v3305_v9 }
 0x89d   :  { %v3323_v58 = vsel %vm3322_vm3, %v3313_v30, 0.0  ;;  %v3336_v0 = vsel %vm3322_vm3, %v3315_v26, 0.0 }
 0x89e   :  { %v3324_v1 = vrot.slane %v3323_v58, 4  ;;  %v3337_v7 = vrot.slane %v3336_v0, 4 }
 0x8a0   :  { %v3325_v49 = vadd.f32 %v3324_v1, %v3323_v58  ;;  %v3338_v4 = vadd.f32 %v3337_v7, %v3336_v0 }
 0x8a2   :  { %v3326_v11 = vrot.slane %v3325_v49, 2  ;;  %v3339_v6 = vrot.slane %v3338_v4, 2 }
 0x8a4   :  { %v3327_v28 = vadd.f32 %v3326_v11, %v3325_v49  ;;  %v3340_v61 = vadd.f32 %v3339_v6, %v3338_v4 }
 0x8a6   :  { %v3328_v3 = vrot.slane %v3327_v28, 1  ;;  %v3341_v21 = vrot.slane %v3340_v61, 1 }
 0x8a8   :  { %v3329_v12 = vadd.f32 %v3328_v3, %v3327_v28  ;;  %v3342_v24 = vadd.f32 %v3341_v21, %v3340_v61 }
 0x8aa   :  { %v3285_v62 = vpop.f32.mrf.mxu2  ;;  %v3374_v20 = vsel %vm3372_vm4, %v3342_v24, %v3329_v12 }
 0x8ab   :  { %v3312_v35 = vmul.f32 %v3308_v2, %v3285_v62  ;;  %v3314_v42 = vmul.f32 %v3310_v27, %v3285_v62  ;;  %3950 = vmatmul.msk.f32.vlgmr.msrb.gmra.mxu2 %vm3322_vm3, %v3374_v20 }
 0x8ad   :  { %v3316_v10 = vrot.slane %v3312_v35, 4  ;;  %v3330_v5 = vrot.slane %v3314_v42, 4 }
 0x8af   :  { %v3317_v13 = vadd.f32 %v3316_v10, %v3312_v35  ;;  %v3331_v25 = vadd.f32 %v3330_v5, %v3314_v42 }
 0x8b1   :  { %v3318_v55 = vrot.slane %v3317_v13, 2  ;;  %v3332_v33 = vrot.slane %v3331_v25, 2 }
 0x8b3   :  { %v3319_v60 = vadd.f32 %v3318_v55, %v3317_v13  ;;  %v3333_v19 = vadd.f32 %v3332_v33, %v3331_v25 }
 0x8b5   :  { %v3320_v52 = vrot.slane %v3319_v60, 1  ;;  %v3334_v36 = vrot.slane %v3333_v19, 1 }
 0x8b7   :  { %v3321_v37 = vadd.f32 %v3320_v52, %v3319_v60  ;;  %v3335_v16 = vadd.f32 %v3334_v36, %v3333_v19 }
 0x8b9   :  { %v3373_v38 = vsel %vm3372_vm4, %v3335_v16, %v3321_v37 }
 0x8ba   :  { %3394 = vmatmul.f32.vlgmr.msra.gmra.mxu0 %v3373_v38 }
 0x92e   :  { %v3415_v41 = vpop.f32.mrf.mxu2 }
 0x937   :  { %v3395_v39 = vpop.f32.mrf.mxu0 }
 0x938   :  { %v3416_v54 = vadd.f32 %v3415_v41, %v3395_v39 }
 0x93a   :  { %3419 = vst.msk [vmem:[%s5669_s23] sm:$0x3] %vm3418_vm7, %v3416_v54 }

</bundles_post_ra>
